<compile_context>
chip_gen: v6e
topology: v6e:2x2x1
jax: 0.10.0
libtpu: 0.0.40
codegen_flags: <defaults>
</compile_context>

<pallas_src>
import jax
import jax.numpy as jnp
from jax import lax
from jax.experimental import pallas as pl
from jax.experimental.pallas import tpu as pltpu

COURT_DIM = 45
BALL_DIM = 3
POSE_DIM = 204
BBOX_DIM = 20
CAT_DIM = COURT_DIM + BALL_DIM + POSE_DIM + BBOX_DIM   # 272
IN_PAD = 384                                            # 3 * 128, lane aligned
EMBED_DIM = 64
FRAME_OUT_DIM = 128
GRU_HIDDEN = 128
GATE_DIM = 3 * GRU_HIDDEN                               # 384
NUM_CLASSES = 5
MAX_ENC_ROWS = 1024                                     # rows (B*TE) per encoder step
GRU_T_CHUNK = 64                                        # timesteps per GRU grid step


def _round_up(x, m):
    return (x + m - 1) // m * m


def _sigmoid(x):
    # Same closed form in kernel and reference (exp lowers to the EUP).
    return 1.0 / (1.0 + jnp.exp(-x))


def _choose_chunks(B, T):
    """Pick the GRU time chunk, padded T, and the encoder time chunk."""
    t_chunk = GRU_T_CHUNK if T >= GRU_T_CHUNK else _round_up(T, 8)
    t_pad = _round_up(T, t_chunk)
    n_chunks = t_pad // t_chunk
    # Encoder chunk = largest multiple of t_chunk that divides t_pad while
    # keeping B * TE rows per grid step at or below MAX_ENC_ROWS.
    k = 1
    for cand in range(n_chunks, 0, -1):
        if n_chunks % cand == 0 and B * cand * t_chunk <= MAX_ENC_ROWS:
            k = cand
            break
    return t_chunk, t_pad, k * t_chunk


# --------------------------------------------------------------------------
# One-time parameter repacking (NOT on the forward path)
# --------------------------------------------------------------------------
def prepare_params(params, use_bf16=False):
    (wc, bc), (wb, bb), (wp, bp), (wx, bx), (wf, bf) = params["encoder"]
    w1 = jnp.zeros((IN_PAD, 4 * EMBED_DIM), jnp.float32)
    off = 0
    for k, (w, d) in enumerate(((wc, COURT_DIM), (wb, BALL_DIM),
                                (wp, POSE_DIM), (wx, BBOX_DIM))):
        w1 = w1.at[off:off + d, k * EMBED_DIM:(k + 1) * EMBED_DIM].set(w)
        off += d
    b1 = jnp.concatenate([bc, bb, bp, bx], axis=-1)                 # (1, 256)

    w_ih, b_ih, w_hh, b_hh = params["gru"]
    w_fc, b_fc = params["fc"]
    C = w_fc.shape[1]
    c_pad = _round_up(C, 128)
    w_fc_p = jnp.pad(w_fc, ((0, 0), (0, c_pad - C)))
    b_fc_p = jnp.pad(b_fc, ((0, 0), (0, c_pad - C)))

    mm_dtype = jnp.bfloat16 if use_bf16 else jnp.float32
    return {
        "w1": w1.astype(mm_dtype), "b1": b1,
        "wf": wf.astype(mm_dtype), "bf": bf,
        "w_ih": w_ih.astype(mm_dtype), "b_ih": b_ih,
        "w_hh": w_hh, "b_hh": b_hh,
        "w_fc": w_fc_p, "b_fc": b_fc_p,
    }


# --------------------------------------------------------------------------
# Kernel 1: encoder + GRU input projection
#   gx = relu(relu(x @ W1 + b1) @ Wf + bf) @ W_ih + b_ih
# --------------------------------------------------------------------------
def _encoder_gx_kernel(x_ref, w1_ref, b1_ref, wf_ref, bf_ref,
                       wih_ref, bih_ref, gx_ref):
    f32 = jnp.float32
    B, TE, F = x_ref.shape
    x = x_ref[...].reshape(B * TE, F)                               # lane-preserving
    emb = jnp.dot(x, w1_ref[...], preferred_element_type=f32)
    emb = jnp.maximum(emb + b1_ref[...], 0.0).astype(wf_ref.dtype)  # (rows, 256)
    feat = jnp.dot(emb, wf_ref[...], preferred_element_type=f32)
    feat = jnp.maximum(feat + bf_ref[...], 0.0).astype(wih_ref.dtype)  # (rows, 128)
    gx = jnp.dot(feat, wih_ref[...], preferred_element_type=f32) + bih_ref[...]
    gx_ref[...] = gx.reshape(gx_ref.shape).astype(gx_ref.dtype)     # (B, TE, 384)


def encode_gx(court, ball, pose, bbox, prep, t_pad, te):
    """(B, T, D_*) float32 -> gx (B, t_pad, 384) float32."""
    B, T, _ = court.shape
    x = jnp.concatenate([court, ball, pose, bbox], axis=-1)          # (B, T, 272)
    x = jnp.pad(x, ((0, 0), (0, t_pad - T), (0, IN_PAD - CAT_DIM)))
    x = x.astype(prep["w1"].dtype)
    n_steps = t_pad // te

    rows = B * t_pad
    flops = 2 * rows * (IN_PAD * 4 * EMBED_DIM
                        + 4 * EMBED_DIM * FRAME_OUT_DIM
                        + FRAME_OUT_DIM * GATE_DIM)
    w_bytes = sum(int(prep[k].size) * prep[k].dtype.itemsize
                  for k in ("w1", "b1", "wf", "bf", "w_ih", "b_ih"))
    bytes_accessed = (rows * IN_PAD * x.dtype.itemsize
                      + rows * GATE_DIM * 4 + w_bytes)

    return pl.pallas_call(
        _encoder_gx_kernel,
        out_shape=jax.ShapeDtypeStruct((B, t_pad, GATE_DIM), jnp.float32),
        grid_spec=pltpu.PrefetchScalarGridSpec(
            num_scalar_prefetch=0,
            grid=(n_steps,),
            in_specs=[
                pl.BlockSpec((B, te, IN_PAD), lambda i: (0, i, 0)),
                pl.BlockSpec(prep["w1"].shape, lambda i: (0, 0)),
                pl.BlockSpec(prep["b1"].shape, lambda i: (0, 0)),
                pl.BlockSpec(prep["wf"].shape, lambda i: (0, 0)),
                pl.BlockSpec(prep["bf"].shape, lambda i: (0, 0)),
                pl.BlockSpec(prep["w_ih"].shape, lambda i: (0, 0)),
                pl.BlockSpec(prep["b_ih"].shape, lambda i: (0, 0)),
            ],
            out_specs=pl.BlockSpec((B, te, GATE_DIM), lambda i: (0, i, 0)),
        ),
        compiler_params=pltpu.CompilerParams(
            dimension_semantics=("parallel",)),
        cost_estimate=pl.CostEstimate(flops=int(flops), transcendentals=0,
                                      bytes_accessed=int(bytes_accessed)),
    )(x, prep["w1"], prep["b1"], prep["wf"], prep["bf"],
      prep["w_ih"], prep["b_ih"])


# --------------------------------------------------------------------------
# Kernel 2: GRU recurrence (PyTorch gate order [r, z, n]) + batched classifier
# --------------------------------------------------------------------------
def _gru_head_kernel(gx_ref, whh_ref, bhh_ref, wfc_ref, bfc_ref,
                     out_ref, h_ref, hbuf_ref):
    c = pl.program_id(0)

    @pl.when(c == 0)
    def _():
        h_ref[...] = jnp.zeros_like(h_ref)

    f32 = jnp.float32
    H = h_ref.shape[-1]
    B, t_chunk, _ = gx_ref.shape
    n_oct = t_chunk // 8

    def octet(o, h):
        base = pl.multiple_of(o * 8, 8)
        gx_blk = gx_ref[:, pl.ds(base, 8), :]                 # (B, 8, 3H)
        hs = []
        for j in range(8):                                    # short static unroll
            gx_t = gx_blk[:, j, :]                            # (B, 3H)
            gh = jnp.dot(h, whh_ref[...],
                         preferred_element_type=f32) + bhh_ref[...]
            r = _sigmoid(gx_t[:, 0:H] + gh[:, 0:H])
            z = _sigmoid(gx_t[:, H:2 * H] + gh[:, H:2 * H])
            n = jnp.tanh(gx_t[:, 2 * H:3 * H] + r * gh[:, 2 * H:3 * H])
            h = (1.0 - z) * n + z * h
            hs.append(h)
        hbuf_ref[:, pl.ds(base, 8), :] = jnp.stack(hs, axis=1)
        return h

    h_final = lax.fori_loop(0, n_oct, octet, h_ref[...])
    h_ref[...] = h_final

    # Deferred classifier: one batched lane-dense matmul + store per chunk.
    hs_all = hbuf_ref[...].reshape(B * t_chunk, H)
    logits = jnp.dot(hs_all, wfc_ref[...],
                     preferred_element_type=f32) + bfc_ref[...]
    out_ref[...] = logits.reshape(out_ref.shape).astype(out_ref.dtype)


def gru_event_head(gx, prep, t_chunk):
    """gx (B, T_pad, 384) -> logits (B, T_pad, C_pad) float32."""
    B, t_pad, _ = gx.shape
    H = GRU_HIDDEN
    c_pad = prep["w_fc"].shape[1]
    n_chunks = t_pad // t_chunk

    flops = 2 * B * t_pad * (H * GATE_DIM + H * c_pad)
    transc = 3 * B * t_pad * H
    bytes_accessed = 4 * (B * t_pad * (GATE_DIM + c_pad)
                          + H * GATE_DIM + GATE_DIM + H * c_pad + c_pad)

    # TODO(synk): for large B on v7x, add a leading "parallel" batch-tile grid
    # axis so both TensorCores run independent halves of the recurrence.
    return pl.pallas_call(
        _gru_head_kernel,
        out_shape=jax.ShapeDtypeStruct((B, t_pad, c_pad), jnp.float32),
        grid_spec=pltpu.PrefetchScalarGridSpec(
            num_scalar_prefetch=0,
            grid=(n_chunks,),
            in_specs=[
                pl.BlockSpec((B, t_chunk, GATE_DIM), lambda c: (0, c, 0)),
                pl.BlockSpec(prep["w_hh"].shape, lambda c: (0, 0)),
                pl.BlockSpec(prep["b_hh"].shape, lambda c: (0, 0)),
                pl.BlockSpec(prep["w_fc"].shape, lambda c: (0, 0)),
                pl.BlockSpec(prep["b_fc"].shape, lambda c: (0, 0)),
            ],
            out_specs=pl.BlockSpec((B, t_chunk, c_pad), lambda c: (0, c, 0)),
            scratch_shapes=[pltpu.VMEM((B, H), jnp.float32),
                            pltpu.VMEM((B, t_chunk, H), jnp.float32)],
        ),
        compiler_params=pltpu.CompilerParams(
            dimension_semantics=("arbitrary",)),   # sequential carry over chunks
        cost_estimate=pl.CostEstimate(flops=int(flops),
                                      transcendentals=int(transc),
                                      bytes_accessed=int(bytes_accessed)),
    )(gx, prep["w_hh"], prep["b_hh"], prep["w_fc"], prep["b_fc"])


# --------------------------------------------------------------------------
# Full forward (prep built once via prepare_params, outside this function)
# --------------------------------------------------------------------------
def event_status_forward(court, ball, pose, bbox, prep):
    B, T, _ = court.shape
    t_chunk, t_pad, te = _choose_chunks(B, T)
    gx = encode_gx(court, ball, pose, bbox, prep, t_pad, te)
    logits_full = gru_event_head(gx, prep, t_chunk)
    return logits_full[:, :T, :NUM_CLASSES]


# --------------------------------------------------------------------------
# Parameters + pure-JAX reference
# --------------------------------------------------------------------------
def init_params(key):
    def linear(k, din, dout):
        kw, kb = jax.random.split(k)
        bound = din ** -0.5
        w = jax.random.uniform(kw, (din, dout), jnp.float32, -bound, bound)
        b = jax.random.uniform(kb, (1, dout), jnp.float32, -bound, bound)
        return w, b

    keys = jax.random.split(key, 9)
    enc = (linear(keys[0], COURT_DIM, EMBED_DIM),
           linear(keys[1], BALL_DIM, EMBED_DIM),
           linear(keys[2], POSE_DIM, EMBED_DIM),
           linear(keys[3], BBOX_DIM, EMBED_DIM),
           linear(keys[4], 4 * EMBED_DIM, FRAME_OUT_DIM))

    H = GRU_HIDDEN
    gb = H ** -0.5
    w_ih = jax.random.uniform(keys[5], (FRAME_OUT_DIM, 3 * H), jnp.float32, -gb, gb)
    w_hh = jax.random.uniform(keys[6], (H, 3 * H), jnp.float32, -gb, gb)
    kb1, kb2 = jax.random.split(keys[7])
    b_ih = jax.random.uniform(kb1, (1, 3 * H), jnp.float32, -gb, gb)
    b_hh = jax.random.uniform(kb2, (1, 3 * H), jnp.float32, -gb, gb)
    fc = linear(keys[8], H, NUM_CLASSES)

    return {"encoder": enc, "gru": (w_ih, b_ih, w_hh, b_hh), "fc": fc}


def reference(court, ball, pose, bbox, params):
    (wc, bc), (wb, bb), (wp, bp), (wx, bx), (wf, bf) = params["encoder"]
    relu = lambda v: jnp.maximum(v, 0.0)
    ce = relu(court @ wc + bc)
    be = relu(ball @ wb + bb)
    pe = relu(pose @ wp + bp)
    xe = relu(bbox @ wx + bx)
    frame_feat = relu(jnp.concatenate([ce, be, pe, xe], axis=-1) @ wf + bf)

    w_ih, b_ih, w_hh, b_hh = params["gru"]
    H = w_hh.shape[0]
    B = court.shape[0]

    def step(h, x_t):
        gx = x_t @ w_ih + b_ih
        gh = h @ w_hh + b_hh
        r = _sigmoid(gx[:, :H] + gh[:, :H])
        z = _sigmoid(gx[:, H:2 * H] + gh[:, H:2 * H])
        n = jnp.tanh(gx[:, 2 * H:] + r * gh[:, 2 * H:])
        h_new = (1.0 - z) * n + z * h
        return h_new, h_new

    h0 = jnp.zeros((B, H), jnp.float32)
    _, hs = lax.scan(step, h0, frame_feat.transpose(1, 0, 2))
    gru_out = hs.transpose(1, 0, 2)

    w_fc, b_fc = params["fc"]
    return gru_out @ w_fc + b_fc


if __name__ == "__main__":
    key = jax.random.PRNGKey(0)
    kp, k1, k2, k3, k4, k5 = jax.random.split(key, 6)

    params = init_params(kp)
    fwd = jax.jit(event_status_forward)

    # --- f32 path, small shapes: strict check against the pure-JAX reference.
    B, T = 2, 8
    court = jax.random.normal(k1, (B, T, COURT_DIM), jnp.float32)
    ball = jax.random.normal(k2, (B, T, BALL_DIM), jnp.float32)
    pose = jax.random.normal(k3, (B, T, POSE_DIM), jnp.float32)
    bbox = jax.random.normal(k4, (B, T, BBOX_DIM), jnp.float32)

    prep32 = prepare_params(params, use_bf16=False)
    logits = jax.block_until_ready(fwd(court, ball, pose, bbox, prep32))
    ref = reference(court, ball, pose, bbox, params)
    assert logits.shape == (B, T, NUM_CLASSES), logits.shape
    err = float(jnp.max(jnp.abs(logits - ref)))
    assert err < 1e-3, err

    # --- f32 path with time padding (T not a multiple of the chunk).
    T2 = 20
    keys2 = jax.random.split(k5, 4)
    court2 = jax.random.normal(keys2[0], (B, T2, COURT_DIM), jnp.float32)
    ball2 = jax.random.normal(keys2[1], (B, T2, BALL_DIM), jnp.float32)
    pose2 = jax.random.normal(keys2[2], (B, T2, POSE_DIM), jnp.float32)
    bbox2 = jax.random.normal(keys2[3], (B, T2, BBOX_DIM), jnp.float32)
    logits2 = jax.block_until_ready(fwd(court2, ball2, pose2, bbox2, prep32))
    ref2 = reference(court2, ball2, pose2, bbox2, params)
    assert logits2.shape == (B, T2, NUM_CLASSES), logits2.shape
    err2 = float(jnp.max(jnp.abs(logits2 - ref2)))
    assert err2 < 1e-3, err2

    # --- bf16 MXU fast path (production default on v5e/v6e/v7x): looser check.
    prep16 = prepare_params(params, use_bf16=True)
    logits_bf16 = jax.block_until_ready(fwd(court, ball, pose, bbox, prep16))
    assert logits_bf16.shape == (B, T, NUM_CLASSES)
    assert bool(jnp.all(jnp.isfinite(logits_bf16)))
    err_bf16 = float(jnp.max(jnp.abs(logits_bf16 - ref)))
    assert err_bf16 < 0.25, err_bf16   # expected tolerance of the bf16 encoder path

    print("KERNEL_OK")
</pallas_src>

<mosaic_0001>
module attributes {stable_mosaic.version = 11 : i64} {
  func.func @_encoder_gx_kernel(%arg0: i32, %arg1: memref<2x8x384xf32, #tpu.memory_space<vmem>>, %arg2: memref<384x256xf32, #tpu.memory_space<vmem>>, %arg3: memref<1x256xf32, #tpu.memory_space<vmem>>, %arg4: memref<256x128xf32, #tpu.memory_space<vmem>>, %arg5: memref<1x128xf32, #tpu.memory_space<vmem>>, %arg6: memref<128x384xf32, #tpu.memory_space<vmem>>, %arg7: memref<1x384xf32, #tpu.memory_space<vmem>>, %arg8: memref<2x8x384xf32, #tpu.memory_space<vmem>>) attributes {dimension_semantics = [#tpu.dimension_semantics<parallel>], iteration_bounds = array<i64: 1>, scalar_prefetch = 0 : i64, scratch_operands = 0 : i64, tpu.core_type = #tpu.core_type<tc>, window_params = [{transform_indices = @transform_0, window_bounds = array<i64: 2, 8, 384>}, {pipeline_mode = #tpu.pipeline_mode<synchronous>, transform_indices = @transform_1, window_bounds = array<i64: 384, 256>}, {pipeline_mode = #tpu.pipeline_mode<synchronous>, transform_indices = @transform_2, window_bounds = array<i64: 1, 256>}, {pipeline_mode = #tpu.pipeline_mode<synchronous>, transform_indices = @transform_3, window_bounds = array<i64: 256, 128>}, {pipeline_mode = #tpu.pipeline_mode<synchronous>, transform_indices = @transform_4, window_bounds = array<i64: 1, 128>}, {pipeline_mode = #tpu.pipeline_mode<synchronous>, transform_indices = @transform_5, window_bounds = array<i64: 128, 384>}, {pipeline_mode = #tpu.pipeline_mode<synchronous>, transform_indices = @transform_6, window_bounds = array<i64: 1, 384>}, {transform_indices = @transform_7, window_bounds = array<i64: 2, 8, 384>}]} {
    %c0 = arith.constant 0 : index
    %c0_0 = arith.constant 0 : index
    %c0_1 = arith.constant 0 : index
    %0 = vector.load %arg1[%c0, %c0_0, %c0_1] : memref<2x8x384xf32, #tpu.memory_space<vmem>>, vector<2x8x384xf32>
    %1 = vector.shape_cast %0 : vector<2x8x384xf32> to vector<16x384xf32>
    %c0_2 = arith.constant 0 : index
    %c0_3 = arith.constant 0 : index
    %2 = vector.load %arg2[%c0_2, %c0_3] : memref<384x256xf32, #tpu.memory_space<vmem>>, vector<384x256xf32>
    %cst = arith.constant dense<0.000000e+00> : vector<16x256xf32>
    %3 = tpu.matmul %1, %2, %cst {dimension_numbers = #tpu.dot_dimension_numbers<[1], [0], [0], [1], [0, 0, 1, 1], [], []>} : vector<16x384xf32>, vector<384x256xf32>, vector<16x256xf32> -> vector<16x256xf32>
    %c0_4 = arith.constant 0 : index
    %c0_5 = arith.constant 0 : index
    %4 = vector.load %arg3[%c0_4, %c0_5] : memref<1x256xf32, #tpu.memory_space<vmem>>, vector<1x256xf32>
    %5 = vector.broadcast %4 : vector<1x256xf32> to vector<16x256xf32>
    %6 = arith.addf %3, %5 : vector<16x256xf32>
    %cst_6 = arith.constant 0.000000e+00 : f32
    %7 = vector.broadcast %cst_6 : f32 to vector<16x256xf32>
    %8 = arith.maximumf %6, %7 : vector<16x256xf32>
    %c0_7 = arith.constant 0 : index
    %c0_8 = arith.constant 0 : index
    %9 = vector.load %arg4[%c0_7, %c0_8] : memref<256x128xf32, #tpu.memory_space<vmem>>, vector<256x128xf32>
    %cst_9 = arith.constant dense<0.000000e+00> : vector<16x128xf32>
    %10 = tpu.matmul %8, %9, %cst_9 {dimension_numbers = #tpu.dot_dimension_numbers<[1], [0], [0], [1], [0, 0, 1, 1], [], []>} : vector<16x256xf32>, vector<256x128xf32>, vector<16x128xf32> -> vector<16x128xf32>
    %c0_10 = arith.constant 0 : index
    %c0_11 = arith.constant 0 : index
    %11 = vector.load %arg5[%c0_10, %c0_11] : memref<1x128xf32, #tpu.memory_space<vmem>>, vector<1x128xf32>
    %12 = vector.broadcast %11 : vector<1x128xf32> to vector<16x128xf32>
    %13 = arith.addf %10, %12 : vector<16x128xf32>
    %cst_12 = arith.constant 0.000000e+00 : f32
    %14 = vector.broadcast %cst_12 : f32 to vector<16x128xf32>
    %15 = arith.maximumf %13, %14 : vector<16x128xf32>
    %c0_13 = arith.constant 0 : index
    %c0_14 = arith.constant 0 : index
    %16 = vector.load %arg6[%c0_13, %c0_14] : memref<128x384xf32, #tpu.memory_space<vmem>>, vector<128x384xf32>
    %cst_15 = arith.constant dense<0.000000e+00> : vector<16x384xf32>
    %17 = tpu.matmul %15, %16, %cst_15 {dimension_numbers = #tpu.dot_dimension_numbers<[1], [0], [0], [1], [0, 0, 1, 1], [], []>} : vector<16x128xf32>, vector<128x384xf32>, vector<16x384xf32> -> vector<16x384xf32>
    %c0_16 = arith.constant 0 : index
    %c0_17 = arith.constant 0 : index
    %18 = vector.load %arg7[%c0_16, %c0_17] : memref<1x384xf32, #tpu.memory_space<vmem>>, vector<1x384xf32>
    %19 = vector.broadcast %18 : vector<1x384xf32> to vector<16x384xf32>
    %20 = arith.addf %17, %19 : vector<16x384xf32>
    %21 = vector.shape_cast %20 : vector<16x384xf32> to vector<2x8x384xf32>
    %c0_18 = arith.constant 0 : index
    %c0_19 = arith.constant 0 : index
    %c0_20 = arith.constant 0 : index
    %22 = vector.load %arg8[%c0_18, %c0_19, %c0_20] : memref<2x8x384xf32, #tpu.memory_space<vmem>>, vector<2x8x384xf32>
    tpu.vector_store %arg8[%c0_18, %c0_19, %c0_20], %21 {strides = array<i32>} : memref<2x8x384xf32, #tpu.memory_space<vmem>>, vector<2x8x384xf32>,
    return
  }
  func.func @transform_0(%arg0: i32) -> (i32, i32, i32) {
    %c0_i32 = arith.constant 0 : i32
    %c0_i32_0 = arith.constant 0 : i32
    %c0_i32_1 = arith.constant 0 : i32
    return %c0_i32, %arg0, %c0_i32_0 : i32, i32, i32
  }
  func.func @transform_1(%arg0: i32) -> (i32, i32) {
    %c0_i32 = arith.constant 0 : i32
    %c0_i32_0 = arith.constant 0 : i32
    %c0_i32_1 = arith.constant 0 : i32
    return %c0_i32, %c0_i32_0 : i32, i32
  }
  func.func @transform_2(%arg0: i32) -> (i32, i32) {
    %c0_i32 = arith.constant 0 : i32
    %c0_i32_0 = arith.constant 0 : i32
    %c0_i32_1 = arith.constant 0 : i32
    return %c0_i32, %c0_i32_0 : i32, i32
  }
  func.func @transform_3(%arg0: i32) -> (i32, i32) {
    %c0_i32 = arith.constant 0 : i32
    %c0_i32_0 = arith.constant 0 : i32
    %c0_i32_1 = arith.constant 0 : i32
    return %c0_i32, %c0_i32_0 : i32, i32
  }
  func.func @transform_4(%arg0: i32) -> (i32, i32) {
    %c0_i32 = arith.constant 0 : i32
    %c0_i32_0 = arith.constant 0 : i32
    %c0_i32_1 = arith.constant 0 : i32
    return %c0_i32, %c0_i32_0 : i32, i32
  }
  func.func @transform_5(%arg0: i32) -> (i32, i32) {
    %c0_i32 = arith.constant 0 : i32
    %c0_i32_0 = arith.constant 0 : i32
    %c0_i32_1 = arith.constant 0 : i32
    return %c0_i32, %c0_i32_0 : i32, i32
  }
  func.func @transform_6(%arg0: i32) -> (i32, i32) {
    %c0_i32 = arith.constant 0 : i32
    %c0_i32_0 = arith.constant 0 : i32
    %c0_i32_1 = arith.constant 0 : i32
    return %c0_i32, %c0_i32_0 : i32, i32
  }
  func.func @transform_7(%arg0: i32) -> (i32, i32, i32) {
    %c0_i32 = arith.constant 0 : i32
    %c0_i32_0 = arith.constant 0 : i32
    %c0_i32_1 = arith.constant 0 : i32
    return %c0_i32, %arg0, %c0_i32_0 : i32, i32, i32
  }
}

module attributes {stable_mosaic.version = 11 : i64} {
  func.func @_gru_head_kernel(%arg0: i32, %arg1: memref<2x8x384xf32, #tpu.memory_space<vmem>>, %arg2: memref<128x384xf32, #tpu.memory_space<vmem>>, %arg3: memref<1x384xf32, #tpu.memory_space<vmem>>, %arg4: memref<128x128xf32, #tpu.memory_space<vmem>>, %arg5: memref<1x128xf32, #tpu.memory_space<vmem>>, %arg6: memref<2x8x128xf32, #tpu.memory_space<vmem>>, %arg7: memref<2x128xf32, #tpu.memory_space<vmem>>, %arg8: memref<2x8x128xf32, #tpu.memory_space<vmem>>) attributes {dimension_semantics = [#tpu.dimension_semantics<arbitrary>], iteration_bounds = array<i64: 1>, scalar_prefetch = 0 : i64, scratch_operands = 2 : i64, tpu.core_type = #tpu.core_type<tc>, window_params = [{transform_indices = @transform_0, window_bounds = array<i64: 2, 8, 384>}, {pipeline_mode = #tpu.pipeline_mode<synchronous>, transform_indices = @transform_1, window_bounds = array<i64: 128, 384>}, {pipeline_mode = #tpu.pipeline_mode<synchronous>, transform_indices = @transform_2, window_bounds = array<i64: 1, 384>}, {pipeline_mode = #tpu.pipeline_mode<synchronous>, transform_indices = @transform_3, window_bounds = array<i64: 128, 128>}, {pipeline_mode = #tpu.pipeline_mode<synchronous>, transform_indices = @transform_4, window_bounds = array<i64: 1, 128>}, {transform_indices = @transform_5, window_bounds = array<i64: 2, 8, 128>}]} {
    %c0_i32 = arith.constant 0 : i32
    %0 = arith.cmpi eq, %arg0, %c0_i32 : i32
    %1 = arith.extui %0 : i1 to i32
    %c0_i32_0 = arith.constant 0 : i32
    %2 = arith.cmpi ne, %1, %c0_i32_0 : i32
    scf.if %2 {
      %cst_115 = arith.constant 0.000000e+00 : f32
      %325 = vector.broadcast %cst_115 : f32 to vector<2x128xf32>
      %c0_116 = arith.constant 0 : index
      %c0_117 = arith.constant 0 : index
      %326 = vector.load %arg7[%c0_116, %c0_117] : memref<2x128xf32, #tpu.memory_space<vmem>>, vector<2x128xf32>
      tpu.vector_store %arg7[%c0_116, %c0_117], %325 {strides = array<i32>} : memref<2x128xf32, #tpu.memory_space<vmem>>, vector<2x128xf32>,
    } else {
    }
    %c0 = arith.constant 0 : index
    %c0_1 = arith.constant 0 : index
    %3 = vector.load %arg7[%c0, %c0_1] : memref<2x128xf32, #tpu.memory_space<vmem>>, vector<2x128xf32>
    %c0_i32_2 = arith.constant 0 : i32
    %c8_i32 = arith.constant 8 : i32
    %4 = arith.muli %c0_i32_2, %c8_i32 : i32
    %5 = tpu.assume_multiple %4, 8 : i32
    %c0_3 = arith.constant 0 : index
    %6 = arith.index_cast %5 : i32 to index
    %c0_4 = arith.constant 0 : index
    %7 = vector.load %arg1[%c0_3, %6, %c0_4] : memref<2x8x384xf32, #tpu.memory_space<vmem>>, vector<2x8x384xf32>
    %8 = vector.extract_strided_slice %7 {offsets = [0, 0, 0], sizes = [2, 1, 384], strides = [1, 1, 1]} : vector<2x8x384xf32> to vector<2x1x384xf32>
    %9 = vector.shape_cast %8 : vector<2x1x384xf32> to vector<2x384xf32>
    %c0_5 = arith.constant 0 : index
    %c0_6 = arith.constant 0 : index
    %10 = vector.load %arg2[%c0_5, %c0_6] : memref<128x384xf32, #tpu.memory_space<vmem>>, vector<128x384xf32>
    %cst = arith.constant dense<0.000000e+00> : vector<2x384xf32>
    %11 = tpu.matmul %3, %10, %cst {dimension_numbers = #tpu.dot_dimension_numbers<[1], [0], [0], [1], [0, 0, 1, 1], [], []>} : vector<2x128xf32>, vector<128x384xf32>, vector<2x384xf32> -> vector<2x384xf32>
    %c0_7 = arith.constant 0 : index
    %c0_8 = arith.constant 0 : index
    %12 = vector.load %arg3[%c0_7, %c0_8] : memref<1x384xf32, #tpu.memory_space<vmem>>, vector<1x384xf32>
    %13 = vector.broadcast %12 : vector<1x384xf32> to vector<2x384xf32>
    %14 = arith.addf %11, %13 : vector<2x384xf32>
    %15 = vector.extract_strided_slice %9 {offsets = [0, 0], sizes = [2, 128], strides = [1, 1]} : vector<2x384xf32> to vector<2x128xf32>
    %16 = vector.extract_strided_slice %14 {offsets = [0, 0], sizes = [2, 128], strides = [1, 1]} : vector<2x384xf32> to vector<2x128xf32>
    %17 = arith.addf %15, %16 : vector<2x128xf32>
    %cst_9 = arith.constant 0.000000e+00 : f32
    %18 = vector.broadcast %cst_9 : f32 to vector<2x128xf32>
    %19 = arith.subf %18, %17 : vector<2x128xf32>
    %20 = math.exp %19 : vector<2x128xf32>
    %cst_10 = arith.constant 1.000000e+00 : f32
    %21 = vector.broadcast %cst_10 : f32 to vector<2x128xf32>
    %22 = arith.addf %21, %20 : vector<2x128xf32>
    %cst_11 = arith.constant 1.000000e+00 : f32
    %23 = vector.broadcast %cst_11 : f32 to vector<2x128xf32>
    %24 = arith.divf %23, %22 : vector<2x128xf32>
    %25 = vector.extract_strided_slice %9 {offsets = [0, 128], sizes = [2, 128], strides = [1, 1]} : vector<2x384xf32> to vector<2x128xf32>
    %26 = vector.extract_strided_slice %14 {offsets = [0, 128], sizes = [2, 128], strides = [1, 1]} : vector<2x384xf32> to vector<2x128xf32>
    %27 = arith.addf %25, %26 : vector<2x128xf32>
    %cst_12 = arith.constant 0.000000e+00 : f32
    %28 = vector.broadcast %cst_12 : f32 to vector<2x128xf32>
    %29 = arith.subf %28, %27 : vector<2x128xf32>
    %30 = math.exp %29 : vector<2x128xf32>
    %cst_13 = arith.constant 1.000000e+00 : f32
    %31 = vector.broadcast %cst_13 : f32 to vector<2x128xf32>
    %32 = arith.addf %31, %30 : vector<2x128xf32>
    %cst_14 = arith.constant 1.000000e+00 : f32
    %33 = vector.broadcast %cst_14 : f32 to vector<2x128xf32>
    %34 = arith.divf %33, %32 : vector<2x128xf32>
    %35 = vector.extract_strided_slice %9 {offsets = [0, 256], sizes = [2, 128], strides = [1, 1]} : vector<2x384xf32> to vector<2x128xf32>
    %36 = vector.extract_strided_slice %14 {offsets = [0, 256], sizes = [2, 128], strides = [1, 1]} : vector<2x384xf32> to vector<2x128xf32>
    %37 = arith.mulf %24, %36 : vector<2x128xf32>
    %38 = arith.addf %35, %37 : vector<2x128xf32>
    %39 = math.tanh %38 : vector<2x128xf32>
    %cst_15 = arith.constant 1.000000e+00 : f32
    %40 = vector.broadcast %cst_15 : f32 to vector<2x128xf32>
    %41 = arith.subf %40, %34 : vector<2x128xf32>
    %42 = arith.mulf %41, %39 : vector<2x128xf32>
    %43 = arith.mulf %34, %3 : vector<2x128xf32>
    %44 = arith.addf %42, %43 : vector<2x128xf32>
    %45 = vector.extract_strided_slice %7 {offsets = [0, 1, 0], sizes = [2, 1, 384], strides = [1, 1, 1]} : vector<2x8x384xf32> to vector<2x1x384xf32>
    %46 = vector.shape_cast %45 : vector<2x1x384xf32> to vector<2x384xf32>
    %c0_16 = arith.constant 0 : index
    %c0_17 = arith.constant 0 : index
    %47 = vector.load %arg2[%c0_16, %c0_17] : memref<128x384xf32, #tpu.memory_space<vmem>>, vector<128x384xf32>
    %cst_18 = arith.constant dense<0.000000e+00> : vector<2x384xf32>
    %48 = tpu.matmul %44, %47, %cst_18 {dimension_numbers = #tpu.dot_dimension_numbers<[1], [0], [0], [1], [0, 0, 1, 1], [], []>} : vector<2x128xf32>, vector<128x384xf32>, vector<2x384xf32> -> vector<2x384xf32>
    %c0_19 = arith.constant 0 : index
    %c0_20 = arith.constant 0 : index
    %49 = vector.load %arg3[%c0_19, %c0_20] : memref<1x384xf32, #tpu.memory_space<vmem>>, vector<1x384xf32>
    %50 = vector.broadcast %49 : vector<1x384xf32> to vector<2x384xf32>
    %51 = arith.addf %48, %50 : vector<2x384xf32>
    %52 = vector.extract_strided_slice %46 {offsets = [0, 0], sizes = [2, 128], strides = [1, 1]} : vector<2x384xf32> to vector<2x128xf32>
    %53 = vector.extract_strided_slice %51 {offsets = [0, 0], sizes = [2, 128], strides = [1, 1]} : vector<2x384xf32> to vector<2x128xf32>
    %54 = arith.addf %52, %53 : vector<2x128xf32>
    %cst_21 = arith.constant 0.000000e+00 : f32
    %55 = vector.broadcast %cst_21 : f32 to vector<2x128xf32>
    %56 = arith.subf %55, %54 : vector<2x128xf32>
    %57 = math.exp %56 : vector<2x128xf32>
    %cst_22 = arith.constant 1.000000e+00 : f32
    %58 = vector.broadcast %cst_22 : f32 to vector<2x128xf32>
    %59 = arith.addf %58, %57 : vector<2x128xf32>
    %cst_23 = arith.constant 1.000000e+00 : f32
    %60 = vector.broadcast %cst_23 : f32 to vector<2x128xf32>
    %61 = arith.divf %60, %59 : vector<2x128xf32>
    %62 = vector.extract_strided_slice %46 {offsets = [0, 128], sizes = [2, 128], strides = [1, 1]} : vector<2x384xf32> to vector<2x128xf32>
    %63 = vector.extract_strided_slice %51 {offsets = [0, 128], sizes = [2, 128], strides = [1, 1]} : vector<2x384xf32> to vector<2x128xf32>
    %64 = arith.addf %62, %63 : vector<2x128xf32>
    %cst_24 = arith.constant 0.000000e+00 : f32
    %65 = vector.broadcast %cst_24 : f32 to vector<2x128xf32>
    %66 = arith.subf %65, %64 : vector<2x128xf32>
    %67 = math.exp %66 : vector<2x128xf32>
    %cst_25 = arith.constant 1.000000e+00 : f32
    %68 = vector.broadcast %cst_25 : f32 to vector<2x128xf32>
    %69 = arith.addf %68, %67 : vector<2x128xf32>
    %cst_26 = arith.constant 1.000000e+00 : f32
    %70 = vector.broadcast %cst_26 : f32 to vector<2x128xf32>
    %71 = arith.divf %70, %69 : vector<2x128xf32>
    %72 = vector.extract_strided_slice %46 {offsets = [0, 256], sizes = [2, 128], strides = [1, 1]} : vector<2x384xf32> to vector<2x128xf32>
    %73 = vector.extract_strided_slice %51 {offsets = [0, 256], sizes = [2, 128], strides = [1, 1]} : vector<2x384xf32> to vector<2x128xf32>
    %74 = arith.mulf %61, %73 : vector<2x128xf32>
    %75 = arith.addf %72, %74 : vector<2x128xf32>
    %76 = math.tanh %75 : vector<2x128xf32>
    %cst_27 = arith.constant 1.000000e+00 : f32
    %77 = vector.broadcast %cst_27 : f32 to vector<2x128xf32>
    %78 = arith.subf %77, %71 : vector<2x128xf32>
    %79 = arith.mulf %78, %76 : vector<2x128xf32>
    %80 = arith.mulf %71, %44 : vector<2x128xf32>
    %81 = arith.addf %79, %80 : vector<2x128xf32>
    %82 = vector.extract_strided_slice %7 {offsets = [0, 2, 0], sizes = [2, 1, 384], strides = [1, 1, 1]} : vector<2x8x384xf32> to vector<2x1x384xf32>
    %83 = vector.shape_cast %82 : vector<2x1x384xf32> to vector<2x384xf32>
    %c0_28 = arith.constant 0 : index
    %c0_29 = arith.constant 0 : index
    %84 = vector.load %arg2[%c0_28, %c0_29] : memref<128x384xf32, #tpu.memory_space<vmem>>, vector<128x384xf32>
    %cst_30 = arith.constant dense<0.000000e+00> : vector<2x384xf32>
    %85 = tpu.matmul %81, %84, %cst_30 {dimension_numbers = #tpu.dot_dimension_numbers<[1], [0], [0], [1], [0, 0, 1, 1], [], []>} : vector<2x128xf32>, vector<128x384xf32>, vector<2x384xf32> -> vector<2x384xf32>
    %c0_31 = arith.constant 0 : index
    %c0_32 = arith.constant 0 : index
    %86 = vector.load %arg3[%c0_31, %c0_32] : memref<1x384xf32, #tpu.memory_space<vmem>>, vector<1x384xf32>
    %87 = vector.broadcast %86 : vector<1x384xf32> to vector<2x384xf32>
    %88 = arith.addf %85, %87 : vector<2x384xf32>
    %89 = vector.extract_strided_slice %83 {offsets = [0, 0], sizes = [2, 128], strides = [1, 1]} : vector<2x384xf32> to vector<2x128xf32>
    %90 = vector.extract_strided_slice %88 {offsets = [0, 0], sizes = [2, 128], strides = [1, 1]} : vector<2x384xf32> to vector<2x128xf32>
    %91 = arith.addf %89, %90 : vector<2x128xf32>
    %cst_33 = arith.constant 0.000000e+00 : f32
    %92 = vector.broadcast %cst_33 : f32 to vector<2x128xf32>
    %93 = arith.subf %92, %91 : vector<2x128xf32>
    %94 = math.exp %93 : vector<2x128xf32>
    %cst_34 = arith.constant 1.000000e+00 : f32
    %95 = vector.broadcast %cst_34 : f32 to vector<2x128xf32>
    %96 = arith.addf %95, %94 : vector<2x128xf32>
    %cst_35 = arith.constant 1.000000e+00 : f32
    %97 = vector.broadcast %cst_35 : f32 to vector<2x128xf32>
    %98 = arith.divf %97, %96 : vector<2x128xf32>
    %99 = vector.extract_strided_slice %83 {offsets = [0, 128], sizes = [2, 128], strides = [1, 1]} : vector<2x384xf32> to vector<2x128xf32>
    %100 = vector.extract_strided_slice %88 {offsets = [0, 128], sizes = [2, 128], strides = [1, 1]} : vector<2x384xf32> to vector<2x128xf32>
    %101 = arith.addf %99, %100 : vector<2x128xf32>
    %cst_36 = arith.constant 0.000000e+00 : f32
    %102 = vector.broadcast %cst_36 : f32 to vector<2x128xf32>
    %103 = arith.subf %102, %101 : vector<2x128xf32>
    %104 = math.exp %103 : vector<2x128xf32>
    %cst_37 = arith.constant 1.000000e+00 : f32
    %105 = vector.broadcast %cst_37 : f32 to vector<2x128xf32>
    %106 = arith.addf %105, %104 : vector<2x128xf32>
    %cst_38 = arith.constant 1.000000e+00 : f32
    %107 = vector.broadcast %cst_38 : f32 to vector<2x128xf32>
    %108 = arith.divf %107, %106 : vector<2x128xf32>
    %109 = vector.extract_strided_slice %83 {offsets = [0, 256], sizes = [2, 128], strides = [1, 1]} : vector<2x384xf32> to vector<2x128xf32>
    %110 = vector.extract_strided_slice %88 {offsets = [0, 256], sizes = [2, 128], strides = [1, 1]} : vector<2x384xf32> to vector<2x128xf32>
    %111 = arith.mulf %98, %110 : vector<2x128xf32>
    %112 = arith.addf %109, %111 : vector<2x128xf32>
    %113 = math.tanh %112 : vector<2x128xf32>
    %cst_39 = arith.constant 1.000000e+00 : f32
    %114 = vector.broadcast %cst_39 : f32 to vector<2x128xf32>
    %115 = arith.subf %114, %108 : vector<2x128xf32>
    %116 = arith.mulf %115, %113 : vector<2x128xf32>
    %117 = arith.mulf %108, %81 : vector<2x128xf32>
    %118 = arith.addf %116, %117 : vector<2x128xf32>
    %119 = vector.extract_strided_slice %7 {offsets = [0, 3, 0], sizes = [2, 1, 384], strides = [1, 1, 1]} : vector<2x8x384xf32> to vector<2x1x384xf32>
    %120 = vector.shape_cast %119 : vector<2x1x384xf32> to vector<2x384xf32>
    %c0_40 = arith.constant 0 : index
    %c0_41 = arith.constant 0 : index
    %121 = vector.load %arg2[%c0_40, %c0_41] : memref<128x384xf32, #tpu.memory_space<vmem>>, vector<128x384xf32>
    %cst_42 = arith.constant dense<0.000000e+00> : vector<2x384xf32>
    %122 = tpu.matmul %118, %121, %cst_42 {dimension_numbers = #tpu.dot_dimension_numbers<[1], [0], [0], [1], [0, 0, 1, 1], [], []>} : vector<2x128xf32>, vector<128x384xf32>, vector<2x384xf32> -> vector<2x384xf32>
    %c0_43 = arith.constant 0 : index
    %c0_44 = arith.constant 0 : index
    %123 = vector.load %arg3[%c0_43, %c0_44] : memref<1x384xf32, #tpu.memory_space<vmem>>, vector<1x384xf32>
    %124 = vector.broadcast %123 : vector<1x384xf32> to vector<2x384xf32>
    %125 = arith.addf %122, %124 : vector<2x384xf32>
    %126 = vector.extract_strided_slice %120 {offsets = [0, 0], sizes = [2, 128], strides = [1, 1]} : vector<2x384xf32> to vector<2x128xf32>
    %127 = vector.extract_strided_slice %125 {offsets = [0, 0], sizes = [2, 128], strides = [1, 1]} : vector<2x384xf32> to vector<2x128xf32>
    %128 = arith.addf %126, %127 : vector<2x128xf32>
    %cst_45 = arith.constant 0.000000e+00 : f32
    %129 = vector.broadcast %cst_45 : f32 to vector<2x128xf32>
    %130 = arith.subf %129, %128 : vector<2x128xf32>
    %131 = math.exp %130 : vector<2x128xf32>
    %cst_46 = arith.constant 1.000000e+00 : f32
    %132 = vector.broadcast %cst_46 : f32 to vector<2x128xf32>
    %133 = arith.addf %132, %131 : vector<2x128xf32>
    %cst_47 = arith.constant 1.000000e+00 : f32
    %134 = vector.broadcast %cst_47 : f32 to vector<2x128xf32>
    %135 = arith.divf %134, %133 : vector<2x128xf32>
    %136 = vector.extract_strided_slice %120 {offsets = [0, 128], sizes = [2, 128], strides = [1, 1]} : vector<2x384xf32> to vector<2x128xf32>
    %137 = vector.extract_strided_slice %125 {offsets = [0, 128], sizes = [2, 128], strides = [1, 1]} : vector<2x384xf32> to vector<2x128xf32>
    %138 = arith.addf %136, %137 : vector<2x128xf32>
    %cst_48 = arith.constant 0.000000e+00 : f32
    %139 = vector.broadcast %cst_48 : f32 to vector<2x128xf32>
    %140 = arith.subf %139, %138 : vector<2x128xf32>
    %141 = math.exp %140 : vector<2x128xf32>
    %cst_49 = arith.constant 1.000000e+00 : f32
    %142 = vector.broadcast %cst_49 : f32 to vector<2x128xf32>
    %143 = arith.addf %142, %141 : vector<2x128xf32>
    %cst_50 = arith.constant 1.000000e+00 : f32
    %144 = vector.broadcast %cst_50 : f32 to vector<2x128xf32>
    %145 = arith.divf %144, %143 : vector<2x128xf32>
    %146 = vector.extract_strided_slice %120 {offsets = [0, 256], sizes = [2, 128], strides = [1, 1]} : vector<2x384xf32> to vector<2x128xf32>
    %147 = vector.extract_strided_slice %125 {offsets = [0, 256], sizes = [2, 128], strides = [1, 1]} : vector<2x384xf32> to vector<2x128xf32>
    %148 = arith.mulf %135, %147 : vector<2x128xf32>
    %149 = arith.addf %146, %148 : vector<2x128xf32>
    %150 = math.tanh %149 : vector<2x128xf32>
    %cst_51 = arith.constant 1.000000e+00 : f32
    %151 = vector.broadcast %cst_51 : f32 to vector<2x128xf32>
    %152 = arith.subf %151, %145 : vector<2x128xf32>
    %153 = arith.mulf %152, %150 : vector<2x128xf32>
    %154 = arith.mulf %145, %118 : vector<2x128xf32>
    %155 = arith.addf %153, %154 : vector<2x128xf32>
    %156 = vector.extract_strided_slice %7 {offsets = [0, 4, 0], sizes = [2, 1, 384], strides = [1, 1, 1]} : vector<2x8x384xf32> to vector<2x1x384xf32>
    %157 = vector.shape_cast %156 : vector<2x1x384xf32> to vector<2x384xf32>
    %c0_52 = arith.constant 0 : index
    %c0_53 = arith.constant 0 : index
    %158 = vector.load %arg2[%c0_52, %c0_53] : memref<128x384xf32, #tpu.memory_space<vmem>>, vector<128x384xf32>
    %cst_54 = arith.constant dense<0.000000e+00> : vector<2x384xf32>
    %159 = tpu.matmul %155, %158, %cst_54 {dimension_numbers = #tpu.dot_dimension_numbers<[1], [0], [0], [1], [0, 0, 1, 1], [], []>} : vector<2x128xf32>, vector<128x384xf32>, vector<2x384xf32> -> vector<2x384xf32>
    %c0_55 = arith.constant 0 : index
    %c0_56 = arith.constant 0 : index
    %160 = vector.load %arg3[%c0_55, %c0_56] : memref<1x384xf32, #tpu.memory_space<vmem>>, vector<1x384xf32>
    %161 = vector.broadcast %160 : vector<1x384xf32> to vector<2x384xf32>
    %162 = arith.addf %159, %161 : vector<2x384xf32>
    %163 = vector.extract_strided_slice %157 {offsets = [0, 0], sizes = [2, 128], strides = [1, 1]} : vector<2x384xf32> to vector<2x128xf32>
    %164 = vector.extract_strided_slice %162 {offsets = [0, 0], sizes = [2, 128], strides = [1, 1]} : vector<2x384xf32> to vector<2x128xf32>
    %165 = arith.addf %163, %164 : vector<2x128xf32>
    %cst_57 = arith.constant 0.000000e+00 : f32
    %166 = vector.broadcast %cst_57 : f32 to vector<2x128xf32>
    %167 = arith.subf %166, %165 : vector<2x128xf32>
    %168 = math.exp %167 : vector<2x128xf32>
    %cst_58 = arith.constant 1.000000e+00 : f32
    %169 = vector.broadcast %cst_58 : f32 to vector<2x128xf32>
    %170 = arith.addf %169, %168 : vector<2x128xf32>
    %cst_59 = arith.constant 1.000000e+00 : f32
    %171 = vector.broadcast %cst_59 : f32 to vector<2x128xf32>
    %172 = arith.divf %171, %170 : vector<2x128xf32>
    %173 = vector.extract_strided_slice %157 {offsets = [0, 128], sizes = [2, 128], strides = [1, 1]} : vector<2x384xf32> to vector<2x128xf32>
    %174 = vector.extract_strided_slice %162 {offsets = [0, 128], sizes = [2, 128], strides = [1, 1]} : vector<2x384xf32> to vector<2x128xf32>
    %175 = arith.addf %173, %174 : vector<2x128xf32>
    %cst_60 = arith.constant 0.000000e+00 : f32
    %176 = vector.broadcast %cst_60 : f32 to vector<2x128xf32>
    %177 = arith.subf %176, %175 : vector<2x128xf32>
    %178 = math.exp %177 : vector<2x128xf32>
    %cst_61 = arith.constant 1.000000e+00 : f32
    %179 = vector.broadcast %cst_61 : f32 to vector<2x128xf32>
    %180 = arith.addf %179, %178 : vector<2x128xf32>
    %cst_62 = arith.constant 1.000000e+00 : f32
    %181 = vector.broadcast %cst_62 : f32 to vector<2x128xf32>
    %182 = arith.divf %181, %180 : vector<2x128xf32>
    %183 = vector.extract_strided_slice %157 {offsets = [0, 256], sizes = [2, 128], strides = [1, 1]} : vector<2x384xf32> to vector<2x128xf32>
    %184 = vector.extract_strided_slice %162 {offsets = [0, 256], sizes = [2, 128], strides = [1, 1]} : vector<2x384xf32> to vector<2x128xf32>
    %185 = arith.mulf %172, %184 : vector<2x128xf32>
    %186 = arith.addf %183, %185 : vector<2x128xf32>
    %187 = math.tanh %186 : vector<2x128xf32>
    %cst_63 = arith.constant 1.000000e+00 : f32
    %188 = vector.broadcast %cst_63 : f32 to vector<2x128xf32>
    %189 = arith.subf %188, %182 : vector<2x128xf32>
    %190 = arith.mulf %189, %187 : vector<2x128xf32>
    %191 = arith.mulf %182, %155 : vector<2x128xf32>
    %192 = arith.addf %190, %191 : vector<2x128xf32>
    %193 = vector.extract_strided_slice %7 {offsets = [0, 5, 0], sizes = [2, 1, 384], strides = [1, 1, 1]} : vector<2x8x384xf32> to vector<2x1x384xf32>
    %194 = vector.shape_cast %193 : vector<2x1x384xf32> to vector<2x384xf32>
    %c0_64 = arith.constant 0 : index
    %c0_65 = arith.constant 0 : index
    %195 = vector.load %arg2[%c0_64, %c0_65] : memref<128x384xf32, #tpu.memory_space<vmem>>, vector<128x384xf32>
    %cst_66 = arith.constant dense<0.000000e+00> : vector<2x384xf32>
    %196 = tpu.matmul %192, %195, %cst_66 {dimension_numbers = #tpu.dot_dimension_numbers<[1], [0], [0], [1], [0, 0, 1, 1], [], []>} : vector<2x128xf32>, vector<128x384xf32>, vector<2x384xf32> -> vector<2x384xf32>
    %c0_67 = arith.constant 0 : index
    %c0_68 = arith.constant 0 : index
    %197 = vector.load %arg3[%c0_67, %c0_68] : memref<1x384xf32, #tpu.memory_space<vmem>>, vector<1x384xf32>
    %198 = vector.broadcast %197 : vector<1x384xf32> to vector<2x384xf32>
    %199 = arith.addf %196, %198 : vector<2x384xf32>
    %200 = vector.extract_strided_slice %194 {offsets = [0, 0], sizes = [2, 128], strides = [1, 1]} : vector<2x384xf32> to vector<2x128xf32>
    %201 = vector.extract_strided_slice %199 {offsets = [0, 0], sizes = [2, 128], strides = [1, 1]} : vector<2x384xf32> to vector<2x128xf32>
    %202 = arith.addf %200, %201 : vector<2x128xf32>
    %cst_69 = arith.constant 0.000000e+00 : f32
    %203 = vector.broadcast %cst_69 : f32 to vector<2x128xf32>
    %204 = arith.subf %203, %202 : vector<2x128xf32>
    %205 = math.exp %204 : vector<2x128xf32>
    %cst_70 = arith.constant 1.000000e+00 : f32
    %206 = vector.broadcast %cst_70 : f32 to vector<2x128xf32>
    %207 = arith.addf %206, %205 : vector<2x128xf32>
    %cst_71 = arith.constant 1.000000e+00 : f32
    %208 = vector.broadcast %cst_71 : f32 to vector<2x128xf32>
    %209 = arith.divf %208, %207 : vector<2x128xf32>
    %210 = vector.extract_strided_slice %194 {offsets = [0, 128], sizes = [2, 128], strides = [1, 1]} : vector<2x384xf32> to vector<2x128xf32>
    %211 = vector.extract_strided_slice %199 {offsets = [0, 128], sizes = [2, 128], strides = [1, 1]} : vector<2x384xf32> to vector<2x128xf32>
    %212 = arith.addf %210, %211 : vector<2x128xf32>
    %cst_72 = arith.constant 0.000000e+00 : f32
    %213 = vector.broadcast %cst_72 : f32 to vector<2x128xf32>
    %214 = arith.subf %213, %212 : vector<2x128xf32>
    %215 = math.exp %214 : vector<2x128xf32>
    %cst_73 = arith.constant 1.000000e+00 : f32
    %216 = vector.broadcast %cst_73 : f32 to vector<2x128xf32>
    %217 = arith.addf %216, %215 : vector<2x128xf32>
    %cst_74 = arith.constant 1.000000e+00 : f32
    %218 = vector.broadcast %cst_74 : f32 to vector<2x128xf32>
    %219 = arith.divf %218, %217 : vector<2x128xf32>
    %220 = vector.extract_strided_slice %194 {offsets = [0, 256], sizes = [2, 128], strides = [1, 1]} : vector<2x384xf32> to vector<2x128xf32>
    %221 = vector.extract_strided_slice %199 {offsets = [0, 256], sizes = [2, 128], strides = [1, 1]} : vector<2x384xf32> to vector<2x128xf32>
    %222 = arith.mulf %209, %221 : vector<2x128xf32>
    %223 = arith.addf %220, %222 : vector<2x128xf32>
    %224 = math.tanh %223 : vector<2x128xf32>
    %cst_75 = arith.constant 1.000000e+00 : f32
    %225 = vector.broadcast %cst_75 : f32 to vector<2x128xf32>
    %226 = arith.subf %225, %219 : vector<2x128xf32>
    %227 = arith.mulf %226, %224 : vector<2x128xf32>
    %228 = arith.mulf %219, %192 : vector<2x128xf32>
    %229 = arith.addf %227, %228 : vector<2x128xf32>
    %230 = vector.extract_strided_slice %7 {offsets = [0, 6, 0], sizes = [2, 1, 384], strides = [1, 1, 1]} : vector<2x8x384xf32> to vector<2x1x384xf32>
    %231 = vector.shape_cast %230 : vector<2x1x384xf32> to vector<2x384xf32>
    %c0_76 = arith.constant 0 : index
    %c0_77 = arith.constant 0 : index
    %232 = vector.load %arg2[%c0_76, %c0_77] : memref<128x384xf32, #tpu.memory_space<vmem>>, vector<128x384xf32>
    %cst_78 = arith.constant dense<0.000000e+00> : vector<2x384xf32>
    %233 = tpu.matmul %229, %232, %cst_78 {dimension_numbers = #tpu.dot_dimension_numbers<[1], [0], [0], [1], [0, 0, 1, 1], [], []>} : vector<2x128xf32>, vector<128x384xf32>, vector<2x384xf32> -> vector<2x384xf32>
    %c0_79 = arith.constant 0 : index
    %c0_80 = arith.constant 0 : index
    %234 = vector.load %arg3[%c0_79, %c0_80] : memref<1x384xf32, #tpu.memory_space<vmem>>, vector<1x384xf32>
    %235 = vector.broadcast %234 : vector<1x384xf32> to vector<2x384xf32>
    %236 = arith.addf %233, %235 : vector<2x384xf32>
    %237 = vector.extract_strided_slice %231 {offsets = [0, 0], sizes = [2, 128], strides = [1, 1]} : vector<2x384xf32> to vector<2x128xf32>
    %238 = vector.extract_strided_slice %236 {offsets = [0, 0], sizes = [2, 128], strides = [1, 1]} : vector<2x384xf32> to vector<2x128xf32>
    %239 = arith.addf %237, %238 : vector<2x128xf32>
    %cst_81 = arith.constant 0.000000e+00 : f32
    %240 = vector.broadcast %cst_81 : f32 to vector<2x128xf32>
    %241 = arith.subf %240, %239 : vector<2x128xf32>
    %242 = math.exp %241 : vector<2x128xf32>
    %cst_82 = arith.constant 1.000000e+00 : f32
    %243 = vector.broadcast %cst_82 : f32 to vector<2x128xf32>
    %244 = arith.addf %243, %242 : vector<2x128xf32>
    %cst_83 = arith.constant 1.000000e+00 : f32
    %245 = vector.broadcast %cst_83 : f32 to vector<2x128xf32>
    %246 = arith.divf %245, %244 : vector<2x128xf32>
    %247 = vector.extract_strided_slice %231 {offsets = [0, 128], sizes = [2, 128], strides = [1, 1]} : vector<2x384xf32> to vector<2x128xf32>
    %248 = vector.extract_strided_slice %236 {offsets = [0, 128], sizes = [2, 128], strides = [1, 1]} : vector<2x384xf32> to vector<2x128xf32>
    %249 = arith.addf %247, %248 : vector<2x128xf32>
    %cst_84 = arith.constant 0.000000e+00 : f32
    %250 = vector.broadcast %cst_84 : f32 to vector<2x128xf32>
    %251 = arith.subf %250, %249 : vector<2x128xf32>
    %252 = math.exp %251 : vector<2x128xf32>
    %cst_85 = arith.constant 1.000000e+00 : f32
    %253 = vector.broadcast %cst_85 : f32 to vector<2x128xf32>
    %254 = arith.addf %253, %252 : vector<2x128xf32>
    %cst_86 = arith.constant 1.000000e+00 : f32
    %255 = vector.broadcast %cst_86 : f32 to vector<2x128xf32>
    %256 = arith.divf %255, %254 : vector<2x128xf32>
    %257 = vector.extract_strided_slice %231 {offsets = [0, 256], sizes = [2, 128], strides = [1, 1]} : vector<2x384xf32> to vector<2x128xf32>
    %258 = vector.extract_strided_slice %236 {offsets = [0, 256], sizes = [2, 128], strides = [1, 1]} : vector<2x384xf32> to vector<2x128xf32>
    %259 = arith.mulf %246, %258 : vector<2x128xf32>
    %260 = arith.addf %257, %259 : vector<2x128xf32>
    %261 = math.tanh %260 : vector<2x128xf32>
    %cst_87 = arith.constant 1.000000e+00 : f32
    %262 = vector.broadcast %cst_87 : f32 to vector<2x128xf32>
    %263 = arith.subf %262, %256 : vector<2x128xf32>
    %264 = arith.mulf %263, %261 : vector<2x128xf32>
    %265 = arith.mulf %256, %229 : vector<2x128xf32>
    %266 = arith.addf %264, %265 : vector<2x128xf32>
    %267 = vector.extract_strided_slice %7 {offsets = [0, 7, 0], sizes = [2, 1, 384], strides = [1, 1, 1]} : vector<2x8x384xf32> to vector<2x1x384xf32>
    %268 = vector.shape_cast %267 : vector<2x1x384xf32> to vector<2x384xf32>
    %c0_88 = arith.constant 0 : index
    %c0_89 = arith.constant 0 : index
    %269 = vector.load %arg2[%c0_88, %c0_89] : memref<128x384xf32, #tpu.memory_space<vmem>>, vector<128x384xf32>
    %cst_90 = arith.constant dense<0.000000e+00> : vector<2x384xf32>
    %270 = tpu.matmul %266, %269, %cst_90 {dimension_numbers = #tpu.dot_dimension_numbers<[1], [0], [0], [1], [0, 0, 1, 1], [], []>} : vector<2x128xf32>, vector<128x384xf32>, vector<2x384xf32> -> vector<2x384xf32>
    %c0_91 = arith.constant 0 : index
    %c0_92 = arith.constant 0 : index
    %271 = vector.load %arg3[%c0_91, %c0_92] : memref<1x384xf32, #tpu.memory_space<vmem>>, vector<1x384xf32>
    %272 = vector.broadcast %271 : vector<1x384xf32> to vector<2x384xf32>
    %273 = arith.addf %270, %272 : vector<2x384xf32>
    %274 = vector.extract_strided_slice %268 {offsets = [0, 0], sizes = [2, 128], strides = [1, 1]} : vector<2x384xf32> to vector<2x128xf32>
    %275 = vector.extract_strided_slice %273 {offsets = [0, 0], sizes = [2, 128], strides = [1, 1]} : vector<2x384xf32> to vector<2x128xf32>
    %276 = arith.addf %274, %275 : vector<2x128xf32>
    %cst_93 = arith.constant 0.000000e+00 : f32
    %277 = vector.broadcast %cst_93 : f32 to vector<2x128xf32>
    %278 = arith.subf %277, %276 : vector<2x128xf32>
    %279 = math.exp %278 : vector<2x128xf32>
    %cst_94 = arith.constant 1.000000e+00 : f32
    %280 = vector.broadcast %cst_94 : f32 to vector<2x128xf32>
    %281 = arith.addf %280, %279 : vector<2x128xf32>
    %cst_95 = arith.constant 1.000000e+00 : f32
    %282 = vector.broadcast %cst_95 : f32 to vector<2x128xf32>
    %283 = arith.divf %282, %281 : vector<2x128xf32>
    %284 = vector.extract_strided_slice %268 {offsets = [0, 128], sizes = [2, 128], strides = [1, 1]} : vector<2x384xf32> to vector<2x128xf32>
    %285 = vector.extract_strided_slice %273 {offsets = [0, 128], sizes = [2, 128], strides = [1, 1]} : vector<2x384xf32> to vector<2x128xf32>
    %286 = arith.addf %284, %285 : vector<2x128xf32>
    %cst_96 = arith.constant 0.000000e+00 : f32
    %287 = vector.broadcast %cst_96 : f32 to vector<2x128xf32>
    %288 = arith.subf %287, %286 : vector<2x128xf32>
    %289 = math.exp %288 : vector<2x128xf32>
    %cst_97 = arith.constant 1.000000e+00 : f32
    %290 = vector.broadcast %cst_97 : f32 to vector<2x128xf32>
    %291 = arith.addf %290, %289 : vector<2x128xf32>
    %cst_98 = arith.constant 1.000000e+00 : f32
    %292 = vector.broadcast %cst_98 : f32 to vector<2x128xf32>
    %293 = arith.divf %292, %291 : vector<2x128xf32>
    %294 = vector.extract_strided_slice %268 {offsets = [0, 256], sizes = [2, 128], strides = [1, 1]} : vector<2x384xf32> to vector<2x128xf32>
    %295 = vector.extract_strided_slice %273 {offsets = [0, 256], sizes = [2, 128], strides = [1, 1]} : vector<2x384xf32> to vector<2x128xf32>
    %296 = arith.mulf %283, %295 : vector<2x128xf32>
    %297 = arith.addf %294, %296 : vector<2x128xf32>
    %298 = math.tanh %297 : vector<2x128xf32>
    %cst_99 = arith.constant 1.000000e+00 : f32
    %299 = vector.broadcast %cst_99 : f32 to vector<2x128xf32>
    %300 = arith.subf %299, %293 : vector<2x128xf32>
    %301 = arith.mulf %300, %298 : vector<2x128xf32>
    %302 = arith.mulf %293, %266 : vector<2x128xf32>
    %303 = arith.addf %301, %302 : vector<2x128xf32>
    %304 = vector.shape_cast %44 : vector<2x128xf32> to vector<2x1x128xf32>
    %305 = vector.shape_cast %81 : vector<2x128xf32> to vector<2x1x128xf32>
    %306 = vector.shape_cast %118 : vector<2x128xf32> to vector<2x1x128xf32>
    %307 = vector.shape_cast %155 : vector<2x128xf32> to vector<2x1x128xf32>
    %308 = vector.shape_cast %192 : vector<2x128xf32> to vector<2x1x128xf32>
    %309 = vector.shape_cast %229 : vector<2x128xf32> to vector<2x1x128xf32>
    %310 = vector.shape_cast %266 : vector<2x128xf32> to vector<2x1x128xf32>
    %311 = vector.shape_cast %303 : vector<2x128xf32> to vector<2x1x128xf32>
    %312 = tpu.concatenate %304, %305, %306, %307, %308, %309, %310, %311 in 1 : vector<2x1x128xf32>, vector<2x1x128xf32>, vector<2x1x128xf32>, vector<2x1x128xf32>, vector<2x1x128xf32>, vector<2x1x128xf32>, vector<2x1x128xf32>, vector<2x1x128xf32> -> vector<2x8x128xf32>
    %c0_100 = arith.constant 0 : index
    %313 = arith.index_cast %5 : i32 to index
    %c0_101 = arith.constant 0 : index
    %314 = vector.load %arg8[%c0_100, %313, %c0_101] : memref<2x8x128xf32, #tpu.memory_space<vmem>>, vector<2x8x128xf32>
    tpu.vector_store %arg8[%c0_100, %313, %c0_101], %312 {strides = array<i32>} : memref<2x8x128xf32, #tpu.memory_space<vmem>>, vector<2x8x128xf32>,
    %c1_i32 = arith.constant 1 : i32
    %c0_102 = arith.constant 0 : index
    %c0_103 = arith.constant 0 : index
    %315 = vector.load %arg7[%c0_102, %c0_103] : memref<2x128xf32, #tpu.memory_space<vmem>>, vector<2x128xf32>
    tpu.vector_store %arg7[%c0_102, %c0_103], %303 {strides = array<i32>} : memref<2x128xf32, #tpu.memory_space<vmem>>, vector<2x128xf32>,
    %c0_104 = arith.constant 0 : index
    %c0_105 = arith.constant 0 : index
    %c0_106 = arith.constant 0 : index
    %316 = vector.load %arg8[%c0_104, %c0_105, %c0_106] : memref<2x8x128xf32, #tpu.memory_space<vmem>>, vector<2x8x128xf32>
    %317 = vector.shape_cast %316 : vector<2x8x128xf32> to vector<16x128xf32>
    %c0_107 = arith.constant 0 : index
    %c0_108 = arith.constant 0 : index
    %318 = vector.load %arg4[%c0_107, %c0_108] : memref<128x128xf32, #tpu.memory_space<vmem>>, vector<128x128xf32>
    %cst_109 = arith.constant dense<0.000000e+00> : vector<16x128xf32>
    %319 = tpu.matmul %317, %318, %cst_109 {dimension_numbers = #tpu.dot_dimension_numbers<[1], [0], [0], [1], [0, 0, 1, 1], [], []>} : vector<16x128xf32>, vector<128x128xf32>, vector<16x128xf32> -> vector<16x128xf32>
    %c0_110 = arith.constant 0 : index
    %c0_111 = arith.constant 0 : index
    %320 = vector.load %arg5[%c0_110, %c0_111] : memref<1x128xf32, #tpu.memory_space<vmem>>, vector<1x128xf32>
    %321 = vector.broadcast %320 : vector<1x128xf32> to vector<16x128xf32>
    %322 = arith.addf %319, %321 : vector<16x128xf32>
    %323 = vector.shape_cast %322 : vector<16x128xf32> to vector<2x8x128xf32>
    %c0_112 = arith.constant 0 : index
    %c0_113 = arith.constant 0 : index
    %c0_114 = arith.constant 0 : index
    %324 = vector.load %arg6[%c0_112, %c0_113, %c0_114] : memref<2x8x128xf32, #tpu.memory_space<vmem>>, vector<2x8x128xf32>
    tpu.vector_store %arg6[%c0_112, %c0_113, %c0_114], %323 {strides = array<i32>} : memref<2x8x128xf32, #tpu.memory_space<vmem>>, vector<2x8x128xf32>,
    return
  }
  func.func @transform_0(%arg0: i32) -> (i32, i32, i32) {
    %c0_i32 = arith.constant 0 : i32
    %c0_i32_0 = arith.constant 0 : i32
    %c0_i32_1 = arith.constant 0 : i32
    return %c0_i32, %arg0, %c0_i32_0 : i32, i32, i32
  }
  func.func @transform_1(%arg0: i32) -> (i32, i32) {
    %c0_i32 = arith.constant 0 : i32
    %c0_i32_0 = arith.constant 0 : i32
    %c0_i32_1 = arith.constant 0 : i32
    return %c0_i32, %c0_i32_0 : i32, i32
  }
  func.func @transform_2(%arg0: i32) -> (i32, i32) {
    %c0_i32 = arith.constant 0 : i32
    %c0_i32_0 = arith.constant 0 : i32
    %c0_i32_1 = arith.constant 0 : i32
    return %c0_i32, %c0_i32_0 : i32, i32
  }
  func.func @transform_3(%arg0: i32) -> (i32, i32) {
    %c0_i32 = arith.constant 0 : i32
    %c0_i32_0 = arith.constant 0 : i32
    %c0_i32_1 = arith.constant 0 : i32
    return %c0_i32, %c0_i32_0 : i32, i32
  }
  func.func @transform_4(%arg0: i32) -> (i32, i32) {
    %c0_i32 = arith.constant 0 : i32
    %c0_i32_0 = arith.constant 0 : i32
    %c0_i32_1 = arith.constant 0 : i32
    return %c0_i32, %c0_i32_0 : i32, i32
  }
  func.func @transform_5(%arg0: i32) -> (i32, i32, i32) {
    %c0_i32 = arith.constant 0 : i32
    %c0_i32_0 = arith.constant 0 : i32
    %c0_i32_1 = arith.constant 0 : i32
    return %c0_i32, %arg0, %c0_i32_0 : i32, i32, i32
  }
}

</mosaic_0001>

<bundles_post_ra>
// kernel: event_status_forward.2
= control target key start
LH: loop header
LB: loop body
LE: loop exit
PB: predicated region body
PF: predicated region fallthrough
CT: control target
= control target key end

     0   :  { %12 = vsyncpa [#allocation3], 0  ;;  %s975_s0 = inlined_call_operand.vmem [shape: f32[2,8,384], index: 0, kind: input, shape index: {}]   ;;  %s976_s1 = inlined_call_operand.hbm [shape: f32[384,256], index: 1, kind: input, shape index: {}]   ;;  %s977_s2 = inlined_call_operand.vmem [shape: f32[1,256], index: 2, kind: input, shape index: {}]   ;;  %s978_s3 = inlined_call_operand.hbm [shape: f32[256,128], index: 3, kind: input, shape index: {}]   ;;  %s979_s4 = inlined_call_operand.vmem [shape: f32[1,128], index: 4, kind: input, shape index: {}]   ;;  %s980_s5 = inlined_call_operand.hbm [shape: f32[128,384], index: 5, kind: input, shape index: {}]   ;;  %s981_s6 = inlined_call_operand.vmem [shape: f32[1,384], index: 6, kind: input, shape index: {}]   ;;  %s982_s7 = inlined_call_operand.vmem [shape: f32[2,8,384], index: 7, kind: output, shape index: {}]  }
   0x1   :  { %13 = vsyncpa [#allocation5], 0  ;;  %s850_s24 = smov [#allocation4]  }
   0x2   :  { %s35_s25 = sshll.u32 %s850_s24, 4  ;;  %s36_s25 = int_to_ptr.vmem [resolvable:$true] %s35_s25 }
   0x3   :  { %s794_s26 = scalar_lea.vmem %s36_s25, 4096  ;;  %p799_p1 = scmp.lt.s32.totalorder %s36_s25, %s36_s25 }
   0x4   :  { %p795_p0 = scmp.ne.s32.totalorder %s36_s25, %s794_s26  ;;  %p800_p2 = scmp.lt.s32.totalorder %s794_s26, %s794_s26 }
   0x6   :  { %p801_p3 = por %p800_p2, %p799_p1 }
   0x8   :  { %p802_p4 = pnand %p801_p3, %p795_p0 }
   0xa   :  { %805 = shalt.err (!%p802_p4)
}
   0xb   :  { %s851_s27 = smov 128   ;;  %s852_s28 = smov 8  }
   0xc   :  { %41 = dma.hbm_to_vmem [thread:$0]  %s978_s3, 4096, %s36_s25, [#allocation5], %s851_s27, %s851_s27, %s852_s28  }
   0xd   :  { %s853_s8 = smov [#allocation2]  }
   0xe   :  { %s21_s9 = sshll.u32 %s853_s8, 4  ;;  %s22_s9 = int_to_ptr.vmem [resolvable:$true] %s21_s9 }
   0xf   :  { %s814_s10 = scalar_lea.vmem %s22_s9, 12288  ;;  %p819_p6 = scmp.lt.s32.totalorder %s22_s9, %s22_s9 }
  0x10   :  { %p815_p5 = scmp.ne.s32.totalorder %s22_s9, %s814_s10  ;;  %p820_p7 = scmp.lt.s32.totalorder %s814_s10, %s814_s10 }
  0x12   :  { %p821_p8 = por %p820_p7, %p819_p6 }
  0x14   :  { %p822_p9 = pnand %p821_p8, %p815_p5 }
  0x16   :  { %825 = shalt.err (!%p822_p9)
}
  0x17   :  { %s854_s11 = smov 256   ;;  %s855_s12 = smov 16  }
  0x18   :  { %27 = dma.hbm_to_vmem [thread:$0]  %s976_s1, 12288, %s22_s9, [#allocation3], %s854_s11, %s854_s11, %s855_s12  }
  0x19   :  { %s856_s15 = smov [#allocation6]  }
  0x1a   :  { %s49_s16 = sshll.u32 %s856_s15, 4  ;;  %s50_s16 = int_to_ptr.vmem [resolvable:$true] %s49_s16 }
  0x1b   :  { %s834_s3 = scalar_lea.vmem %s50_s16, 6144  ;;  %p839_p11 = scmp.lt.s32.totalorder %s50_s16, %s50_s16 }
  0x1c   :  { %p835_p10 = scmp.ne.s32.totalorder %s50_s16, %s834_s3  ;;  %p840_p12 = scmp.lt.s32.totalorder %s834_s3, %s834_s3 }
  0x1e   :  { %p841_p13 = por %p840_p12, %p839_p11 }
  0x20   :  { %p842_p0 = pnand %p841_p13, %p835_p10 }
  0x22   :  { %845 = shalt.err (!%p842_p0)
}
  0x23   :  { %s857_s17 = smov 384   ;;  %s858_s18 = smov 24  }
  0x24   :  { %55 = dma.hbm_to_vmem [thread:$0]  %s980_s5, 6144, %s50_s16, [#allocation5], %s857_s17, %s857_s17, %s858_s18  }
  0x25   :  { %846 = dma.done.wait [#allocation3], 12288  }
  0x26   :  { %847 = vsyncadd [#allocation3], 4294955008 }
  0x27   :  { %848 = dma.done.wait [#allocation5], 10240  }
  0x28   :  { %849 = vsyncadd [#allocation5], 4294957056  ;;  %v859_v0 = vmov 0.0   ;;  %v104_v1 = vld [vmem:[#allocation2 + $0xf8] sm:$0xff]  ;;  %v103_v2 = vld [vmem:[#allocation2 + $0xf0] sm:$0xff] }
  0x29   :  { %322 = vmatprep.mubr.f32.mxu1 %v859_v0  ;;  %v102_v3 = vld [vmem:[#allocation2 + $0xe8] sm:$0xff]  ;;  %181 = vmatprep.subr.mxu0 %v104_v1  ;;  %v101_v4 = vld [vmem:[#allocation2 + $0xe0] sm:$0xff]  ;;  %v100_v5 = vld [vmem:[#allocation2 + $0xd8] sm:$0xff] }
  0x2a   :  { %182 = vmatpush1.msra.mxu0 %v103_v2  ;;  %v99_v6 = vld [vmem:[#allocation2 + $0xd0] sm:$0xff]  ;;  %v98_v7 = vld [vmem:[#allocation2 + $0xc8] sm:$0xff]  ;;  %v97_v8 = vld [vmem:[#allocation2 + $0xc0] sm:$0xff] }
  0x2b   :  { %183 = vmatprep.subr.mxu0 %v102_v3  ;;  %v96_v9 = vld [vmem:[#allocation2 + $0xb8] sm:$0xff]  ;;  %v95_v10 = vld [vmem:[#allocation2 + $0xb0] sm:$0xff]  ;;  %v94_v11 = vld [vmem:[#allocation2 + $0xa8] sm:$0xff] }
  0x2c   :  { %184 = vmatpush1.msra.mxu0 %v101_v4  ;;  %v93_v12 = vld [vmem:[#allocation2 + $0xa0] sm:$0xff]  ;;  %v92_v13 = vld [vmem:[#allocation2 + $0x98] sm:$0xff]  ;;  %v91_v14 = vld [vmem:[#allocation2 + $0x90] sm:$0xff] }
  0x2d   :  { %185 = vmatprep.subr.mxu0 %v100_v5  ;;  %v168_v15 = vld [vmem:[#allocation2 + $0x2f8] sm:$0xff]  ;;  %v167_v16 = vld [vmem:[#allocation2 + $0x2f0] sm:$0xff]  ;;  %v90_v17 = vld [vmem:[#allocation2 + $0x88] sm:$0xff] }
  0x2e   :  { %186 = vmatpush1.msra.mxu0 %v99_v6  ;;  %258 = vmatprep.subr.mxu1 %v168_v15  ;;  %v166_v18 = vld [vmem:[#allocation2 + $0x2e8] sm:$0xff]  ;;  %v89_v19 = vld [vmem:[#allocation2 + $0x80] sm:$0xff]  ;;  %v164_v21 = vld [vmem:[#allocation2 + $0x2d8] sm:$0xff] }
  0x2f   :  { %187 = vmatprep.subr.mxu0 %v98_v7  ;;  %259 = vmatpush1.msra.mxu1 %v167_v16  ;;  %v165_v20 = vld [vmem:[#allocation2 + $0x2e0] sm:$0xff]  ;;  %v88_v22 = vld [vmem:[#allocation2 + $0x78] sm:$0xff]  ;;  %v163_v23 = vld [vmem:[#allocation2 + $0x2d0] sm:$0xff] }
  0x30   :  { %188 = vmatpush1.msra.mxu0 %v97_v8  ;;  %260 = vmatprep.subr.mxu1 %v166_v18  ;;  %v87_v24 = vld [vmem:[#allocation2 + $0x70] sm:$0xff]  ;;  %v162_v25 = vld [vmem:[#allocation2 + $0x2c8] sm:$0xff]  ;;  %v161_v27 = vld [vmem:[#allocation2 + $0x2c0] sm:$0xff] }
  0x31   :  { %189 = vmatprep.subr.mxu0 %v96_v9  ;;  %261 = vmatpush1.msra.mxu1 %v165_v20  ;;  %v86_v26 = vld [vmem:[#allocation2 + $0x68] sm:$0xff]  ;;  %v85_v28 = vld [vmem:[#allocation2 + $0x60] sm:$0xff]  ;;  %v160_v29 = vld [vmem:[#allocation2 + $0x2b8] sm:$0xff] }
  0x32   :  { %190 = vmatpush1.msra.mxu0 %v95_v10  ;;  %262 = vmatprep.subr.mxu1 %v164_v21  ;;  %v84_v30 = vld [vmem:[#allocation2 + $0x58] sm:$0xff]  ;;  %v159_v31 = vld [vmem:[#allocation2 + $0x2b0] sm:$0xff]  ;;  %v158_v33 = vld [vmem:[#allocation2 + $0x2a8] sm:$0xff] }
  0x33   :  { %191 = vmatprep.subr.mxu0 %v94_v11  ;;  %263 = vmatpush1.msra.mxu1 %v163_v23  ;;  %v83_v32 = vld [vmem:[#allocation2 + $0x50] sm:$0xff]  ;;  %v82_v34 = vld [vmem:[#allocation2 + $0x48] sm:$0xff]  ;;  %v157_v35 = vld [vmem:[#allocation2 + $0x2a0] sm:$0xff] }
  0x34   :  { %192 = vmatpush1.msra.mxu0 %v93_v12  ;;  %264 = vmatprep.subr.mxu1 %v162_v25  ;;  %v81_v36 = vld [vmem:[#allocation2 + $0x40] sm:$0xff]  ;;  %v156_v37 = vld [vmem:[#allocation2 + $0x298] sm:$0xff]  ;;  %v155_v39 = vld [vmem:[#allocation2 + $0x290] sm:$0xff] }
  0x35   :  { %193 = vmatprep.subr.mxu0 %v92_v13  ;;  %265 = vmatpush1.msra.mxu1 %v161_v27  ;;  %v80_v38 = vld [vmem:[#allocation2 + $0x38] sm:$0xff]  ;;  %v79_v40 = vld [vmem:[#allocation2 + $0x30] sm:$0xff]  ;;  %v154_v41 = vld [vmem:[#allocation2 + $0x288] sm:$0xff] }
  0x36   :  { %194 = vmatpush1.msra.mxu0 %v91_v14  ;;  %266 = vmatprep.subr.mxu1 %v160_v29  ;;  %v78_v42 = vld [vmem:[#allocation2 + $0x28] sm:$0xff]  ;;  %v153_v43 = vld [vmem:[#allocation2 + $0x280] sm:$0xff]  ;;  %v152_v45 = vld [vmem:[#allocation2 + $0x278] sm:$0xff] }
  0x37   :  { %195 = vmatprep.subr.mxu0 %v90_v17  ;;  %267 = vmatpush1.msra.mxu1 %v159_v31  ;;  %v77_v44 = vld [vmem:[#allocation2 + $0x20] sm:$0xff]  ;;  %v76_v46 = vld [vmem:[#allocation2 + $0x18] sm:$0xff]  ;;  %v151_v47 = vld [vmem:[#allocation2 + $0x270] sm:$0xff] }
  0x38   :  { %196 = vmatpush1.msra.mxu0 %v89_v19  ;;  %268 = vmatprep.subr.mxu1 %v158_v33  ;;  %v75_v48 = vld [vmem:[#allocation2 + $0x10] sm:$0xff]  ;;  %v150_v49 = vld [vmem:[#allocation2 + $0x268] sm:$0xff]  ;;  %v149_v51 = vld [vmem:[#allocation2 + $0x260] sm:$0xff] }
  0x39   :  { %197 = vmatprep.subr.mxu0 %v88_v22  ;;  %269 = vmatpush1.msra.mxu1 %v157_v35  ;;  %v74_v50 = vld [vmem:[#allocation2 + $0x8] sm:$0xff]  ;;  %v73_v52 = vld [vmem:[#allocation2] sm:$0xff]  ;;  %v148_v53 = vld [vmem:[#allocation2 + $0x258] sm:$0xff] }
  0x3a   :  { %198 = vmatpush1.msra.mxu0 %v87_v24  ;;  %270 = vmatprep.subr.mxu1 %v156_v37  ;;  %v136_v54 = vld [vmem:[#allocation2 + $0x1f8] sm:$0xff]  ;;  %v147_v55 = vld [vmem:[#allocation2 + $0x250] sm:$0xff]  ;;  %v146_v57 = vld [vmem:[#allocation2 + $0x248] sm:$0xff] }
  0x3b   :  { %199 = vmatprep.subr.mxu0 %v86_v26  ;;  %271 = vmatpush1.msra.mxu1 %v155_v39  ;;  %v135_v56 = vld [vmem:[#allocation2 + $0x1f0] sm:$0xff]  ;;  %v134_v58 = vld [vmem:[#allocation2 + $0x1e8] sm:$0xff]  ;;  %v145_v59 = vld [vmem:[#allocation2 + $0x240] sm:$0xff] }
  0x3c   :  { %200 = vmatpush1.msra.mxu0 %v85_v28  ;;  %272 = vmatprep.subr.mxu1 %v154_v41  ;;  %v133_v60 = vld [vmem:[#allocation2 + $0x1e0] sm:$0xff]  ;;  %v144_v61 = vld [vmem:[#allocation2 + $0x238] sm:$0xff]  ;;  %v143_v63 = vld [vmem:[#allocation2 + $0x230] sm:$0xff] }
  0x3d   :  { %201 = vmatprep.subr.mxu0 %v84_v30  ;;  %273 = vmatpush1.msra.mxu1 %v153_v43  ;;  %v132_v62 = vld [vmem:[#allocation2 + $0x1d8] sm:$0xff]  ;;  %v131_v1 = vld [vmem:[#allocation2 + $0x1d0] sm:$0xff]  ;;  %v142_v2 = vld [vmem:[#allocation2 + $0x228] sm:$0xff] }
  0x3e   :  { %202 = vmatpush1.msra.mxu0 %v83_v32  ;;  %274 = vmatprep.subr.mxu1 %v152_v45  ;;  %v130_v3 = vld [vmem:[#allocation2 + $0x1c8] sm:$0xff]  ;;  %v141_v4 = vld [vmem:[#allocation2 + $0x220] sm:$0xff]  ;;  %v140_v6 = vld [vmem:[#allocation2 + $0x218] sm:$0xff] }
  0x3f   :  { %203 = vmatprep.subr.mxu0 %v82_v34  ;;  %275 = vmatpush1.msra.mxu1 %v151_v47  ;;  %v129_v5 = vld [vmem:[#allocation2 + $0x1c0] sm:$0xff]  ;;  %v128_v7 = vld [vmem:[#allocation2 + $0x1b8] sm:$0xff]  ;;  %v139_v8 = vld [vmem:[#allocation2 + $0x210] sm:$0xff] }
  0x40   :  { %204 = vmatpush1.msra.mxu0 %v81_v36  ;;  %276 = vmatprep.subr.mxu1 %v150_v49  ;;  %v127_v9 = vld [vmem:[#allocation2 + $0x1b0] sm:$0xff]  ;;  %v138_v10 = vld [vmem:[#allocation2 + $0x208] sm:$0xff]  ;;  %v125_v13 = vld [vmem:[#allocation2 + $0x1a0] sm:$0xff] }
  0x41   :  { %205 = vmatprep.subr.mxu0 %v80_v38  ;;  %277 = vmatpush1.msra.mxu1 %v149_v51  ;;  %v126_v11 = vld [vmem:[#allocation2 + $0x1a8] sm:$0xff]  ;;  %v137_v14 = vld [vmem:[#allocation2 + $0x200] sm:$0xff]  ;;  %v124_v15 = vld [vmem:[#allocation2 + $0x198] sm:$0xff] }
  0x42   :  { %206 = vmatpush1.msra.mxu0 %v79_v40  ;;  %278 = vmatprep.subr.mxu1 %v148_v53  ;;  %v68_v12 = vld [vmem:[%s975_s0 + $0x8] sm:$0xff]  ;;  %v69_v16 = vld [vmem:[%s975_s0 + $0x10] sm:$0xff]  ;;  %v370_v19 = vld [vmem:[#allocation4 + $0xf8] sm:$0xff] }
  0x43   :  { %207 = vmatprep.subr.mxu0 %v78_v42  ;;  %279 = vmatpush1.msra.mxu1 %v147_v55  ;;  %v123_v17 = vld [vmem:[#allocation2 + $0x190] sm:$0xff]  ;;  %v122_v18 = vld [vmem:[#allocation2 + $0x188] sm:$0xff]  ;;  %v121_v20 = vld [vmem:[#allocation2 + $0x180] sm:$0xff] }
  0x44   :  { %208 = vmatpush1.msra.mxu0 %v77_v44  ;;  %280 = vmatprep.subr.mxu1 %v146_v57  ;;  %v354_v21 = vld [vmem:[#allocation4 + $0x78] sm:$0xff]  ;;  %v72_v23 = vld [vmem:[%s975_s0 + $0x28] sm:$0xff]  ;;  %v119_v24 = vld [vmem:[#allocation2 + $0x170] sm:$0xff] }
  0x45   :  { %209 = vmatprep.subr.mxu0 %v76_v46  ;;  %281 = vmatpush1.msra.mxu1 %v145_v59  ;;  %v120_v22 = vld [vmem:[#allocation2 + $0x178] sm:$0xff]  ;;  %v369_v25 = vld [vmem:[#allocation4 + $0xf0] sm:$0xff]  ;;  %v118_v26 = vld [vmem:[#allocation2 + $0x168] sm:$0xff] }
  0x46   :  { %210 = vmatpush1.msra.mxu0 %v75_v48  ;;  %282 = vmatprep.subr.mxu1 %v144_v61  ;;  %v353_v27 = vld [vmem:[#allocation4 + $0x70] sm:$0xff]  ;;  %v117_v28 = vld [vmem:[#allocation2 + $0x160] sm:$0xff]  ;;  %v368_v29 = vld [vmem:[#allocation4 + $0xe8] sm:$0xff] }
  0x47   :  { %211 = vmatprep.subr.mxu0 %v74_v50  ;;  %283 = vmatpush1.msra.mxu1 %v143_v63  ;;  %v116_v30 = vld [vmem:[#allocation2 + $0x158] sm:$0xff]  ;;  %v352_v31 = vld [vmem:[#allocation4 + $0x68] sm:$0xff]  ;;  %v115_v32 = vld [vmem:[#allocation2 + $0x150] sm:$0xff] }
  0x48   :  { %212 = vmatpush1.msra.mxu0 %v73_v52  ;;  %284 = vmatprep.subr.mxu1 %v142_v2  ;;  %v367_v33 = vld [vmem:[#allocation4 + $0xe0] sm:$0xff]  ;;  %v114_v34 = vld [vmem:[#allocation2 + $0x148] sm:$0xff]  ;;  %v366_v37 = vld [vmem:[#allocation4 + $0xd8] sm:$0xff] }
  0x49   :  { %213 = vmatprep.subr.mxu0 %v136_v54  ;;  %285 = vmatpush1.msra.mxu1 %v141_v4  ;;  %v351_v35 = vld [vmem:[#allocation4 + $0x60] sm:$0xff]  ;;  %v112_v38 = vld [vmem:[#allocation2 + $0x138] sm:$0xff]  ;;  %v111_v40 = vld [vmem:[#allocation2 + $0x130] sm:$0xff] }
  0x4a   :  { %214 = vmatpush2.msra.mxu0 %v135_v56  ;;  %286 = vmatprep.subr.mxu1 %v140_v6  ;;  %v113_v36 = vld [vmem:[#allocation2 + $0x140] sm:$0xff]  ;;  %v350_v39 = vld [vmem:[#allocation4 + $0x58] sm:$0xff]  ;;  %v365_v41 = vld [vmem:[#allocation4 + $0xd0] sm:$0xff] }
  0x4b   :  { %215 = vmatprep.subr.mxu0 %v134_v58  ;;  %287 = vmatpush1.msra.mxu1 %v139_v8  ;;  %v110_v42 = vld [vmem:[#allocation2 + $0x128] sm:$0xff]  ;;  %v349_v43 = vld [vmem:[#allocation4 + $0x50] sm:$0xff]  ;;  %v109_v44 = vld [vmem:[#allocation2 + $0x120] sm:$0xff] }
  0x4c   :  { %216 = vmatpush2.msra.mxu0 %v133_v60  ;;  %288 = vmatprep.subr.mxu1 %v138_v10  ;;  %v364_v45 = vld [vmem:[#allocation4 + $0xc8] sm:$0xff]  ;;  %v108_v46 = vld [vmem:[#allocation2 + $0x118] sm:$0xff]  ;;  %v107_v48 = vld [vmem:[#allocation2 + $0x110] sm:$0xff] }
  0x4d   :  { %217 = vmatprep.subr.mxu0 %v132_v62  ;;  %245 = vmatprep.mubr.f32.mxu0 %v68_v12  ;;  %v348_v47 = vld [vmem:[#allocation4 + $0x48] sm:$0xff]  ;;  %v363_v49 = vld [vmem:[#allocation4 + $0xc0] sm:$0xff]  ;;  %v362_v53 = vld [vmem:[#allocation4 + $0xb8] sm:$0xff] }
  0x4e   :  { %218 = vmatpush2.msra.mxu0 %v131_v1  ;;  %289 = vmatpush1.msra.mxu1 %v137_v14  ;;  %v106_v50 = vld [vmem:[#allocation2 + $0x108] sm:$0xff]  ;;  %v347_v51 = vld [vmem:[#allocation4 + $0x40] sm:$0xff]  ;;  %v346_v55 = vld [vmem:[#allocation4 + $0x38] sm:$0xff] }
  0x4f   :  { %219 = vmatprep.subr.mxu0 %v130_v3  ;;  %323 = vmatmul.mubr.f32.vlgmr.msra.gmra.mxu1 %v69_v16  ;;  %v105_v52 = vld [vmem:[#allocation2 + $0x100] sm:$0xff]  ;;  %v361_v57 = vld [vmem:[#allocation4 + $0xb0] sm:$0xff]  ;;  %v360_v59 = vld [vmem:[#allocation4 + $0xa8] sm:$0xff] }
  0x50   :  { %220 = vmatpush2.msra.mxu0 %v129_v5  ;;  %328 = vmatprep.mubr.f32.mxu1 %v859_v0  ;;  %v67_v54 = vld [vmem:[%s975_s0] sm:$0xff]  ;;  %v345_v58 = vld [vmem:[#allocation4 + $0x30] sm:$0xff]  ;;  %v70_v60 = vld [vmem:[%s975_s0 + $0x18] sm:$0xff] }
  0x51   :  { %221 = vmatprep.subr.mxu0 %v128_v7  ;;  %685 = vmatprep.subr.mxu1 %v370_v19  ;;  %v71_v56 = vld [vmem:[%s975_s0 + $0x20] sm:$0xff]  ;;  %v344_v61 = vld [vmem:[#allocation4 + $0x28] sm:$0xff]  ;;  %v358_v1 = vld [vmem:[#allocation4 + $0x98] sm:$0xff] }
  0x52   :  { %222 = vmatpush2.msra.mxu0 %v127_v9  ;;  %686 = vmatpush3.msra.mxu1 %v354_v21  ;;  %v359_v62 = vld [vmem:[#allocation4 + $0xa0] sm:$0xff]  ;;  %v342_v2 = vld [vmem:[#allocation4 + $0x18] sm:$0xff]  ;;  %v357_v3 = vld [vmem:[#allocation4 + $0x90] sm:$0xff] }
  0x53   :  { %223 = vmatprep.subr.mxu0 %v126_v11  ;;  %329 = vmatmul.mubr.f32.gmra.mxu1 %v72_v23  ;;  %v343_v63 = vld [vmem:[#allocation4 + $0x20] sm:$0xff]  ;;  %v341_v4 = vld [vmem:[#allocation4 + $0x10] sm:$0xff]  ;;  %v356_v5 = vld [vmem:[#allocation4 + $0x88] sm:$0xff] }
  0x54   :  { %224 = vmatpush2.msra.mxu0 %v125_v13  ;;  %687 = vmatprep.subr.mxu1 %v369_v25  ;;  %v340_v6 = vld [vmem:[#allocation4 + $0x8] sm:$0xff]  ;;  %v355_v7 = vld [vmem:[#allocation4 + $0x80] sm:$0xff]  ;;  %v501_v9 = vld [vmem:[#allocation6 + $0x170] sm:$0xff] }
  0x55   :  { %225 = vmatprep.subr.mxu0 %v124_v15  ;;  %688 = vmatpush3.msra.mxu1 %v353_v27  ;;  %v339_v8 = vld [vmem:[#allocation4] sm:$0xff]  ;;  %v500_v10 = vld [vmem:[#allocation6 + $0x168] sm:$0xff]  ;;  %v498_v11 = vld [vmem:[#allocation6 + $0x158] sm:$0xff] }
  0x56   :  { %226 = vmatpush2.msra.mxu0 %v123_v17  ;;  %689 = vmatprep.subr.mxu1 %v368_v29  ;;  %v497_v12 = vld [vmem:[#allocation6 + $0x150] sm:$0xff]  ;;  %v930_v13 = vld [vmem:[#allocation6 + $0x178] sm:$0xff]  ;;  %v495_v14 = vld [vmem:[#allocation6 + $0x140] sm:$0xff] }
  0x57   :  { %227 = vmatprep.subr.mxu0 %v122_v18  ;;  %690 = vmatpush3.msra.mxu1 %v352_v31  ;;  %v494_v15 = vld [vmem:[#allocation6 + $0x138] sm:$0xff]  ;;  %v492_v16 = vld [vmem:[#allocation6 + $0x128] sm:$0xff]  ;;  %v491_v17 = vld [vmem:[#allocation6 + $0x120] sm:$0xff] }
  0x58   :  { %228 = vmatpush2.msra.mxu0 %v121_v20  ;;  %691 = vmatprep.subr.mxu1 %v367_v33  ;;  %v489_v18 = vld [vmem:[#allocation6 + $0x110] sm:$0xff]  ;;  %v488_v19 = vld [vmem:[#allocation6 + $0x108] sm:$0xff]  ;;  %v486_v20 = vld [vmem:[#allocation6 + $0xf8] sm:$0xff]  ;;  %v171_v33 = vlaneseq }
  0x59   :  { %229 = vmatprep.subr.mxu0 %v120_v22  ;;  %692 = vmatpush3.msra.mxu1 %v351_v35  ;;  %v485_v21 = vld [vmem:[#allocation6 + $0xf0] sm:$0xff]  ;;  %v483_v22 = vld [vmem:[#allocation6 + $0xe0] sm:$0xff]  ;;  %v482_v23 = vld [vmem:[#allocation6 + $0xd8] sm:$0xff] }
  0x5a   :  { %230 = vmatpush2.msra.mxu0 %v119_v24  ;;  %693 = vmatprep.subr.mxu1 %v366_v37  ;;  %v480_v24 = vld [vmem:[#allocation6 + $0xc8] sm:$0xff]  ;;  %v479_v25 = vld [vmem:[#allocation6 + $0xc0] sm:$0xff]  ;;  %v473_v29 = vld [vmem:[#allocation6 + $0x90] sm:$0xff] }
  0x5b   :  { %231 = vmatprep.subr.mxu0 %v118_v26  ;;  %694 = vmatpush3.msra.mxu1 %v350_v39  ;;  %v477_v26 = vld [vmem:[#allocation6 + $0xb0] sm:$0xff]  ;;  %v476_v27 = vld [vmem:[#allocation6 + $0xa8] sm:$0xff]  ;;  %v470_v31 = vld [vmem:[#allocation6 + $0x78] sm:$0xff] }
  0x5c   :  { %232 = vmatpush2.msra.mxu0 %v117_v28  ;;  %695 = vmatprep.subr.mxu1 %v365_v41  ;;  %v474_v28 = vld [vmem:[#allocation6 + $0x98] sm:$0xff] }
  0x5d   :  { %233 = vmatprep.subr.mxu0 %v116_v30  ;;  %696 = vmatpush3.msra.mxu1 %v349_v43  ;;  %v471_v30 = vld [vmem:[#allocation6 + $0x80] sm:$0xff] }
  0x5e   :  { %234 = vmatpush2.msra.mxu0 %v115_v32  ;;  %697 = vmatprep.subr.mxu1 %v364_v45  ;;  %v468_v32 = vld [vmem:[#allocation6 + $0x68] sm:$0xff] }
  0x5f   :  { %235 = vmatprep.subr.mxu0 %v114_v34  ;;  %698 = vmatpush3.msra.mxu1 %v348_v47  ;;  %v933_v34 = vshrl.u32 %v171_v33, 7 }
  0x60   :  { %236 = vmatpush2.msra.mxu0 %v113_v36  ;;  %699 = vmatprep.subr.mxu1 %v363_v49  ;;  %v169_v36 = vld [vmem:[%s977_s2] sm:$0x3] }
  0x61   :  { %237 = vmatprep.subr.mxu0 %v112_v38  ;;  %700 = vmatpush3.msra.mxu1 %v347_v51  ;;  %v173_v35 = vsub.s32 0, %v933_v34  ;;  %v177_v37 = vsub.s32 1, %v933_v34 }
  0x62   :  { %238 = vmatpush2.msra.mxu0 %v111_v40  ;;  %701 = vmatprep.subr.mxu1 %v362_v53 }
  0x63   :  { %239 = vmatprep.subr.mxu0 %v110_v42  ;;  %702 = vmatpush3.msra.mxu1 %v346_v55  ;;  %v174_v39 = vrot.slane %v169_v36, %v173_v35  ;;  %v178_v40 = vrot.slane %v169_v36, %v177_v37  ;;  %v515_v36 = vsub.s32 2, %v933_v34 }
  0x64   :  { %240 = vmatpush2.msra.mxu0 %v109_v44  ;;  %703 = vmatprep.subr.mxu1 %v361_v57 }
  0x65   :  { %241 = vmatprep.subr.mxu0 %v108_v46  ;;  %704 = vmatpush3.msra.mxu1 %v345_v58  ;;  %v499_v58 = vld [vmem:[#allocation6 + $0x160] sm:$0xff] }
  0x66   :  { %242 = vmatpush2.msra.mxu0 %v107_v48  ;;  %705 = vmatprep.subr.mxu1 %v360_v59 }
  0x67   :  { %243 = vmatprep.subr.mxu0 %v106_v50  ;;  %706 = vmatpush3.msra.mxu1 %v344_v61 }
  0x68   :  { %244 = vmatpush2.msra.mxu0 %v105_v52  ;;  %707 = vmatprep.subr.mxu1 %v359_v62  ;;  %v493_v62 = vld [vmem:[#allocation6 + $0x130] sm:$0xff] }
  0x69   :  { %246 = vmatmul.mubr.f32.vlgmr.msra.gmra.mxu0 %v67_v54  ;;  %708 = vmatpush3.msra.mxu1 %v343_v63  ;;  %v490_v63 = vld [vmem:[#allocation6 + $0x118] sm:$0xff] }
  0x6a   :  { %251 = vmatprep.mubr.f32.mxu0 %v71_v56  ;;  %709 = vmatprep.subr.mxu1 %v358_v1  ;;  %v487_v1 = vld [vmem:[#allocation6 + $0x100] sm:$0xff] }
  0x6b   :  { %710 = vmatpush3.msra.mxu1 %v342_v2  ;;  %520 = vmatprep.subr.mxu0 %v501_v9  ;;  %v484_v2 = vld [vmem:[#allocation6 + $0xe8] sm:$0xff] }
  0x6c   :  { %711 = vmatprep.subr.mxu1 %v357_v3  ;;  %521 = vmatpush1.msra.mxu0 %v500_v10  ;;  %v481_v3 = vld [vmem:[#allocation6 + $0xd0] sm:$0xff]  ;;  %v464_v9 = vld [vmem:[#allocation6 + $0x48] sm:$0xff]  ;;  %v462_v10 = vld [vmem:[#allocation6 + $0x38] sm:$0xff] }
  0x6d   :  { %252 = vmatmul.mubr.f32.gmra.mxu0 %v70_v60  ;;  %712 = vmatpush3.msra.mxu1 %v341_v4  ;;  %v496_v60 = vld [vmem:[#allocation6 + $0x148] sm:$0xff]  ;;  %v478_v4 = vld [vmem:[#allocation6 + $0xb8] sm:$0xff] }
  0x6e   :  { %584 = vmatprep.mubr.f32.mxu0 %v859_v0  ;;  %713 = vmatprep.subr.mxu1 %v356_v5  ;;  %v475_v5 = vld [vmem:[#allocation6 + $0xa0] sm:$0xff] }
  0x6f   :  { %714 = vmatpush3.msra.mxu1 %v340_v6  ;;  %522 = vmatprep.subr.mxu0 %v498_v11  ;;  %v467_v6 = vld [vmem:[#allocation6 + $0x60] sm:$0xff]  ;;  %v469_v11 = vld [vmem:[#allocation6 + $0x70] sm:$0xff] }
  0x70   :  { %715 = vmatprep.subr.mxu1 %v355_v7  ;;  %523 = vmatpush1.msra.mxu0 %v497_v12  ;;  %v465_v7 = vld [vmem:[#allocation6 + $0x50] sm:$0xff] }
  0x71   :  { %716 = vmatpush3.msra.mxu1 %v339_v8  ;;  %524 = vmatprep.subr.mxu0 %v495_v14  ;;  %v472_v8 = vld [vmem:[#allocation6 + $0x88] sm:$0xff]  ;;  %v461_v12 = vld [vmem:[#allocation6 + $0x30] sm:$0xff]  ;;  %v466_v14 = vld [vmem:[#allocation6 + $0x58] sm:$0xff] }
  0x72   :  { %741 = vmatprep.subr.mxu1 %v930_v13  ;;  %525 = vmatpush1.msra.mxu0 %v494_v15  ;;  %v458_v15 = vld [vmem:[#allocation6 + $0x18] sm:$0xff] }
  0x73   :  { %526 = vmatprep.subr.mxu0 %v492_v16  ;;  %v456_v16 = vld [vmem:[#allocation6 + $0x8] sm:$0xff] }
  0x74   :  { %527 = vmatpush1.msra.mxu0 %v491_v17  ;;  %v463_v17 = vld [vmem:[#allocation6 + $0x40] sm:$0xff] }
  0x75   :  { %528 = vmatprep.subr.mxu0 %v489_v18  ;;  %v455_v18 = vld [vmem:[#allocation6] sm:$0xff] }
  0x76   :  { %529 = vmatpush1.msra.mxu0 %v488_v19  ;;  %v460_v19 = vld [vmem:[#allocation6 + $0x28] sm:$0xff] }
  0x77   :  { %530 = vmatprep.subr.mxu0 %v486_v20  ;;  %v457_v20 = vld [vmem:[#allocation6 + $0x10] sm:$0xff] }
  0x78   :  { %531 = vmatpush1.msra.mxu0 %v485_v21 }
  0x79   :  { %532 = vmatprep.subr.mxu0 %v483_v22  ;;  %v684_v22 = vld [vmem:[%s979_s4] ss:$0 sm:$0xff] }
  0x7a   :  { %533 = vmatpush1.msra.mxu0 %v482_v23 }
  0x7b   :  { %534 = vmatprep.subr.mxu0 %v480_v24 }
  0x7c   :  { %535 = vmatpush1.msra.mxu0 %v479_v25 }
  0x7d   :  { %536 = vmatprep.subr.mxu0 %v477_v26 }
  0x7e   :  { %537 = vmatpush1.msra.mxu0 %v476_v27 }
  0x7f   :  { %538 = vmatprep.subr.mxu0 %v474_v28 }
  0x80   :  { %539 = vmatpush1.msra.mxu0 %v473_v29 }
  0x81   :  { %540 = vmatprep.subr.mxu0 %v471_v30 }
  0x82   :  { %541 = vmatpush1.msra.mxu0 %v470_v31 }
  0x83   :  { %542 = vmatprep.subr.mxu0 %v468_v32  ;;  %v503_v32 = vld [vmem:[%s981_s6] sm:$0x7] }
  0x84   :  { %543 = vmatpush1.msra.mxu0 %v467_v6  ;;  %v508_v33 = vrot.slane %v503_v32, %v173_v35 }
  0x85   :  { %544 = vmatprep.subr.mxu0 %v465_v7 }
  0x86   :  { %545 = vmatpush1.msra.mxu0 %v464_v9 }
  0x87   :  { %546 = vmatprep.subr.mxu0 %v462_v10 }
  0x88   :  { %547 = vmatpush1.msra.mxu0 %v461_v12 }
 0x10f   :  { %v324_v38 = vpop.f32.mrf.mxu1 }
 0x111   :  { %v326_v42 = vpop.f32.mrf.mxu1 }
 0x113   :  { %v330_v48 = vpop.f32.mrf.mxu1 }
 0x115   :  { %v332_v56 = vpop.f32.mrf.mxu1 }
 0x129   :  { %v247_v41 = vpop.f32.mrf.mxu0 }
 0x12a   :  { %v248_v43 = vadd.f32 %v247_v41, %v174_v39  ;;  %v516_v41 = vrot.slane %v503_v32, %v515_v36 }
 0x12b   :  { %v249_v44 = vpop.f32.mrf.mxu0 }
 0x12c   :  { %v250_v45 = vadd.f32 %v249_v44, %v178_v40  ;;  %v325_v46 = vadd.f32 %v324_v38, %v248_v43  ;;  %v512_v38 = vrot.slane %v503_v32, %v177_v37 }
 0x12d   :  { %v253_v47 = vpop.f32.mrf.mxu0 }
 0x12e   :  { %v327_v49 = vadd.f32 %v326_v42, %v250_v45  ;;  %v254_v50 = vadd.f32 %v253_v47, %v174_v39  ;;  %v335_v54 = vmax.f32 %v325_v46, 0.0 }
 0x12f   :  { %v255_v51 = vpop.f32.mrf.mxu0 }
 0x130   :  { %v336_v52 = vmax.f32 %v327_v49, 0.0  ;;  %v256_v53 = vadd.f32 %v255_v51, %v178_v40  ;;  %v331_v55 = vadd.f32 %v330_v48, %v254_v50 }
 0x132   :  { %v333_v57 = vadd.f32 %v332_v56, %v256_v53  ;;  %442 = vmatprep.mubr.f32.mxu1 %v336_v52  ;;  %v337_v61 = vmax.f32 %v331_v55, 0.0 }
 0x133   :  { %443 = vmatmul.mubr.f32.vlgmr.msra.gmra.mxu1 %v335_v54 }
 0x134   :  { %v338_v59 = vmax.f32 %v333_v57, 0.0  ;;  %742 = vmatpush3.msra.mxu1 %v930_v13  ;;  %v459_v13 = vld [vmem:[#allocation6 + $0x20] sm:$0xff] }
 0x135   :  { %743 = vmatprep.subr.mxu1 %v499_v58  ;;  %548 = vmatprep.subr.mxu0 %v459_v13 }
 0x136   :  { %447 = vmatprep.mubr.f32.mxu1 %v338_v59  ;;  %744 = vmatpush3.msra.mxu1 %v499_v58 }
 0x137   :  { %448 = vmatmul.mubr.f32.gmra.mxu1 %v337_v61  ;;  %745 = vmatprep.subr.mxu1 %v496_v60 }
 0x138   :  { %746 = vmatpush3.msra.mxu1 %v496_v60  ;;  %549 = vmatpush1.msra.mxu0 %v458_v15 }
 0x139   :  { %747 = vmatprep.subr.mxu1 %v493_v62  ;;  %550 = vmatprep.subr.mxu0 %v456_v16 }
 0x13a   :  { %748 = vmatpush3.msra.mxu1 %v493_v62  ;;  %551 = vmatpush1.msra.mxu0 %v455_v18 }
 0x13b   :  { %749 = vmatprep.subr.mxu1 %v490_v63 }
 0x13c   :  { %750 = vmatpush3.msra.mxu1 %v490_v63 }
 0x13d   :  { %751 = vmatprep.subr.mxu1 %v487_v1 }
 0x13e   :  { %752 = vmatpush3.msra.mxu1 %v487_v1 }
 0x13f   :  { %753 = vmatprep.subr.mxu1 %v484_v2 }
 0x140   :  { %754 = vmatpush3.msra.mxu1 %v484_v2 }
 0x141   :  { %755 = vmatprep.subr.mxu1 %v481_v3 }
 0x142   :  { %756 = vmatpush3.msra.mxu1 %v481_v3 }
 0x143   :  { %757 = vmatprep.subr.mxu1 %v478_v4 }
 0x144   :  { %758 = vmatpush3.msra.mxu1 %v478_v4 }
 0x145   :  { %759 = vmatprep.subr.mxu1 %v475_v5 }
 0x146   :  { %760 = vmatpush3.msra.mxu1 %v475_v5 }
 0x147   :  { %761 = vmatprep.subr.mxu1 %v472_v8 }
 0x148   :  { %762 = vmatpush3.msra.mxu1 %v472_v8 }
 0x149   :  { %763 = vmatprep.subr.mxu1 %v469_v11 }
 0x14a   :  { %764 = vmatpush3.msra.mxu1 %v469_v11 }
 0x14b   :  { %765 = vmatprep.subr.mxu1 %v466_v14 }
 0x14c   :  { %766 = vmatpush3.msra.mxu1 %v466_v14 }
 0x14d   :  { %767 = vmatprep.subr.mxu1 %v463_v17 }
 0x14e   :  { %768 = vmatpush3.msra.mxu1 %v463_v17 }
 0x14f   :  { %769 = vmatprep.subr.mxu1 %v460_v19 }
 0x150   :  { %770 = vmatpush3.msra.mxu1 %v460_v19 }
 0x151   :  { %771 = vmatprep.subr.mxu1 %v457_v20 }
 0x152   :  { %772 = vmatpush3.msra.mxu1 %v457_v20 }
 0x1f3   :  { %v717_v21 = vpop.f32.mrf.mxu1 }
 0x1f5   :  { %v718_v23 = vpop.f32.mrf.mxu1 }
 0x1f6   :  { %v719_v24 = vadd.f32 %v718_v23, %v717_v21 }
 0x1f7   :  { %v720_v25 = vpop.f32.mrf.mxu1 }
 0x1f8   :  { %v445_v26 = vadd.f32 %v719_v24, %v684_v22 }
 0x1f9   :  { %v721_v27 = vpop.f32.mrf.mxu1 }
 0x1fa   :  { %v453_v28 = vmax.f32 %v445_v26, 0.0  ;;  %v722_v29 = vadd.f32 %v721_v27, %v720_v25 }
 0x1fc   :  { %v450_v30 = vadd.f32 %v722_v29, %v684_v22  ;;  %585 = vmatmul.mubr.f32.vlgmr.msra.gmra.mxu0 %v453_v28  ;;  %773 = vmatprep.mubr.f32.mxu1 %v453_v28 }
 0x1fd   :  { %590 = vmatprep.mubr.f32.mxu0 %v859_v0 }
 0x1fe   :  { %v454_v31 = vmax.f32 %v450_v30, 0.0 }
 0x200   :  { %591 = vmatmul.mubr.f32.gmra.mxu0 %v454_v31  ;;  %774 = vmatmul.mubr.f32.vlgmr.msra.gmra.mxu1 %v454_v31 }
 0x2bc   :  { %v586_v39 = vpop.f32.mrf.mxu0 }
 0x2bd   :  { %v587_v40 = vadd.f32 %v586_v39, %v508_v33 }
 0x2be   :  { %v588_v42 = vpop.f32.mrf.mxu0 }
 0x2bf   :  { %672 = vst [vmem:[%s982_s7] sm:$0xff] %v587_v40  ;;  %v589_v0 = vadd.f32 %v588_v42, %v512_v38 }
 0x2c0   :  { %v592_v43 = vpop.f32.mrf.mxu0  ;;  %v775_v44 = vpop.f32.mrf.mxu1 }
 0x2c1   :  { %673 = vst [vmem:[%s982_s7 + $0x8] sm:$0xff] %v589_v0  ;;  %v593_v35 = vadd.f32 %v592_v43, %v508_v33  ;;  %v669_v45 = vadd.f32 %v775_v44, %v516_v41 }
 0x2c2   :  { %v594_v46 = vpop.f32.mrf.mxu0  ;;  %v663_v34 = vpop.f32.mrf.mxu1 }
 0x2c3   :  { %675 = vst [vmem:[%s982_s7 + $0x18] sm:$0xff] %v593_v35  ;;  %677 = vst [vmem:[%s982_s7 + $0x28] sm:$0xff] %v669_v45  ;;  %v595_v37 = vadd.f32 %v594_v46, %v512_v38  ;;  %v664_v47 = vadd.f32 %v663_v34, %v516_v41 }
 0x2c5   :  { %676 = vst [vmem:[%s982_s7 + $0x20] sm:$0xff] %v595_v37  ;;  %674 = vst [vmem:[%s982_s7 + $0x10] sm:$0xff] %v664_v47 }
 0x2c6   :  { %682 = vsyncpa [#allocation3], 1 }
 0x2c7   :  { %683 = vsyncpa [#allocation5], 1 }

// kernel: event_status_forward.3
= control target key start
LH: loop header
LB: loop body
LE: loop exit
PB: predicated region body
PF: predicated region fallthrough
CT: control target
= control target key end

     0   :  { %v3941_v3 = vmov 0.0   ;;  %vm2573_vm0 = vmmov 0   ;;  %v85_v50 = vlaneseq  ;;  %vm302_vm1 = vcmask 1041409   ;;  %s3935_s1 = inlined_call_operand.vmem [shape: f32[128,384], index: 1, kind: input, shape index: {}]   ;;  %s3936_s2 = inlined_call_operand.vmem [shape: f32[1,384], index: 2, kind: input, shape index: {}]   ;;  %s3937_s0 = inlined_call_operand.vmem [shape: f32[2,8,384], index: 0, kind: input, shape index: {}]   ;;  %s3938_s3 = inlined_call_operand.vmem [shape: f32[128,128], index: 3, kind: input, shape index: {}]   ;;  %s3939_s4 = inlined_call_operand.vmem [shape: f32[1,128], index: 4, kind: input, shape index: {}]   ;;  %s3940_s5 = inlined_call_operand.vmem [shape: f32[2,8,128], index: 5, kind: output, shape index: {}]  }
   0x1   :  { %v2607_v0 = vld [vmem:[%s3935_s1 + $0x170] sm:$0xff]  ;;  %v2612_v1 = vld [vmem:[%s3935_s1 + $0x168] sm:$0xff]  ;;  %v2617_v2 = vld [vmem:[%s3935_s1 + $0x158] sm:$0xff]  ;;  %164 = vmatprep.mubr.f32.mxu0 %v3941_v3  ;;  %24 = vst [vmem:[#allocation2] sm:$0x3] %v3941_v3  ;;  %2041 = vmatprep.subr.mxu1 %v3941_v3  ;;  %vm1750_vm2 = vcmask 1040384  }
   0x2   :  { %4006 = vst [vmem:[#allocation4_spill] sm:$0xff] %v2607_v0  ;;  %100 = vmatprep.subr.mxu0 %v2607_v0  ;;  %v2626_v4 = vld [vmem:[%s3935_s1 + $0x150] sm:$0xff]  ;;  %2073 = vmatprep.mubr.msk.f32.mxu1 %vm2573_vm0, %v3941_v3  ;;  %v2634_v5 = vld [vmem:[%s3935_s1 + $0x140] sm:$0xff]  ;;  %v2640_v6 = vld [vmem:[%s3935_s1 + $0x138] sm:$0xff]  ;;  %v86_v51 = vshrl.u32 %v85_v50, 7  ;;  %vm1753_vm3 = vcmask 1041408  }
   0x3   :  { %101 = vmatpush1.msra.mxu0 %v2612_v1  ;;  %v2646_v7 = vld [vmem:[%s3935_s1 + $0x128] sm:$0xff]  ;;  %v2652_v8 = vld [vmem:[%s3935_s1 + $0x120] sm:$0xff]  ;;  %v2658_v9 = vld [vmem:[%s3935_s1 + $0x110] sm:$0xff]  ;;  %vm1756_vm4 = vcmask 1042432   ;;  %vm1759_vm5 = vcmask 1043456   ;;  %vm1762_vm6 = vcmask 1044480  }
   0x4   :  { %102 = vmatprep.subr.mxu0 %v2617_v2  ;;  %v2664_v10 = vld [vmem:[%s3935_s1 + $0x108] sm:$0xff]  ;;  %v2670_v11 = vld [vmem:[%s3935_s1 + $0xf8] sm:$0xff]  ;;  %v2676_v12 = vld [vmem:[%s3935_s1 + $0xf0] sm:$0xff]  ;;  %v87_v52 = vsub.s32 0, %v86_v51  ;;  %v91_v54 = vsub.s32 1, %v86_v51  ;;  %vm1765_vm7 = vcmask 1045504  }
   0x5   :  { %103 = vmatpush1.msra.mxu0 %v2626_v4  ;;  %v2682_v13 = vld [vmem:[%s3935_s1 + $0xe0] sm:$0xff]  ;;  %v2688_v14 = vld [vmem:[%s3935_s1 + $0xd8] sm:$0xff]  ;;  %v2704_v17 = vld [vmem:[%s3935_s1 + $0xc8] sm:$0xff]  ;;  %vm1768_vm8 = vcmask 1046528  }
   0x6   :  { %104 = vmatprep.subr.mxu0 %v2634_v5  ;;  %v2693_v15 = vld [vmem:[%s3935_s1 + $0x178] sm:$0xff]  ;;  %v2698_v16 = vld [vmem:[%s3935_s1 + $0x160] sm:$0xff]  ;;  %v2717_v19 = vld [vmem:[%s3935_s1 + $0x148] sm:$0xff] }
   0x7   :  { %105 = vmatpush1.msra.mxu0 %v2640_v6  ;;  %2042 = vmatpush3.msra.mxu1 %v2693_v15  ;;  %v2711_v18 = vld [vmem:[%s3935_s1 + $0xc0] sm:$0xff]  ;;  %v2723_v20 = vld [vmem:[%s3935_s1 + $0xb0] sm:$0xff]  ;;  %v2730_v21 = vld [vmem:[%s3935_s1 + $0xa8] sm:$0xff] }
   0x8   :  { %106 = vmatprep.subr.mxu0 %v2646_v7  ;;  %2043 = vmatprep.subr.mxu1 %v3941_v3  ;;  %v2736_v22 = vld [vmem:[%s3935_s1 + $0x130] sm:$0xff]  ;;  %v2742_v23 = vld [vmem:[%s3935_s1 + $0x98] sm:$0xff]  ;;  %v2761_v26 = vld [vmem:[%s3935_s1 + $0x80] sm:$0xff] }
   0x9   :  { %107 = vmatpush1.msra.mxu0 %v2652_v8  ;;  %2044 = vmatpush3.msra.mxu1 %v2698_v16  ;;  %v2749_v24 = vld [vmem:[%s3935_s1 + $0x90] sm:$0xff]  ;;  %v2755_v25 = vld [vmem:[%s3935_s1 + $0x118] sm:$0xff]  ;;  %v2774_v28 = vld [vmem:[%s3935_s1 + $0x100] sm:$0xff] }
   0xa   :  { %108 = vmatprep.subr.mxu0 %v2658_v9  ;;  %2045 = vmatprep.subr.mxu1 %v3941_v3  ;;  %v2768_v27 = vld [vmem:[%s3935_s1 + $0x78] sm:$0xff]  ;;  %v2780_v29 = vld [vmem:[%s3935_s1 + $0x68] sm:$0xff]  ;;  %v2787_v30 = vld [vmem:[%s3935_s1 + $0x60] sm:$0xff] }
   0xb   :  { %109 = vmatpush1.msra.mxu0 %v2664_v10  ;;  %2046 = vmatpush3.msra.mxu1 %v2717_v19  ;;  %v2793_v31 = vld [vmem:[%s3935_s1 + $0xe8] sm:$0xff]  ;;  %v2799_v32 = vld [vmem:[%s3935_s1 + $0x50] sm:$0xff]  ;;  %v2818_v35 = vld [vmem:[%s3935_s1 + $0x38] sm:$0xff] }
   0xc   :  { %110 = vmatprep.subr.mxu0 %v2670_v11  ;;  %2047 = vmatprep.subr.mxu1 %v3941_v3  ;;  %4007 = vst [vmem:[#allocation5_spill] sm:$0xff] %v2799_v32  ;;  %v2806_v33 = vld [vmem:[%s3935_s1 + $0x48] sm:$0xff]  ;;  %v2812_v34 = vld [vmem:[%s3935_s1 + $0xd0] sm:$0xff]  ;;  %4009 = vst [vmem:[#allocation7_spill] sm:$0xff] %v2818_v35 }
   0xd   :  { %111 = vmatpush1.msra.mxu0 %v2676_v12  ;;  %2048 = vmatpush3.msra.mxu1 %v2736_v22  ;;  %4008 = vst [vmem:[#allocation6_spill] sm:$0xff] %v2806_v33  ;;  %v2825_v36 = vld [vmem:[%s3935_s1 + $0x30] sm:$0xff]  ;;  %v2831_v37 = vld [vmem:[%s3935_s1 + $0xb8] sm:$0xff]  ;;  %v2837_v38 = vld [vmem:[%s3935_s1 + $0x20] sm:$0xff] }
   0xe   :  { %112 = vmatprep.subr.mxu0 %v2682_v13  ;;  %2049 = vmatprep.subr.mxu1 %v3941_v3  ;;  %4010 = vst [vmem:[#allocation8_spill] sm:$0xff] %v2825_v36  ;;  %4011 = vst [vmem:[#allocation9_spill] sm:$0xff] %v2837_v38  ;;  %v2844_v39 = vld [vmem:[%s3935_s1 + $0x18] sm:$0xff]  ;;  %v2850_v40 = vld [vmem:[%s3935_s1 + $0xa0] sm:$0xff] }
   0xf   :  { %113 = vmatpush1.msra.mxu0 %v2688_v14  ;;  %2050 = vmatpush3.msra.mxu1 %v2755_v25  ;;  %4012 = vst [vmem:[#allocation10_spill] sm:$0xff] %v2844_v39  ;;  %v2856_v41 = vld [vmem:[%s3935_s1 + $0x8] sm:$0xff]  ;;  %v2863_v42 = vld [vmem:[%s3935_s1] sm:$0xff]  ;;  %v2880_v45 = vld [vmem:[%s3935_s1 + $0x70] sm:$0xff] }
  0x10   :  { %114 = vmatprep.subr.mxu0 %v2704_v17  ;;  %2051 = vmatprep.subr.mxu1 %v3941_v3  ;;  %4013 = vst [vmem:[#allocation11_spill] sm:$0xff] %v2856_v41  ;;  %4014 = vst [vmem:[#allocation12_spill] sm:$0xff] %v2863_v42  ;;  %v2869_v43 = vld [vmem:[%s3935_s1 + $0x88] sm:$0xff]  ;;  %v2872_v44 = vld [vmem:[#allocation2] sm:$0x3] }
  0x11   :  { %115 = vmatpush1.msra.mxu0 %v2711_v18  ;;  %2052 = vmatpush3.msra.mxu1 %v2774_v28  ;;  %v2889_v46 = vld [vmem:[%s3935_s1 + $0x58] sm:$0xff]  ;;  %v2897_v47 = vld [vmem:[%s3935_s1 + $0x40] sm:$0xff]  ;;  %v2906_v48 = vld [vmem:[%s3935_s1 + $0x28] sm:$0xff] }
  0x12   :  { %116 = vmatprep.subr.mxu0 %v2723_v20  ;;  %2053 = vmatprep.subr.mxu1 %v3941_v3  ;;  %4015 = vst [vmem:[#allocation13_spill] sm:$0xff] %v2889_v46  ;;  %4016 = vst [vmem:[#allocation14_spill] sm:$0xff] %v2897_v47  ;;  %v2915_v49 = vld [vmem:[%s3935_s1 + $0x10] sm:$0xff]  ;;  %v83_v53 = vld [vmem:[%s3936_s2] sm:$0x7] }
  0x13   :  { %117 = vmatpush1.msra.mxu0 %v2730_v21  ;;  %2054 = vmatpush3.msra.mxu1 %v2793_v31  ;;  %4017 = vst [vmem:[#allocation15_spill] sm:$0xff] %v2906_v48  ;;  %4018 = vst [vmem:[#allocation16_spill] sm:$0xff] %v2915_v49  ;;  %v2988_v55 = vrot.slane %v83_v53, %v87_v52  ;;  %v2990_v56 = vrot.slane %v83_v53, %v91_v54  ;;  %v2995_v57 = vld [vmem:[%s3937_s0] sm:$0xff]  ;;  %v3001_v60 = vld [vmem:[%s3937_s0 + $0x18] sm:$0xff] }
  0x14   :  { %118 = vmatprep.subr.mxu0 %v2742_v23  ;;  %2055 = vmatprep.subr.mxu1 %v3941_v3  ;;  %4021 = vst [vmem:[#allocation19_spill] sm:$0xff] %v2995_v57  ;;  %4022 = vst [vmem:[#allocation20_spill] sm:$0xff] %v3001_v60 }
  0x15   :  { %119 = vmatpush1.msra.mxu0 %v2749_v24  ;;  %2056 = vmatpush3.msra.mxu1 %v2812_v34  ;;  %4019 = vst [vmem:[#allocation17_spill] sm:$0xff] %v2988_v55  ;;  %4020 = vst [vmem:[#allocation18_spill] sm:$0xff] %v2990_v56 }
  0x16   :  { %120 = vmatprep.subr.mxu0 %v2761_v26  ;;  %2057 = vmatprep.subr.mxu1 %v3941_v3 }
  0x17   :  { %121 = vmatpush1.msra.mxu0 %v2768_v27  ;;  %2058 = vmatpush3.msra.mxu1 %v2831_v37 }
  0x18   :  { %122 = vmatprep.subr.mxu0 %v2780_v29  ;;  %2059 = vmatprep.subr.mxu1 %v3941_v3 }
  0x19   :  { %123 = vmatpush1.msra.mxu0 %v2787_v30  ;;  %2060 = vmatpush3.msra.mxu1 %v2850_v40 }
  0x1a   :  { %124 = vmatprep.subr.mxu0 %v2799_v32  ;;  %2061 = vmatprep.subr.mxu1 %v3941_v3 }
  0x1b   :  { %125 = vmatpush1.msra.mxu0 %v2806_v33  ;;  %2062 = vmatpush3.msra.mxu1 %v2869_v43 }
  0x1c   :  { %126 = vmatprep.subr.mxu0 %v2818_v35  ;;  %2063 = vmatprep.subr.mxu1 %v3941_v3 }
  0x1d   :  { %127 = vmatpush1.msra.mxu0 %v2825_v36  ;;  %2064 = vmatpush3.msra.mxu1 %v2880_v45 }
  0x1e   :  { %128 = vmatprep.subr.mxu0 %v2837_v38  ;;  %2065 = vmatprep.subr.mxu1 %v3941_v3 }
  0x1f   :  { %129 = vmatpush1.msra.mxu0 %v2844_v39  ;;  %2066 = vmatpush3.msra.mxu1 %v2889_v46 }
  0x20   :  { %130 = vmatprep.subr.mxu0 %v2856_v41  ;;  %2067 = vmatprep.subr.mxu1 %v3941_v3 }
  0x21   :  { %131 = vmatpush1.msra.mxu0 %v2863_v42  ;;  %2068 = vmatpush3.msra.mxu1 %v2897_v47 }
  0x22   :  { %165 = vmatmul.mubr.f32.vlgmr.msra.gmra.mxu0 %v2872_v44  ;;  %305 = vmatprep.subr.mxu0 %v2607_v0 }
  0x23   :  { %306 = vmatpush1.msra.mxu0 %v2612_v1  ;;  %2069 = vmatprep.subr.mxu1 %v3941_v3 }
  0x24   :  { %307 = vmatprep.subr.mxu0 %v2617_v2  ;;  %2070 = vmatpush3.msra.mxu1 %v2906_v48 }
  0x25   :  { %308 = vmatpush1.msra.mxu0 %v2626_v4  ;;  %2071 = vmatprep.subr.mxu1 %v3941_v3 }
  0x26   :  { %309 = vmatprep.subr.mxu0 %v2634_v5  ;;  %2072 = vmatpush3.msra.mxu1 %v2915_v49 }
  0x27   :  { %310 = vmatpush1.msra.mxu0 %v2640_v6  ;;  %2074 = vmatmul.mubr.f32.vlgmr.msra.gmra.mxu1 %v2872_v44 }
  0x28   :  { %311 = vmatprep.subr.mxu0 %v2646_v7  ;;  %2076 = vmatprep.subr.mxu1 %v3941_v3 }
  0x29   :  { %312 = vmatpush1.msra.mxu0 %v2652_v8  ;;  %2077 = vmatpush3.msra.mxu1 %v2693_v15 }
  0x2a   :  { %313 = vmatprep.subr.mxu0 %v2658_v9  ;;  %2078 = vmatprep.subr.mxu1 %v3941_v3 }
  0x2b   :  { %314 = vmatpush1.msra.mxu0 %v2664_v10  ;;  %2079 = vmatpush3.msra.mxu1 %v2698_v16 }
  0x2c   :  { %315 = vmatprep.subr.mxu0 %v2670_v11  ;;  %2080 = vmatprep.subr.mxu1 %v3941_v3 }
  0x2d   :  { %316 = vmatpush1.msra.mxu0 %v2676_v12  ;;  %2081 = vmatpush3.msra.mxu1 %v2717_v19 }
  0x2e   :  { %317 = vmatprep.subr.mxu0 %v2682_v13  ;;  %2082 = vmatprep.subr.mxu1 %v3941_v3 }
  0x2f   :  { %318 = vmatpush1.msra.mxu0 %v2688_v14  ;;  %2083 = vmatpush3.msra.mxu1 %v2736_v22 }
  0x30   :  { %319 = vmatprep.subr.mxu0 %v2704_v17  ;;  %2084 = vmatprep.subr.mxu1 %v3941_v3 }
  0x31   :  { %320 = vmatpush1.msra.mxu0 %v2711_v18  ;;  %2085 = vmatpush3.msra.mxu1 %v2755_v25 }
  0x32   :  { %321 = vmatprep.subr.mxu0 %v2723_v20  ;;  %2086 = vmatprep.subr.mxu1 %v3941_v3 }
  0x33   :  { %322 = vmatpush1.msra.mxu0 %v2730_v21  ;;  %2087 = vmatpush3.msra.mxu1 %v2774_v28 }
  0x34   :  { %323 = vmatprep.subr.mxu0 %v2742_v23  ;;  %2088 = vmatprep.subr.mxu1 %v3941_v3 }
  0x35   :  { %324 = vmatpush1.msra.mxu0 %v2749_v24  ;;  %2089 = vmatpush3.msra.mxu1 %v2793_v31 }
  0x36   :  { %325 = vmatprep.subr.mxu0 %v2761_v26  ;;  %2090 = vmatprep.subr.mxu1 %v3941_v3 }
  0x37   :  { %326 = vmatpush1.msra.mxu0 %v2768_v27  ;;  %2091 = vmatpush3.msra.mxu1 %v2812_v34 }
  0x38   :  { %327 = vmatprep.subr.mxu0 %v2780_v29  ;;  %2092 = vmatprep.subr.mxu1 %v3941_v3 }
  0x39   :  { %328 = vmatpush1.msra.mxu0 %v2787_v30  ;;  %2093 = vmatpush3.msra.mxu1 %v2831_v37 }
  0x3a   :  { %329 = vmatprep.subr.mxu0 %v2799_v32  ;;  %2094 = vmatprep.subr.mxu1 %v3941_v3 }
  0x3b   :  { %330 = vmatpush1.msra.mxu0 %v2806_v33  ;;  %2095 = vmatpush3.msra.mxu1 %v2850_v40 }
  0x3c   :  { %331 = vmatprep.subr.mxu0 %v2818_v35  ;;  %2096 = vmatprep.subr.mxu1 %v3941_v3 }
  0x3d   :  { %332 = vmatpush1.msra.mxu0 %v2825_v36  ;;  %2097 = vmatpush3.msra.mxu1 %v2869_v43 }
  0x3e   :  { %333 = vmatprep.subr.mxu0 %v2837_v38  ;;  %2098 = vmatprep.subr.mxu1 %v3941_v3 }
  0x3f   :  { %334 = vmatpush1.msra.mxu0 %v2844_v39  ;;  %2099 = vmatpush3.msra.mxu1 %v2880_v45 }
  0x40   :  { %335 = vmatprep.subr.mxu0 %v2856_v41  ;;  %2100 = vmatprep.subr.mxu1 %v3941_v3 }
  0x41   :  { %336 = vmatpush1.msra.mxu0 %v2863_v42  ;;  %369 = vmatprep.mubr.f32.mxu0 %v3941_v3 }
  0x42   :  { %2101 = vmatpush3.msra.mxu1 %v2889_v46  ;;  %2108 = vmatprep.mubr.msk.f32.mxu1 %vm2573_vm0, %v3941_v3 }
  0x43   :  { %2102 = vmatprep.subr.mxu1 %v3941_v3  ;;  %508 = vmatprep.subr.mxu0 %v2607_v0 }
  0x44   :  { %2103 = vmatpush3.msra.mxu1 %v2897_v47 }
  0x45   :  { %2104 = vmatprep.subr.mxu1 %v3941_v3 }
  0x46   :  { %2105 = vmatpush3.msra.mxu1 %v2906_v48 }
  0x47   :  { %2106 = vmatprep.subr.mxu1 %v3941_v3 }
  0x48   :  { %2107 = vmatpush3.msra.mxu1 %v2915_v49 }
  0x49   :  { %2111 = vmatprep.subr.mxu1 %v3941_v3  ;;  %v3009_v3 = vld [vmem:[%s3937_s0 + $0x8] sm:$0xff] }
  0xe2   :  { %v166_v58 = vpop.f32.mrf.mxu0 }
  0xe3   :  { %v167_v59 = vadd.f32 %v166_v58, %v2988_v55  ;;  %v3014_v55 = vld [vmem:[%s3937_s0 + $0x20] sm:$0xff] }
  0xe4   :  { %v168_v61 = vpop.f32.mrf.mxu0 }
  0xe5   :  { %v242_v62 = vrot.slane %v167_v59, 1  ;;  %v245_v63 = vadd.f32 %v167_v59, %v2995_v57  ;;  %v169_v50 = vadd.f32 %v168_v61, %v2990_v56 }
  0xe7   :  { %v246_v52 = vadd.f32 %v242_v62, %v3001_v60  ;;  %v247_v54 = vsub.f32 0.0, %v245_v63  ;;  %v260_v58 = vrot.slane %v169_v50, 1  ;;  %v263_v59 = vadd.f32 %v169_v50, %v3009_v3  ;;  %v237_v63 = vpop.f32.mrf.mxu1 }
  0xe9   :  { %v248_v0 = vsub.f32 0.0, %v246_v52  ;;  %v249_v49 = vmul.f32 1.442695, %v247_v54  ;;  %v264_v62 = vadd.f32 %v260_v58, %v3014_v55  ;;  %v265_v57 = vsub.f32 0.0, %v263_v59  ;;  %v2075_v56 = vpop.f32.mrf.mxu1 }
  0xea   :  { %v95_v54 = vsub.s32 2, %v86_v51 }
  0xeb   :  { %2358 = vpow2.f32 %v249_v49  ;;  %v251_v61 = vmul.f32 1.442695, %v248_v0  ;;  %v266_v60 = vsub.f32 0.0, %v264_v62  ;;  %v267_v42 = vmul.f32 1.442695, %v265_v57 }
  0xec   :  { %v3018_v49 = vrot.slane %v83_v53, %v95_v54 }
  0xed   :  { %2360 = vpow2.f32 %v251_v61  ;;  %v269_v41 = vmul.f32 1.442695, %v266_v60 }
  0xee   :  { %2362 = vpow2.f32 %v267_v42  ;;  %v238_v50 = vadd.f32 %v237_v63, %v3018_v49  ;;  %v292_v63 = vrot.slane %v2872_v44, 1 }
  0xef   :  { %2364 = vpow2.f32 %v269_v41  ;;  %v3024_v41 = vld [vmem:[%s3937_s0 + $0x10] sm:$0xff] }
  0xf0   :  { %v278_v61 = vrot.slane %v238_v50, 1 }
  0xf8   :  { %v2359_v48 = vpop.eup %2358 }
  0xf9   :  { %v253_v39 = vadd.f32 1.0, %v2359_v48 }
  0xfa   :  { %v2361_v38 = vpop.eup %2360 }
  0xfb   :  { %v254_v52 = vadd.f32 1.0, %v2361_v38  ;;  %2366 = vrcp.f32 %v253_v39  ;;  %v2363_v0 = vpop.eup %2362  ;;  %v3029_v39 = vld [vmem:[%s3937_s0 + $0x28] sm:$0xff] }
  0xfc   :  { %v2365_v58 = vpop.eup %2364  ;;  %v271_v59 = vadd.f32 1.0, %v2363_v0 }
  0xfd   :  { %2368 = vrcp.f32 %v254_v52  ;;  %v272_v56 = vadd.f32 1.0, %v2365_v58 }
  0xfe   :  { %2370 = vrcp.f32 %v271_v59 }
  0xff   :  { %2372 = vrcp.f32 %v272_v56 }
 0x108   :  { %v2367_v57 = vpop.eup %2366 }
 0x109   :  { %v281_v42 = vmul.f32 %v2367_v57, %v238_v50 }
 0x10a   :  { %v2369_v38 = vpop.eup %2368 }
 0x10b   :  { %v282_v48 = vmul.f32 %v2369_v38, %v278_v61  ;;  %v283_v51 = vadd.f32 %v281_v42, %v3024_v41  ;;  %v2371_v60 = vpop.eup %2370 }
 0x10c   :  { %v2373_v62 = vpop.eup %2372  ;;  %v287_v54 = vsub.f32 1.0, %v2371_v60  ;;  %v295_v56 = vmul.f32 %v2371_v60, %v2872_v44  ;;  %v4023_v44 = vmov 0.0   ;;  %v4026_v60 = vld [vmem:[#allocation15_spill] sm:$0xff] }
 0x10d   :  { %v284_v53 = vadd.f32 %v282_v48, %v3029_v39  ;;  %2374 = vtanh.f32 %v283_v51  ;;  %v288_v0 = vsub.f32 1.0, %v2373_v62  ;;  %v296_v57 = vmul.f32 %v2373_v62, %v292_v63  ;;  %v4024_v51 = vld [vmem:[#allocation9_spill] sm:$0xff]  ;;  %v4027_v62 = vld [vmem:[#allocation11_spill] sm:$0xff]  ;;  %v4028_v63 = vld [vmem:[#allocation12_spill] sm:$0xff] }
 0x10f   :  { %2376 = vtanh.f32 %v284_v53  ;;  %v4025_v53 = vld [vmem:[#allocation10_spill] sm:$0xff] }
 0x11a   :  { %v2375_v52 = vpop.eup %2374 }
 0x11b   :  { %v289_v58 = vmul.f32 %v2375_v52, %v287_v54  ;;  %v4029_v52 = vld [vmem:[#allocation16_spill] sm:$0xff] }
 0x11c   :  { %v2377_v50 = vpop.eup %2376  ;;  %v4030_v54 = vld [vmem:[#allocation4_spill] sm:$0xff] }
 0x11d   :  { %v290_v59 = vmul.f32 %v2377_v50, %v288_v0  ;;  %v3037_v42 = vadd.f32 %v295_v56, %v289_v58  ;;  %v4031_v58 = vld [vmem:[#allocation17_spill] sm:$0xff] }
 0x11f   :  { %v3035_v61 = vadd.f32 %v296_v57, %v290_v59 }
 0x121   :  { %v3965_v38 = vrot.slane %v3035_v61, 7 }
 0x123   :  { %v303_v48 = vsel %vm302_vm1, %v3965_v38, %v3037_v42  ;;  %v4032_v38 = vld [vmem:[#allocation20_spill] sm:$0xff] }
 0x124   :  { %370 = vmatmul.mubr.f32.vlgmr.msra.gmra.mxu0 %v303_v48  ;;  %2109 = vmatmul.mubr.f32.vlgmr.msra.gmra.mxu1 %v303_v48 }
 0x125   :  { %509 = vmatpush1.msra.mxu0 %v2612_v1  ;;  %2112 = vmatpush3.msra.mxu1 %v2693_v15 }
 0x126   :  { %510 = vmatprep.subr.mxu0 %v2617_v2  ;;  %2113 = vmatprep.subr.mxu1 %v4023_v44 }
 0x127   :  { %511 = vmatpush1.msra.mxu0 %v2626_v4  ;;  %2114 = vmatpush3.msra.mxu1 %v2698_v16 }
 0x128   :  { %512 = vmatprep.subr.mxu0 %v2634_v5  ;;  %2115 = vmatprep.subr.mxu1 %v4023_v44 }
 0x129   :  { %513 = vmatpush1.msra.mxu0 %v2640_v6  ;;  %2116 = vmatpush3.msra.mxu1 %v2717_v19 }
 0x12a   :  { %514 = vmatprep.subr.mxu0 %v2646_v7  ;;  %2117 = vmatprep.subr.mxu1 %v4023_v44 }
 0x12b   :  { %515 = vmatpush1.msra.mxu0 %v2652_v8  ;;  %2118 = vmatpush3.msra.mxu1 %v2736_v22 }
 0x12c   :  { %516 = vmatprep.subr.mxu0 %v2658_v9  ;;  %2119 = vmatprep.subr.mxu1 %v4023_v44 }
 0x12d   :  { %517 = vmatpush1.msra.mxu0 %v2664_v10  ;;  %2120 = vmatpush3.msra.mxu1 %v2755_v25 }
 0x12e   :  { %518 = vmatprep.subr.mxu0 %v2670_v11  ;;  %2121 = vmatprep.subr.mxu1 %v4023_v44 }
 0x12f   :  { %519 = vmatpush1.msra.mxu0 %v2676_v12  ;;  %2122 = vmatpush3.msra.mxu1 %v2774_v28 }
 0x130   :  { %520 = vmatprep.subr.mxu0 %v2682_v13  ;;  %2123 = vmatprep.subr.mxu1 %v4023_v44 }
 0x131   :  { %521 = vmatpush1.msra.mxu0 %v2688_v14  ;;  %2124 = vmatpush3.msra.mxu1 %v2793_v31 }
 0x132   :  { %522 = vmatprep.subr.mxu0 %v2704_v17  ;;  %2125 = vmatprep.subr.mxu1 %v4023_v44 }
 0x133   :  { %523 = vmatpush1.msra.mxu0 %v2711_v18  ;;  %2126 = vmatpush3.msra.mxu1 %v2812_v34 }
 0x134   :  { %524 = vmatprep.subr.mxu0 %v2723_v20  ;;  %2127 = vmatprep.subr.mxu1 %v4023_v44 }
 0x135   :  { %525 = vmatpush1.msra.mxu0 %v2730_v21  ;;  %2128 = vmatpush3.msra.mxu1 %v2831_v37 }
 0x136   :  { %526 = vmatprep.subr.mxu0 %v2742_v23  ;;  %2129 = vmatprep.subr.mxu1 %v4023_v44 }
 0x137   :  { %527 = vmatpush1.msra.mxu0 %v2749_v24  ;;  %2130 = vmatpush3.msra.mxu1 %v2850_v40 }
 0x138   :  { %528 = vmatprep.subr.mxu0 %v2761_v26  ;;  %2131 = vmatprep.subr.mxu1 %v4023_v44 }
 0x139   :  { %529 = vmatpush1.msra.mxu0 %v2768_v27  ;;  %2132 = vmatpush3.msra.mxu1 %v2869_v43 }
 0x13a   :  { %530 = vmatprep.subr.mxu0 %v2780_v29  ;;  %2133 = vmatprep.subr.mxu1 %v4023_v44 }
 0x13b   :  { %531 = vmatpush1.msra.mxu0 %v2787_v30  ;;  %2134 = vmatpush3.msra.mxu1 %v2880_v45 }
 0x13c   :  { %532 = vmatprep.subr.mxu0 %v2799_v32  ;;  %2135 = vmatprep.subr.mxu1 %v4023_v44 }
 0x13d   :  { %533 = vmatpush1.msra.mxu0 %v2806_v33  ;;  %2136 = vmatpush3.msra.mxu1 %v2889_v46 }
 0x13e   :  { %534 = vmatprep.subr.mxu0 %v2818_v35  ;;  %2137 = vmatprep.subr.mxu1 %v4023_v44 }
 0x13f   :  { %535 = vmatpush1.msra.mxu0 %v2825_v36  ;;  %2138 = vmatpush3.msra.mxu1 %v2897_v47 }
 0x140   :  { %536 = vmatprep.subr.mxu0 %v4024_v51  ;;  %2139 = vmatprep.subr.mxu1 %v4023_v44 }
 0x141   :  { %537 = vmatpush1.msra.mxu0 %v4025_v53  ;;  %2140 = vmatpush3.msra.mxu1 %v4026_v60  ;;  %v4034_v53 = vld [vmem:[#allocation19_spill] sm:$0xff] }
 0x142   :  { %538 = vmatprep.subr.mxu0 %v4027_v62  ;;  %2141 = vmatprep.subr.mxu1 %v4023_v44  ;;  %v4033_v62 = vld [vmem:[#allocation18_spill] sm:$0xff] }
 0x143   :  { %539 = vmatpush1.msra.mxu0 %v4028_v63  ;;  %572 = vmatprep.mubr.f32.mxu0 %v4023_v44 }
 0x144   :  { %2142 = vmatpush3.msra.mxu1 %v4029_v52  ;;  %2143 = vmatprep.mubr.msk.f32.mxu1 %vm2573_vm0, %v4023_v44 }
 0x145   :  { %716 = vmatprep.subr.mxu0 %v4030_v54  ;;  %2146 = vmatprep.subr.mxu1 %v4023_v44 }
 0x1e4   :  { %v371_v0 = vpop.f32.mrf.mxu0  ;;  %v442_v50 = vpop.f32.mrf.mxu1 }
 0x1e5   :  { %v372_v59 = vadd.f32 %v371_v0, %v4031_v58 }
 0x1e6   :  { %v373_v57 = vpop.f32.mrf.mxu0  ;;  %v2110_v56 = vpop.f32.mrf.mxu1 }
 0x1e7   :  { %v447_v48 = vrot.slane %v372_v59, 7  ;;  %v451_v63 = vadd.f32 %v372_v59, %v4032_v38  ;;  %v374_v60 = vadd.f32 %v373_v57, %v4033_v62 }
 0x1e9   :  { %v450_v52 = vadd.f32 %v447_v48, %v4034_v53  ;;  %v453_v51 = vsub.f32 0.0, %v451_v63  ;;  %v465_v47 = vrot.slane %v374_v60, 7  ;;  %v469_v54 = vadd.f32 %v374_v60, %v3014_v55 }
 0x1eb   :  { %v452_v36 = vsub.f32 0.0, %v450_v52  ;;  %v456_v35 = vmul.f32 1.442695, %v453_v51  ;;  %v468_v33 = vadd.f32 %v465_v47, %v3009_v3  ;;  %v471_v0 = vsub.f32 0.0, %v469_v54 }
 0x1ed   :  { %v454_v46 = vmul.f32 1.442695, %v452_v36  ;;  %2378 = vpow2.f32 %v456_v35  ;;  %v470_v56 = vsub.f32 0.0, %v468_v33  ;;  %v474_v58 = vmul.f32 1.442695, %v471_v0 }
 0x1ee   :  { %v443_v36 = vadd.f32 %v442_v50, %v3018_v49  ;;  %v496_v50 = vrot.slane %v3037_v42, 7 }
 0x1ef   :  { %2380 = vpow2.f32 %v454_v46  ;;  %v472_v32 = vmul.f32 1.442695, %v470_v56 }
 0x1f0   :  { %2382 = vpow2.f32 %v474_v58  ;;  %v483_v46 = vrot.slane %v443_v36, 7 }
 0x1f1   :  { %2384 = vpow2.f32 %v472_v32 }
 0x1fa   :  { %v2379_v59 = vpop.eup %2378 }
 0x1fb   :  { %v459_v57 = vadd.f32 1.0, %v2379_v59 }
 0x1fc   :  { %v2381_v48 = vpop.eup %2380 }
 0x1fd   :  { %v458_v63 = vadd.f32 1.0, %v2381_v48  ;;  %2386 = vrcp.f32 %v459_v57  ;;  %v2383_v51 = vpop.eup %2382 }
 0x1fe   :  { %v2385_v52 = vpop.eup %2384  ;;  %v477_v35 = vadd.f32 1.0, %v2383_v51 }
 0x1ff   :  { %2388 = vrcp.f32 %v458_v63  ;;  %v476_v60 = vadd.f32 1.0, %v2385_v52 }
 0x200   :  { %2390 = vrcp.f32 %v477_v35  ;;  %v4035_v35 = vrot.slane %v3035_v61, 7 }
 0x201   :  { %2392 = vrcp.f32 %v476_v60 }
 0x20a   :  { %v2387_v47 = vpop.eup %2386 }
 0x20b   :  { %v487_v54 = vmul.f32 %v2387_v47, %v443_v36 }
 0x20c   :  { %v2389_v33 = vpop.eup %2388 }
 0x20d   :  { %v486_v0 = vmul.f32 %v2389_v33, %v483_v46  ;;  %v489_v32 = vadd.f32 %v487_v54, %v3029_v39  ;;  %v2391_v56 = vpop.eup %2390 }
 0x20e   :  { %v2393_v59 = vpop.eup %2392  ;;  %v493_v63 = vsub.f32 1.0, %v2391_v56  ;;  %v500_v46 = vmul.f32 %v2391_v56, %v4035_v35 }
 0x20f   :  { %v488_v58 = vadd.f32 %v486_v0, %v3024_v41  ;;  %2394 = vtanh.f32 %v489_v32  ;;  %v492_v48 = vsub.f32 1.0, %v2393_v59  ;;  %v499_v47 = vmul.f32 %v2393_v59, %v496_v50 }
 0x211   :  { %2396 = vtanh.f32 %v488_v58 }
 0x21c   :  { %v2395_v57 = vpop.eup %2394 }
 0x21d   :  { %v495_v36 = vmul.f32 %v2395_v57, %v493_v63 }
 0x21e   :  { %v2397_v51 = vpop.eup %2396 }
 0x21f   :  { %v494_v52 = vmul.f32 %v2397_v51, %v492_v48  ;;  %v3125_v60 = vadd.f32 %v500_v46, %v495_v36 }
 0x221   :  { %v3123_v54 = vadd.f32 %v499_v47, %v494_v52 }
 0x223   :  { %v505_v33 = vrot.slane %v3123_v54, 1 }
 0x225   :  { %v506_v0 = vsel %vm302_vm1, %v3125_v60, %v505_v33 }
 0x226   :  { %573 = vmatmul.mubr.f32.vlgmr.msra.gmra.mxu0 %v506_v0  ;;  %2144 = vmatmul.mubr.f32.vlgmr.msra.gmra.mxu1 %v506_v0 }
 0x227   :  { %717 = vmatpush1.msra.mxu0 %v2612_v1  ;;  %2147 = vmatpush3.msra.mxu1 %v2693_v15  ;;  %v4036_v1 = vld [vmem:[#allocation5_spill] sm:$0xff] }
 0x228   :  { %718 = vmatprep.subr.mxu0 %v2617_v2  ;;  %2148 = vmatprep.subr.mxu1 %v4023_v44  ;;  %v4037_v2 = vld [vmem:[#allocation6_spill] sm:$0xff] }
 0x229   :  { %719 = vmatpush1.msra.mxu0 %v2626_v4  ;;  %2149 = vmatpush3.msra.mxu1 %v2698_v16  ;;  %v4038_v4 = vld [vmem:[#allocation13_spill] sm:$0xff] }
 0x22a   :  { %720 = vmatprep.subr.mxu0 %v2634_v5  ;;  %2150 = vmatprep.subr.mxu1 %v4023_v44  ;;  %v4039_v5 = vld [vmem:[#allocation7_spill] sm:$0xff] }
 0x22b   :  { %721 = vmatpush1.msra.mxu0 %v2640_v6  ;;  %2151 = vmatpush3.msra.mxu1 %v2717_v19  ;;  %v4040_v6 = vld [vmem:[#allocation8_spill] sm:$0xff] }
 0x22c   :  { %722 = vmatprep.subr.mxu0 %v2646_v7  ;;  %2152 = vmatprep.subr.mxu1 %v4023_v44  ;;  %v4041_v7 = vld [vmem:[#allocation14_spill] sm:$0xff] }
 0x22d   :  { %723 = vmatpush1.msra.mxu0 %v2652_v8  ;;  %2153 = vmatpush3.msra.mxu1 %v2736_v22  ;;  %v4042_v8 = vld [vmem:[#allocation9_spill] sm:$0xff] }
 0x22e   :  { %724 = vmatprep.subr.mxu0 %v2658_v9  ;;  %2154 = vmatprep.subr.mxu1 %v4023_v44  ;;  %v4043_v9 = vld [vmem:[#allocation10_spill] sm:$0xff] }
 0x22f   :  { %725 = vmatpush1.msra.mxu0 %v2664_v10  ;;  %2155 = vmatpush3.msra.mxu1 %v2755_v25  ;;  %v4044_v10 = vld [vmem:[#allocation15_spill] sm:$0xff] }
 0x230   :  { %726 = vmatprep.subr.mxu0 %v2670_v11  ;;  %2156 = vmatprep.subr.mxu1 %v4023_v44  ;;  %v4045_v11 = vld [vmem:[#allocation11_spill] sm:$0xff] }
 0x231   :  { %727 = vmatpush1.msra.mxu0 %v2676_v12  ;;  %2157 = vmatpush3.msra.mxu1 %v2774_v28  ;;  %v4046_v12 = vld [vmem:[#allocation12_spill] sm:$0xff] }
 0x232   :  { %728 = vmatprep.subr.mxu0 %v2682_v13  ;;  %2158 = vmatprep.subr.mxu1 %v4023_v44  ;;  %v4047_v13 = vld [vmem:[#allocation16_spill] sm:$0xff] }
 0x233   :  { %729 = vmatpush1.msra.mxu0 %v2688_v14  ;;  %2159 = vmatpush3.msra.mxu1 %v2793_v31  ;;  %v4048_v14 = vld [vmem:[#allocation4_spill] sm:$0xff] }
 0x234   :  { %730 = vmatprep.subr.mxu0 %v2704_v17  ;;  %2160 = vmatprep.subr.mxu1 %v4023_v44 }
 0x235   :  { %731 = vmatpush1.msra.mxu0 %v2711_v18  ;;  %2161 = vmatpush3.msra.mxu1 %v2812_v34 }
 0x236   :  { %732 = vmatprep.subr.mxu0 %v2723_v20  ;;  %2162 = vmatprep.subr.mxu1 %v4023_v44  ;;  %v4049_v20 = vld [vmem:[#allocation17_spill] sm:$0xff] }
 0x237   :  { %733 = vmatpush1.msra.mxu0 %v2730_v21  ;;  %2163 = vmatpush3.msra.mxu1 %v2831_v37 }
 0x238   :  { %734 = vmatprep.subr.mxu0 %v2742_v23  ;;  %2164 = vmatprep.subr.mxu1 %v4023_v44 }
 0x239   :  { %735 = vmatpush1.msra.mxu0 %v2749_v24  ;;  %2165 = vmatpush3.msra.mxu1 %v2850_v40 }
 0x23a   :  { %736 = vmatprep.subr.mxu0 %v2761_v26  ;;  %2166 = vmatprep.subr.mxu1 %v4023_v44 }
 0x23b   :  { %737 = vmatpush1.msra.mxu0 %v2768_v27  ;;  %2167 = vmatpush3.msra.mxu1 %v2869_v43 }
 0x23c   :  { %738 = vmatprep.subr.mxu0 %v2780_v29  ;;  %2168 = vmatprep.subr.mxu1 %v4023_v44 }
 0x23d   :  { %739 = vmatpush1.msra.mxu0 %v2787_v30  ;;  %2169 = vmatpush3.msra.mxu1 %v2880_v45 }
 0x23e   :  { %740 = vmatprep.subr.mxu0 %v4036_v1  ;;  %2170 = vmatprep.subr.mxu1 %v4023_v44 }
 0x23f   :  { %741 = vmatpush1.msra.mxu0 %v4037_v2  ;;  %2171 = vmatpush3.msra.mxu1 %v4038_v4 }
 0x240   :  { %742 = vmatprep.subr.mxu0 %v4039_v5  ;;  %2172 = vmatprep.subr.mxu1 %v4023_v44 }
 0x241   :  { %743 = vmatpush1.msra.mxu0 %v4040_v6  ;;  %2173 = vmatpush3.msra.mxu1 %v4041_v7 }
 0x242   :  { %744 = vmatprep.subr.mxu0 %v4042_v8  ;;  %2174 = vmatprep.subr.mxu1 %v4023_v44 }
 0x243   :  { %745 = vmatpush1.msra.mxu0 %v4043_v9  ;;  %2175 = vmatpush3.msra.mxu1 %v4044_v10 }
 0x244   :  { %746 = vmatprep.subr.mxu0 %v4045_v11  ;;  %2176 = vmatprep.subr.mxu1 %v4023_v44 }
 0x245   :  { %747 = vmatpush1.msra.mxu0 %v4046_v12  ;;  %780 = vmatprep.mubr.f32.mxu0 %v4023_v44 }
 0x246   :  { %2177 = vmatpush3.msra.mxu1 %v4047_v13  ;;  %2178 = vmatprep.mubr.msk.f32.mxu1 %vm2573_vm0, %v4023_v44 }
 0x247   :  { %924 = vmatprep.subr.mxu0 %v4048_v14  ;;  %2181 = vmatprep.subr.mxu1 %v4023_v44 }
 0x2e6   :  { %v574_v17 = vpop.f32.mrf.mxu0  ;;  %v645_v18 = vpop.f32.mrf.mxu1 }
 0x2e7   :  { %v575_v21 = vadd.f32 %v574_v17, %v4049_v20  ;;  %v646_v14 = vadd.f32 %v645_v18, %v3018_v49  ;;  %v702_v18 = vrot.slane %v3123_v54, 7 }
 0x2e8   :  { %v576_v23 = vpop.f32.mrf.mxu0  ;;  %v2145_v24 = vpop.f32.mrf.mxu1 }
 0x2e9   :  { %v650_v26 = vrot.slane %v575_v21, 6  ;;  %v651_v27 = vrot.slane %v575_v21, 7  ;;  %v577_v29 = vadd.f32 %v576_v23, %v4033_v62  ;;  %v688_v23 = vrot.slane %v646_v14, 6 }
 0x2eb   :  { %v654_v30 = vadd.f32 %v650_v26, %v4034_v53  ;;  %v655_v32 = vadd.f32 %v651_v27, %v4032_v38  ;;  %v669_v58 = vrot.slane %v577_v29, 6  ;;  %v670_v56 = vrot.slane %v577_v29, 7 }
 0x2ec   :  { %v689_v26 = vrot.slane %v646_v14, 7 }
 0x2ed   :  { %v656_v59 = vsub.f32 0.0, %v654_v30  ;;  %v657_v57 = vsub.f32 0.0, %v655_v32  ;;  %v673_v63 = vadd.f32 %v669_v58, %v3009_v3  ;;  %v674_v51 = vadd.f32 %v670_v56, %v3014_v55 }
 0x2ef   :  { %v658_v50 = vmul.f32 1.442695, %v656_v59  ;;  %v660_v48 = vmul.f32 1.442695, %v657_v57  ;;  %v675_v52 = vsub.f32 0.0, %v673_v63  ;;  %v676_v36 = vsub.f32 0.0, %v674_v51 }
 0x2f1   :  { %2398 = vpow2.f32 %v658_v50  ;;  %v677_v47 = vmul.f32 1.442695, %v675_v52  ;;  %v679_v35 = vmul.f32 1.442695, %v676_v36 }
 0x2f2   :  { %2400 = vpow2.f32 %v660_v48  ;;  %v703_v48 = vrot.slane %v3125_v60, 7 }
 0x2f3   :  { %2402 = vpow2.f32 %v677_v47 }
 0x2f4   :  { %2404 = vpow2.f32 %v679_v35 }
 0x2fe   :  { %v2399_v46 = vpop.eup %2398 }
 0x2ff   :  { %v2401_v33 = vpop.eup %2400  ;;  %v662_v0 = vadd.f32 1.0, %v2399_v46 }
 0x300   :  { %v663_v1 = vadd.f32 1.0, %v2401_v33  ;;  %v2403_v2 = vpop.eup %2402 }
 0x301   :  { %2406 = vrcp.f32 %v662_v0  ;;  %v2405_v5 = vpop.eup %2404  ;;  %v681_v17 = vadd.f32 1.0, %v2403_v2  ;;  %v1751_v0 = vsel %vm1750_vm2, %v3037_v42, %v3123_v54  ;;  %v3228_v42 = vld [vmem:[%s3935_s1 + $0x168] sm:$0xff]  ;;  %v3242_v54 = vld [vmem:[%s3935_s1 + $0x150] sm:$0xff] }
 0x302   :  { %2408 = vrcp.f32 %v663_v1  ;;  %v682_v21 = vadd.f32 1.0, %v2405_v5  ;;  %v1752_v1 = vsel %vm1750_vm2, %v3035_v61, %v3125_v60  ;;  %v3235_v61 = vld [vmem:[%s3935_s1 + $0x158] sm:$0xff] }
 0x303   :  { %2410 = vrcp.f32 %v681_v17  ;;  %v3256_v60 = vld [vmem:[%s3935_s1 + $0x138] sm:$0xff] }
 0x304   :  { %2412 = vrcp.f32 %v682_v21 }
 0x30e   :  { %v2407_v24 = vpop.eup %2406 }
 0x30f   :  { %v2409_v27 = vpop.eup %2408  ;;  %v692_v29 = vmul.f32 %v2407_v24, %v688_v23  ;;  %v3270_v23 = vld [vmem:[%s3935_s1 + $0x120] sm:$0xff]  ;;  %v3284_v24 = vld [vmem:[%s3935_s1 + $0x108] sm:$0xff] }
 0x310   :  { %v693_v30 = vmul.f32 %v2409_v27, %v689_v26  ;;  %v2411_v56 = vpop.eup %2410  ;;  %v3298_v26 = vld [vmem:[%s3935_s1 + $0xf0] sm:$0xff]  ;;  %v3312_v27 = vld [vmem:[%s3935_s1 + $0xd8] sm:$0xff] }
 0x311   :  { %v694_v32 = vadd.f32 %v692_v29, %v3024_v41  ;;  %v2413_v59 = vpop.eup %2412  ;;  %v698_v57 = vsub.f32 1.0, %v2411_v56  ;;  %v706_v36 = vmul.f32 %v2411_v56, %v702_v18  ;;  %v3326_v29 = vld [vmem:[%s3935_s1 + $0xc0] sm:$0xff] }
 0x312   :  { %v695_v58 = vadd.f32 %v693_v30, %v3029_v39  ;;  %v699_v63 = vsub.f32 1.0, %v2413_v59  ;;  %v707_v35 = vmul.f32 %v2413_v59, %v703_v48  ;;  %v3340_v30 = vld [vmem:[%s3935_s1 + $0xa8] sm:$0xff]  ;;  %v3382_v56 = vld [vmem:[%s3935_s1 + $0x60] sm:$0xff] }
 0x313   :  { %2414 = vtanh.f32 %v694_v32  ;;  %v3354_v32 = vld [vmem:[%s3935_s1 + $0x90] sm:$0xff]  ;;  %4050 = vst [vmem:[#allocation20_spill] sm:$0xff] %v3382_v56  ;;  %v3396_v59 = vld [vmem:[%s3935_s1 + $0x48] sm:$0xff] }
 0x314   :  { %2416 = vtanh.f32 %v695_v58  ;;  %v3368_v58 = vld [vmem:[%s3935_s1 + $0x78] sm:$0xff]  ;;  %4052 = vst [vmem:[#allocation5_spill] sm:$0xff] %v3396_v59 }
 0x320   :  { %v2415_v50 = vpop.eup %2414 }
 0x321   :  { %v2417_v51 = vpop.eup %2416  ;;  %v700_v52 = vmul.f32 %v2415_v50, %v698_v57 }
 0x322   :  { %v701_v47 = vmul.f32 %v2417_v51, %v699_v63 }
 0x323   :  { %v3208_v46 = vadd.f32 %v706_v36, %v700_v52 }
 0x324   :  { %v3210_v33 = vadd.f32 %v707_v35, %v701_v47 }
 0x325   :  { %v712_v2 = vrot.slane %v3208_v46, 2  ;;  %v3218_v5 = vsel %vm1753_vm3, %v1751_v0, %v3208_v46 }
 0x326   :  { %v713_v14 = vrot.slane %v3210_v33, 1  ;;  %v3222_v17 = vsel %vm1753_vm3, %v1752_v1, %v3210_v33 }
 0x328   :  { %v714_v21 = vsel %vm302_vm1, %v713_v14, %v712_v2 }
 0x329   :  { %781 = vmatmul.mubr.f32.vlgmr.msra.gmra.mxu0 %v714_v21  ;;  %2179 = vmatmul.mubr.f32.vlgmr.msra.gmra.mxu1 %v714_v21 }
 0x32a   :  { %925 = vmatpush1.msra.mxu0 %v3228_v42  ;;  %2182 = vmatpush3.msra.mxu1 %v2693_v15  ;;  %v3249_v15 = vld [vmem:[%s3935_s1 + $0x140] sm:$0xff] }
 0x32b   :  { %926 = vmatprep.subr.mxu0 %v3235_v61  ;;  %2183 = vmatprep.subr.mxu1 %v4023_v44 }
 0x32c   :  { %927 = vmatpush1.msra.mxu0 %v3242_v54  ;;  %2184 = vmatpush3.msra.mxu1 %v2698_v16  ;;  %v3263_v16 = vld [vmem:[%s3935_s1 + $0x128] sm:$0xff] }
 0x32d   :  { %928 = vmatprep.subr.mxu0 %v3249_v15  ;;  %2185 = vmatprep.subr.mxu1 %v4023_v44 }
 0x32e   :  { %929 = vmatpush1.msra.mxu0 %v3256_v60  ;;  %2186 = vmatpush3.msra.mxu1 %v2717_v19  ;;  %v3277_v19 = vld [vmem:[%s3935_s1 + $0x110] sm:$0xff] }
 0x32f   :  { %930 = vmatprep.subr.mxu0 %v3263_v16  ;;  %2187 = vmatprep.subr.mxu1 %v4023_v44 }
 0x330   :  { %931 = vmatpush1.msra.mxu0 %v3270_v23  ;;  %2188 = vmatpush3.msra.mxu1 %v2736_v22  ;;  %v3291_v22 = vld [vmem:[%s3935_s1 + $0xf8] sm:$0xff] }
 0x331   :  { %932 = vmatprep.subr.mxu0 %v3277_v19  ;;  %2189 = vmatprep.subr.mxu1 %v4023_v44 }
 0x332   :  { %933 = vmatpush1.msra.mxu0 %v3284_v24  ;;  %2190 = vmatpush3.msra.mxu1 %v2755_v25  ;;  %v3305_v25 = vld [vmem:[%s3935_s1 + $0xe0] sm:$0xff] }
 0x333   :  { %934 = vmatprep.subr.mxu0 %v3291_v22  ;;  %2191 = vmatprep.subr.mxu1 %v4023_v44 }
 0x334   :  { %935 = vmatpush1.msra.mxu0 %v3298_v26  ;;  %2192 = vmatpush3.msra.mxu1 %v2774_v28  ;;  %v3319_v28 = vld [vmem:[%s3935_s1 + $0xc8] sm:$0xff] }
 0x335   :  { %936 = vmatprep.subr.mxu0 %v3305_v25  ;;  %2193 = vmatprep.subr.mxu1 %v4023_v44 }
 0x336   :  { %937 = vmatpush1.msra.mxu0 %v3312_v27  ;;  %2194 = vmatpush3.msra.mxu1 %v2793_v31  ;;  %v3333_v31 = vld [vmem:[%s3935_s1 + $0xb0] sm:$0xff] }
 0x337   :  { %938 = vmatprep.subr.mxu0 %v3319_v28  ;;  %2195 = vmatprep.subr.mxu1 %v4023_v44 }
 0x338   :  { %939 = vmatpush1.msra.mxu0 %v3326_v29  ;;  %2196 = vmatpush3.msra.mxu1 %v2812_v34  ;;  %v3347_v34 = vld [vmem:[%s3935_s1 + $0x98] sm:$0xff] }
 0x339   :  { %940 = vmatprep.subr.mxu0 %v3333_v31  ;;  %2197 = vmatprep.subr.mxu1 %v4023_v44 }
 0x33a   :  { %941 = vmatpush1.msra.mxu0 %v3340_v30  ;;  %2198 = vmatpush3.msra.mxu1 %v2831_v37  ;;  %v3361_v37 = vld [vmem:[%s3935_s1 + $0x80] sm:$0xff] }
 0x33b   :  { %942 = vmatprep.subr.mxu0 %v3347_v34  ;;  %2199 = vmatprep.subr.mxu1 %v4023_v44 }
 0x33c   :  { %943 = vmatpush1.msra.mxu0 %v3354_v32  ;;  %2200 = vmatpush3.msra.mxu1 %v2850_v40  ;;  %v3375_v40 = vld [vmem:[%s3935_s1 + $0x68] sm:$0xff] }
 0x33d   :  { %944 = vmatprep.subr.mxu0 %v3361_v37  ;;  %2201 = vmatprep.subr.mxu1 %v4023_v44 }
 0x33e   :  { %945 = vmatpush1.msra.mxu0 %v3368_v58  ;;  %2202 = vmatpush3.msra.mxu1 %v2869_v43  ;;  %v3389_v43 = vld [vmem:[%s3935_s1 + $0x50] sm:$0xff] }
 0x33f   :  { %946 = vmatprep.subr.mxu0 %v3375_v40  ;;  %2203 = vmatprep.subr.mxu1 %v4023_v44  ;;  %4051 = vst [vmem:[#allocation19_spill] sm:$0xff] %v3389_v43 }
 0x340   :  { %947 = vmatpush1.msra.mxu0 %v3382_v56  ;;  %2204 = vmatpush3.msra.mxu1 %v2880_v45  ;;  %v3403_v45 = vld [vmem:[%s3935_s1 + $0x38] sm:$0xff] }
 0x341   :  { %948 = vmatprep.subr.mxu0 %v3389_v43  ;;  %2205 = vmatprep.subr.mxu1 %v4023_v44  ;;  %4053 = vst [vmem:[#allocation6_spill] sm:$0xff] %v3403_v45 }
 0x342   :  { %949 = vmatpush1.msra.mxu0 %v3396_v59  ;;  %2206 = vmatpush3.msra.mxu1 %v4038_v4  ;;  %v3423_v4 = vld [vmem:[%s3935_s1 + $0x170] sm:$0xff] }
 0x343   :  { %950 = vmatprep.subr.mxu0 %v3403_v45  ;;  %2207 = vmatprep.subr.mxu1 %v4023_v44  ;;  %4054 = vst [vmem:[#allocation13_spill] sm:$0xff] %v3423_v4 }
 0x344   :  { %951 = vmatpush1.msra.mxu0 %v4040_v6  ;;  %2208 = vmatpush3.msra.mxu1 %v4041_v7 }
 0x345   :  { %952 = vmatprep.subr.mxu0 %v4042_v8  ;;  %2209 = vmatprep.subr.mxu1 %v4023_v44 }
 0x346   :  { %953 = vmatpush1.msra.mxu0 %v4043_v9  ;;  %2210 = vmatpush3.msra.mxu1 %v4044_v10 }
 0x347   :  { %954 = vmatprep.subr.mxu0 %v4045_v11  ;;  %2211 = vmatprep.subr.mxu1 %v4023_v44 }
 0x348   :  { %955 = vmatpush1.msra.mxu0 %v4046_v12  ;;  %988 = vmatprep.mubr.f32.mxu0 %v4023_v44 }
 0x349   :  { %2212 = vmatpush3.msra.mxu1 %v4047_v13  ;;  %2213 = vmatprep.mubr.msk.f32.mxu1 %vm2573_vm0, %v4023_v44 }
 0x34a   :  { %1132 = vmatprep.subr.mxu0 %v3423_v4  ;;  %2216 = vmatprep.subr.mxu1 %v4023_v44 }
 0x3e9   :  { %v782_v6 = vpop.f32.mrf.mxu0  ;;  %v853_v7 = vpop.f32.mrf.mxu1 }
 0x3ea   :  { %v783_v8 = vadd.f32 %v782_v6, %v4049_v20 }
 0x3eb   :  { %v784_v9 = vpop.f32.mrf.mxu0  ;;  %v2180_v10 = vpop.f32.mrf.mxu1 }
 0x3ec   :  { %v858_v11 = vrot.slane %v783_v8, 5  ;;  %v859_v12 = vrot.slane %v783_v8, 6  ;;  %v785_v13 = vadd.f32 %v784_v9, %v4033_v62 }
 0x3ee   :  { %v862_v57 = vadd.f32 %v858_v11, %v4034_v53  ;;  %v863_v18 = vadd.f32 %v859_v12, %v4032_v38  ;;  %v877_v50 = vrot.slane %v785_v13, 5  ;;  %v878_v48 = vrot.slane %v785_v13, 6 }
 0x3f0   :  { %v864_v63 = vsub.f32 0.0, %v862_v57  ;;  %v865_v51 = vsub.f32 0.0, %v863_v18  ;;  %v881_v47 = vadd.f32 %v877_v50, %v3009_v3  ;;  %v882_v35 = vadd.f32 %v878_v48, %v3014_v55 }
 0x3f1   :  { %v854_v3 = vadd.f32 %v853_v7, %v3018_v49  ;;  %v910_v7 = vrot.slane %v3208_v46, 7 }
 0x3f2   :  { %v866_v52 = vmul.f32 1.442695, %v864_v63  ;;  %v868_v36 = vmul.f32 1.442695, %v865_v51  ;;  %v883_v0 = vsub.f32 0.0, %v881_v47  ;;  %v884_v1 = vsub.f32 0.0, %v882_v35 }
 0x3f3   :  { %v896_v11 = vrot.slane %v854_v3, 5  ;;  %v897_v13 = vrot.slane %v854_v3, 6  ;;  %v3484_v3 = vld [vmem:[%s3935_s1 + $0x130] sm:$0xff] }
 0x3f4   :  { %2418 = vpow2.f32 %v866_v52  ;;  %v885_v2 = vmul.f32 1.442695, %v883_v0  ;;  %v887_v14 = vmul.f32 1.442695, %v884_v1  ;;  %v911_v0 = vrot.slane %v3210_v33, 7 }
 0x3f5   :  { %2420 = vpow2.f32 %v868_v36 }
 0x3f6   :  { %2422 = vpow2.f32 %v885_v2 }
 0x3f7   :  { %2424 = vpow2.f32 %v887_v14 }
 0x401   :  { %v2419_v53 = vpop.eup %2418 }
 0x402   :  { %v2421_v38 = vpop.eup %2420  ;;  %v870_v21 = vadd.f32 1.0, %v2419_v53 }
 0x403   :  { %v871_v6 = vadd.f32 1.0, %v2421_v38  ;;  %v2423_v8 = vpop.eup %2422 }
 0x404   :  { %2426 = vrcp.f32 %v870_v21  ;;  %v2425_v9 = vpop.eup %2424  ;;  %v889_v10 = vadd.f32 1.0, %v2423_v8 }
 0x405   :  { %2428 = vrcp.f32 %v871_v6  ;;  %v890_v55 = vadd.f32 1.0, %v2425_v9  ;;  %v3457_v9 = vld [vmem:[%s3935_s1 + $0x178] sm:$0xff] }
 0x406   :  { %2430 = vrcp.f32 %v889_v10  ;;  %v3493_v10 = vld [vmem:[%s3935_s1 + $0x118] sm:$0xff] }
 0x407   :  { %2432 = vrcp.f32 %v890_v55  ;;  %v3502_v55 = vld [vmem:[%s3935_s1 + $0x100] sm:$0xff] }
 0x411   :  { %v2427_v12 = vpop.eup %2426 }
 0x412   :  { %v2429_v57 = vpop.eup %2428  ;;  %v900_v18 = vmul.f32 %v2427_v12, %v896_v11  ;;  %v3511_v11 = vld [vmem:[%s3935_s1 + $0xe8] sm:$0xff]  ;;  %v3520_v12 = vld [vmem:[%s3935_s1 + $0xd0] sm:$0xff] }
 0x413   :  { %v901_v50 = vmul.f32 %v2429_v57, %v897_v13  ;;  %v2431_v51 = vpop.eup %2430  ;;  %v3529_v13 = vld [vmem:[%s3935_s1 + $0xb8] sm:$0xff]  ;;  %v3538_v57 = vld [vmem:[%s3935_s1 + $0xa0] sm:$0xff] }
 0x414   :  { %v902_v48 = vadd.f32 %v900_v18, %v3024_v41  ;;  %v2433_v52 = vpop.eup %2432  ;;  %v906_v36 = vsub.f32 1.0, %v2431_v51  ;;  %v914_v14 = vmul.f32 %v2431_v51, %v910_v7  ;;  %v3547_v18 = vld [vmem:[%s3935_s1 + $0x88] sm:$0xff]  ;;  %v3579_v51 = vld [vmem:[%s3935_s1 + $0x40] sm:$0xff] }
 0x415   :  { %v903_v63 = vadd.f32 %v901_v50, %v3029_v39  ;;  %v907_v35 = vsub.f32 1.0, %v2433_v52  ;;  %v915_v38 = vmul.f32 %v2433_v52, %v911_v0  ;;  %v3556_v50 = vld [vmem:[%s3935_s1 + $0x70] sm:$0xff]  ;;  %4058 = vst [vmem:[#allocation9_spill] sm:$0xff] %v3579_v51  ;;  %v3585_v52 = vld [vmem:[%s3935_s1 + $0x20] sm:$0xff]  ;;  %v3598_v7 = vld [vmem:[%s3935_s1 + $0x28] sm:$0xff] }
 0x416   :  { %2434 = vtanh.f32 %v902_v48  ;;  %4055 = vst [vmem:[#allocation7_spill] sm:$0xff] %v3556_v50  ;;  %v3565_v48 = vld [vmem:[%s3935_s1 + $0x58] sm:$0xff]  ;;  %4059 = vst [vmem:[#allocation10_spill] sm:$0xff] %v3585_v52  ;;  %v3618_v0 = vld [vmem:[%s3935_s1 + $0x10] sm:$0xff] }
 0x417   :  { %2436 = vtanh.f32 %v903_v63  ;;  %4056 = vst [vmem:[#allocation8_spill] sm:$0xff] %v3565_v48  ;;  %v3573_v63 = vld [vmem:[%s3935_s1 + $0x30] sm:$0xff]  ;;  %4061 = vst [vmem:[#allocation11_spill] sm:$0xff] %v3598_v7 }
 0x418   :  { %4057 = vst [vmem:[#allocation14_spill] sm:$0xff] %v3573_v63  ;;  %4064 = vst [vmem:[#allocation4_spill] sm:$0xff] %v3618_v0 }
 0x423   :  { %v2435_v47 = vpop.eup %2434 }
 0x424   :  { %v2437_v1 = vpop.eup %2436  ;;  %v908_v2 = vmul.f32 %v2435_v47, %v906_v36  ;;  %v3592_v36 = vld [vmem:[%s3935_s1 + $0x18] sm:$0xff]  ;;  %v3604_v47 = vld [vmem:[%s3935_s1 + $0x8] sm:$0xff] }
 0x425   :  { %v909_v53 = vmul.f32 %v2437_v1, %v907_v35  ;;  %4060 = vst [vmem:[#allocation15_spill] sm:$0xff] %v3592_v36  ;;  %4062 = vst [vmem:[#allocation12_spill] sm:$0xff] %v3604_v47  ;;  %v3611_v35 = vld [vmem:[%s3935_s1] sm:$0xff] }
 0x426   :  { %v3438_v41 = vadd.f32 %v914_v14, %v908_v2  ;;  %4063 = vst [vmem:[#allocation16_spill] sm:$0xff] %v3611_v35 }
 0x427   :  { %v3440_v39 = vadd.f32 %v915_v38, %v909_v53 }
 0x428   :  { %v920_v21 = vrot.slane %v3438_v41, 3  ;;  %v3445_v6 = vsel %vm1756_vm4, %v3218_v5, %v3438_v41  ;;  %v3466_v5 = vld [vmem:[%s3935_s1 + $0x160] sm:$0xff] }
 0x429   :  { %v921_v46 = vrot.slane %v3440_v39, 2  ;;  %v3450_v33 = vsel %vm1756_vm4, %v3222_v17, %v3440_v39  ;;  %v3475_v17 = vld [vmem:[%s3935_s1 + $0x148] sm:$0xff] }
 0x42b   :  { %v922_v8 = vsel %vm302_vm1, %v921_v46, %v920_v21 }
 0x42c   :  { %989 = vmatmul.mubr.f32.vlgmr.msra.gmra.mxu0 %v922_v8  ;;  %2214 = vmatmul.mubr.f32.vlgmr.msra.gmra.mxu1 %v922_v8 }
 0x42d   :  { %1133 = vmatpush1.msra.mxu0 %v3228_v42  ;;  %2217 = vmatpush3.msra.mxu1 %v3457_v9 }
 0x42e   :  { %1134 = vmatprep.subr.mxu0 %v3235_v61  ;;  %2218 = vmatprep.subr.mxu1 %v4023_v44 }
 0x42f   :  { %1135 = vmatpush1.msra.mxu0 %v3242_v54  ;;  %2219 = vmatpush3.msra.mxu1 %v3466_v5 }
 0x430   :  { %1136 = vmatprep.subr.mxu0 %v3249_v15  ;;  %2220 = vmatprep.subr.mxu1 %v4023_v44 }
 0x431   :  { %1137 = vmatpush1.msra.mxu0 %v3256_v60  ;;  %2221 = vmatpush3.msra.mxu1 %v3475_v17 }
 0x432   :  { %1138 = vmatprep.subr.mxu0 %v3263_v16  ;;  %2222 = vmatprep.subr.mxu1 %v4023_v44 }
 0x433   :  { %1139 = vmatpush1.msra.mxu0 %v3270_v23  ;;  %2223 = vmatpush3.msra.mxu1 %v3484_v3 }
 0x434   :  { %1140 = vmatprep.subr.mxu0 %v3277_v19  ;;  %2224 = vmatprep.subr.mxu1 %v4023_v44 }
 0x435   :  { %1141 = vmatpush1.msra.mxu0 %v3284_v24  ;;  %2225 = vmatpush3.msra.mxu1 %v3493_v10 }
 0x436   :  { %1142 = vmatprep.subr.mxu0 %v3291_v22  ;;  %2226 = vmatprep.subr.mxu1 %v4023_v44 }
 0x437   :  { %1143 = vmatpush1.msra.mxu0 %v3298_v26  ;;  %2227 = vmatpush3.msra.mxu1 %v3502_v55 }
 0x438   :  { %1144 = vmatprep.subr.mxu0 %v3305_v25  ;;  %2228 = vmatprep.subr.mxu1 %v4023_v44 }
 0x439   :  { %1145 = vmatpush1.msra.mxu0 %v3312_v27  ;;  %2229 = vmatpush3.msra.mxu1 %v3511_v11 }
 0x43a   :  { %1146 = vmatprep.subr.mxu0 %v3319_v28  ;;  %2230 = vmatprep.subr.mxu1 %v4023_v44 }
 0x43b   :  { %1147 = vmatpush1.msra.mxu0 %v3326_v29  ;;  %2231 = vmatpush3.msra.mxu1 %v3520_v12 }
 0x43c   :  { %1148 = vmatprep.subr.mxu0 %v3333_v31  ;;  %2232 = vmatprep.subr.mxu1 %v4023_v44 }
 0x43d   :  { %1149 = vmatpush1.msra.mxu0 %v3340_v30  ;;  %2233 = vmatpush3.msra.mxu1 %v3529_v13 }
 0x43e   :  { %1150 = vmatprep.subr.mxu0 %v3347_v34  ;;  %2234 = vmatprep.subr.mxu1 %v4023_v44 }
 0x43f   :  { %1151 = vmatpush1.msra.mxu0 %v3354_v32  ;;  %2235 = vmatpush3.msra.mxu1 %v3538_v57 }
 0x440   :  { %1152 = vmatprep.subr.mxu0 %v3361_v37  ;;  %2236 = vmatprep.subr.mxu1 %v4023_v44 }
 0x441   :  { %1153 = vmatpush1.msra.mxu0 %v3368_v58  ;;  %2237 = vmatpush3.msra.mxu1 %v3547_v18 }
 0x442   :  { %1154 = vmatprep.subr.mxu0 %v3375_v40  ;;  %2238 = vmatprep.subr.mxu1 %v4023_v44 }
 0x443   :  { %1155 = vmatpush1.msra.mxu0 %v3382_v56  ;;  %2239 = vmatpush3.msra.mxu1 %v3556_v50 }
 0x444   :  { %1156 = vmatprep.subr.mxu0 %v3389_v43  ;;  %2240 = vmatprep.subr.mxu1 %v4023_v44 }
 0x445   :  { %1157 = vmatpush1.msra.mxu0 %v3396_v59  ;;  %2241 = vmatpush3.msra.mxu1 %v3565_v48 }
 0x446   :  { %1158 = vmatprep.subr.mxu0 %v3403_v45  ;;  %2242 = vmatprep.subr.mxu1 %v4023_v44 }
 0x447   :  { %1159 = vmatpush1.msra.mxu0 %v3573_v63  ;;  %2243 = vmatpush3.msra.mxu1 %v3579_v51 }
 0x448   :  { %1160 = vmatprep.subr.mxu0 %v3585_v52  ;;  %2244 = vmatprep.subr.mxu1 %v4023_v44 }
 0x449   :  { %1161 = vmatpush1.msra.mxu0 %v3592_v36  ;;  %2245 = vmatpush3.msra.mxu1 %v3598_v7 }
 0x44a   :  { %1162 = vmatprep.subr.mxu0 %v3604_v47  ;;  %2246 = vmatprep.subr.mxu1 %v4023_v44 }
 0x44b   :  { %1163 = vmatpush1.msra.mxu0 %v3611_v35  ;;  %1196 = vmatprep.mubr.f32.mxu0 %v4023_v44 }
 0x44c   :  { %2247 = vmatpush3.msra.mxu1 %v3618_v0  ;;  %2248 = vmatprep.mubr.msk.f32.mxu1 %vm2573_vm0, %v4023_v44  ;;  %v3630_v0 = vld [vmem:[%s3937_s0] sm:$0xff] }
 0x44d   :  { %1340 = vmatprep.subr.mxu0 %v3423_v4  ;;  %2251 = vmatprep.subr.mxu1 %v4023_v44  ;;  %4065 = vst [vmem:[#allocation21_spill] sm:$0xff] %v3630_v0  ;;  %v3636_v4 = vld [vmem:[%s3937_s0 + $0x18] sm:$0xff] }
 0x44e   :  { %4066 = vst [vmem:[#allocation22_spill] sm:$0xff] %v3636_v4 }
 0x4ec   :  { %v990_v1 = vpop.f32.mrf.mxu0  ;;  %v1061_v2 = vpop.f32.mrf.mxu1 }
 0x4ed   :  { %v991_v14 = vadd.f32 %v990_v1, %v4049_v20  ;;  %v1062_v51 = vadd.f32 %v1061_v2, %v3018_v49 }
 0x4ee   :  { %v992_v53 = vpop.f32.mrf.mxu0  ;;  %v2215_v38 = vpop.f32.mrf.mxu1 }
 0x4ef   :  { %v1066_v21 = vrot.slane %v991_v14, 4  ;;  %v1067_v46 = vrot.slane %v991_v14, 5  ;;  %v993_v8 = vadd.f32 %v992_v53, %v4033_v62  ;;  %v3642_v62 = vld [vmem:[%s3937_s0 + $0x8] sm:$0xff] }
 0x4f0   :  { %4067 = vst [vmem:[#allocation23_spill] sm:$0xff] %v3642_v62 }
 0x4f1   :  { %v1070_v35 = vadd.f32 %v3630_v0, %v1066_v21  ;;  %v1071_v1 = vadd.f32 %v3636_v4, %v1067_v46  ;;  %v1085_v20 = vrot.slane %v993_v8, 4  ;;  %v1086_v38 = vrot.slane %v993_v8, 5  ;;  %v3648_v0 = vld [vmem:[%s3937_s0 + $0x20] sm:$0xff] }
 0x4f3   :  { %v1072_v47 = vsub.f32 0.0, %v1070_v35  ;;  %v1073_v14 = vsub.f32 0.0, %v1071_v1  ;;  %v1089_v21 = vadd.f32 %v3642_v62, %v1085_v20  ;;  %v1090_v46 = vadd.f32 %v3648_v0, %v1086_v38 }
 0x4f5   :  { %v1074_v7 = vmul.f32 1.442695, %v1072_v47  ;;  %v1076_v53 = vmul.f32 1.442695, %v1073_v14  ;;  %v1091_v35 = vsub.f32 0.0, %v1089_v21  ;;  %v1092_v8 = vsub.f32 0.0, %v1090_v46 }
 0x4f6   :  { %v1105_v21 = vrot.slane %v1062_v51, 5 }
 0x4f7   :  { %2438 = vpow2.f32 %v1074_v7  ;;  %v1093_v47 = vmul.f32 1.442695, %v1091_v35  ;;  %v1095_v1 = vmul.f32 1.442695, %v1092_v8  ;;  %v1104_v7 = vrot.slane %v1062_v51, 4 }
 0x4f8   :  { %2440 = vpow2.f32 %v1076_v53 }
 0x4f9   :  { %2442 = vpow2.f32 %v1093_v47  ;;  %v1118_v47 = vrot.slane %v3438_v41, 7 }
 0x4fa   :  { %2444 = vpow2.f32 %v1095_v1 }
 0x504   :  { %v2439_v14 = vpop.eup %2438 }
 0x505   :  { %v2441_v4 = vpop.eup %2440  ;;  %v1078_v36 = vadd.f32 1.0, %v2439_v14 }
 0x506   :  { %v1079_v52 = vadd.f32 1.0, %v2441_v4  ;;  %v2443_v20 = vpop.eup %2442  ;;  %v3655_v4 = vld [vmem:[%s3937_s0 + $0x10] sm:$0xff] }
 0x507   :  { %2446 = vrcp.f32 %v1078_v36  ;;  %v2445_v62 = vpop.eup %2444  ;;  %v1097_v63 = vadd.f32 1.0, %v2443_v20  ;;  %v3661_v36 = vld [vmem:[%s3937_s0 + $0x28] sm:$0xff]  ;;  %v1119_v20 = vrot.slane %v3440_v39, 7 }
 0x508   :  { %2448 = vrcp.f32 %v1079_v52  ;;  %v1098_v38 = vadd.f32 1.0, %v2445_v62 }
 0x509   :  { %2450 = vrcp.f32 %v1097_v63 }
 0x50a   :  { %2452 = vrcp.f32 %v1098_v38 }
 0x514   :  { %v2447_v53 = vpop.eup %2446 }
 0x515   :  { %v2449_v46 = vpop.eup %2448  ;;  %v1108_v35 = vmul.f32 %v2447_v53, %v1104_v7 }
 0x516   :  { %v1109_v8 = vmul.f32 %v2449_v46, %v1105_v21  ;;  %v2451_v51 = vpop.eup %2450 }
 0x517   :  { %v1110_v52 = vadd.f32 %v3655_v4, %v1108_v35  ;;  %v2453_v63 = vpop.eup %2452  ;;  %v1114_v2 = vsub.f32 1.0, %v2451_v51  ;;  %v1122_v53 = vmul.f32 %v2451_v51, %v1118_v47  ;;  %v4072_v47 = vld [vmem:[#allocation11_spill] sm:$0xff] }
 0x518   :  { %v1111_v62 = vadd.f32 %v3661_v36, %v1109_v8  ;;  %v1115_v14 = vsub.f32 1.0, %v2453_v63  ;;  %v1123_v46 = vmul.f32 %v2453_v63, %v1119_v20  ;;  %v4070_v63 = vld [vmem:[#allocation10_spill] sm:$0xff]  ;;  %v4075_v20 = vld [vmem:[#allocation4_spill] sm:$0xff] }
 0x519   :  { %2454 = vtanh.f32 %v1110_v52 }
 0x51a   :  { %2456 = vtanh.f32 %v1111_v62 }
 0x526   :  { %v2455_v1 = vpop.eup %2454 }
 0x527   :  { %v2457_v38 = vpop.eup %2456  ;;  %v1116_v7 = vmul.f32 %v2455_v1, %v1114_v2  ;;  %v4071_v2 = vld [vmem:[#allocation15_spill] sm:$0xff]  ;;  %v4073_v1 = vld [vmem:[#allocation12_spill] sm:$0xff] }
 0x528   :  { %v1117_v21 = vmul.f32 %v2457_v38, %v1115_v14  ;;  %v4074_v14 = vld [vmem:[#allocation16_spill] sm:$0xff]  ;;  %v4076_v38 = vld [vmem:[#allocation13_spill] sm:$0xff] }
 0x529   :  { %v3666_v35 = vadd.f32 %v1122_v53, %v1116_v7 }
 0x52a   :  { %v3668_v8 = vadd.f32 %v1123_v46, %v1117_v21  ;;  %v4077_v21 = vld [vmem:[#allocation17_spill] sm:$0xff] }
 0x52b   :  { %v1128_v52 = vrot.slane %v3666_v35, 4  ;;  %v3673_v62 = vsel %vm1759_vm5, %v3445_v6, %v3666_v35  ;;  %v4068_v6 = vld [vmem:[#allocation14_spill] sm:$0xff] }
 0x52c   :  { %v1129_v41 = vrot.slane %v3668_v8, 3  ;;  %v3678_v39 = vsel %vm1759_vm5, %v3450_v33, %v3668_v8  ;;  %v4069_v33 = vld [vmem:[#allocation9_spill] sm:$0xff] }
 0x52e   :  { %v1130_v51 = vsel %vm302_vm1, %v1129_v41, %v1128_v52 }
 0x52f   :  { %1197 = vmatmul.mubr.f32.vlgmr.msra.gmra.mxu0 %v1130_v51  ;;  %2249 = vmatmul.mubr.f32.vlgmr.msra.gmra.mxu1 %v1130_v51 }
 0x530   :  { %1341 = vmatpush1.msra.mxu0 %v3228_v42  ;;  %2252 = vmatpush3.msra.mxu1 %v3457_v9 }
 0x531   :  { %1342 = vmatprep.subr.mxu0 %v3235_v61  ;;  %2253 = vmatprep.subr.mxu1 %v4023_v44 }
 0x532   :  { %1343 = vmatpush1.msra.mxu0 %v3242_v54  ;;  %2254 = vmatpush3.msra.mxu1 %v3466_v5 }
 0x533   :  { %1344 = vmatprep.subr.mxu0 %v3249_v15  ;;  %2255 = vmatprep.subr.mxu1 %v4023_v44 }
 0x534   :  { %1345 = vmatpush1.msra.mxu0 %v3256_v60  ;;  %2256 = vmatpush3.msra.mxu1 %v3475_v17 }
 0x535   :  { %1346 = vmatprep.subr.mxu0 %v3263_v16  ;;  %2257 = vmatprep.subr.mxu1 %v4023_v44 }
 0x536   :  { %1347 = vmatpush1.msra.mxu0 %v3270_v23  ;;  %2258 = vmatpush3.msra.mxu1 %v3484_v3 }
 0x537   :  { %1348 = vmatprep.subr.mxu0 %v3277_v19  ;;  %2259 = vmatprep.subr.mxu1 %v4023_v44 }
 0x538   :  { %1349 = vmatpush1.msra.mxu0 %v3284_v24  ;;  %2260 = vmatpush3.msra.mxu1 %v3493_v10 }
 0x539   :  { %1350 = vmatprep.subr.mxu0 %v3291_v22  ;;  %2261 = vmatprep.subr.mxu1 %v4023_v44 }
 0x53a   :  { %1351 = vmatpush1.msra.mxu0 %v3298_v26  ;;  %2262 = vmatpush3.msra.mxu1 %v3502_v55 }
 0x53b   :  { %1352 = vmatprep.subr.mxu0 %v3305_v25  ;;  %2263 = vmatprep.subr.mxu1 %v4023_v44 }
 0x53c   :  { %1353 = vmatpush1.msra.mxu0 %v3312_v27  ;;  %2264 = vmatpush3.msra.mxu1 %v3511_v11 }
 0x53d   :  { %1354 = vmatprep.subr.mxu0 %v3319_v28  ;;  %2265 = vmatprep.subr.mxu1 %v4023_v44 }
 0x53e   :  { %1355 = vmatpush1.msra.mxu0 %v3326_v29  ;;  %2266 = vmatpush3.msra.mxu1 %v3520_v12 }
 0x53f   :  { %1356 = vmatprep.subr.mxu0 %v3333_v31  ;;  %2267 = vmatprep.subr.mxu1 %v4023_v44 }
 0x540   :  { %1357 = vmatpush1.msra.mxu0 %v3340_v30  ;;  %2268 = vmatpush3.msra.mxu1 %v3529_v13 }
 0x541   :  { %1358 = vmatprep.subr.mxu0 %v3347_v34  ;;  %2269 = vmatprep.subr.mxu1 %v4023_v44 }
 0x542   :  { %1359 = vmatpush1.msra.mxu0 %v3354_v32  ;;  %2270 = vmatpush3.msra.mxu1 %v3538_v57 }
 0x543   :  { %1360 = vmatprep.subr.mxu0 %v3361_v37  ;;  %2271 = vmatprep.subr.mxu1 %v4023_v44 }
 0x544   :  { %1361 = vmatpush1.msra.mxu0 %v3368_v58  ;;  %2272 = vmatpush3.msra.mxu1 %v3547_v18 }
 0x545   :  { %1362 = vmatprep.subr.mxu0 %v3375_v40  ;;  %2273 = vmatprep.subr.mxu1 %v4023_v44 }
 0x546   :  { %1363 = vmatpush1.msra.mxu0 %v3382_v56  ;;  %2274 = vmatpush3.msra.mxu1 %v3556_v50  ;;  %v4081_v50 = vld [vmem:[#allocation23_spill] sm:$0xff] }
 0x547   :  { %1364 = vmatprep.subr.mxu0 %v3389_v43  ;;  %2275 = vmatprep.subr.mxu1 %v4023_v44 }
 0x548   :  { %1365 = vmatpush1.msra.mxu0 %v3396_v59  ;;  %2276 = vmatpush3.msra.mxu1 %v3565_v48 }
 0x549   :  { %1366 = vmatprep.subr.mxu0 %v3403_v45  ;;  %2277 = vmatprep.subr.mxu1 %v4023_v44 }
 0x54a   :  { %1367 = vmatpush1.msra.mxu0 %v4068_v6  ;;  %2278 = vmatpush3.msra.mxu1 %v4069_v33 }
 0x54b   :  { %1368 = vmatprep.subr.mxu0 %v4070_v63  ;;  %2279 = vmatprep.subr.mxu1 %v4023_v44 }
 0x54c   :  { %1369 = vmatpush1.msra.mxu0 %v4071_v2  ;;  %2280 = vmatpush3.msra.mxu1 %v4072_v47  ;;  %v4079_v2 = vld [vmem:[#allocation21_spill] sm:$0xff] }
 0x54d   :  { %1370 = vmatprep.subr.mxu0 %v4073_v1  ;;  %2281 = vmatprep.subr.mxu1 %v4023_v44 }
 0x54e   :  { %1371 = vmatpush1.msra.mxu0 %v4074_v14  ;;  %1404 = vmatprep.mubr.f32.mxu0 %v4023_v44  ;;  %v4078_v14 = vld [vmem:[#allocation18_spill] sm:$0xff] }
 0x54f   :  { %2282 = vmatpush3.msra.mxu1 %v4075_v20  ;;  %2283 = vmatprep.mubr.msk.f32.mxu1 %vm2573_vm0, %v4023_v44  ;;  %v4080_v20 = vld [vmem:[#allocation22_spill] sm:$0xff] }
 0x550   :  { %1548 = vmatprep.subr.mxu0 %v4076_v38  ;;  %2286 = vmatprep.subr.mxu1 %v4023_v44 }
 0x5ef   :  { %v1198_v7 = vpop.f32.mrf.mxu0  ;;  %v1269_v53 = vpop.f32.mrf.mxu1 }
 0x5f0   :  { %v1199_v46 = vadd.f32 %v1198_v7, %v4077_v21 }
 0x5f1   :  { %v1200_v52 = vpop.f32.mrf.mxu0  ;;  %v2250_v41 = vpop.f32.mrf.mxu1 }
 0x5f2   :  { %v1274_v51 = vrot.slane %v1199_v46, 3  ;;  %v1275_v1 = vrot.slane %v1199_v46, 4  ;;  %v1201_v47 = vadd.f32 %v1200_v52, %v4078_v14 }
 0x5f4   :  { %v1278_v63 = vadd.f32 %v4079_v2, %v1274_v51  ;;  %v1279_v33 = vadd.f32 %v4080_v20, %v1275_v1  ;;  %v1293_v6 = vrot.slane %v1201_v47, 3  ;;  %v1294_v45 = vrot.slane %v1201_v47, 4 }
 0x5f6   :  { %v1280_v48 = vsub.f32 0.0, %v1278_v63  ;;  %v1281_v38 = vsub.f32 0.0, %v1279_v33  ;;  %v1297_v56 = vadd.f32 %v4081_v50, %v1293_v6  ;;  %v1298_v7 = vadd.f32 %v3648_v0, %v1294_v45 }
 0x5f7   :  { %v1270_v6 = vadd.f32 %v1269_v53, %v3018_v49  ;;  %v1326_v53 = vrot.slane %v3666_v35, 7 }
 0x5f8   :  { %v1282_v59 = vmul.f32 1.442695, %v1280_v48  ;;  %v1284_v43 = vmul.f32 1.442695, %v1281_v38  ;;  %v1299_v41 = vsub.f32 0.0, %v1297_v56  ;;  %v1300_v46 = vsub.f32 0.0, %v1298_v7 }
 0x5f9   :  { %v1313_v56 = vrot.slane %v1270_v6, 4 }
 0x5fa   :  { %2458 = vpow2.f32 %v1282_v59  ;;  %v1301_v21 = vmul.f32 1.442695, %v1299_v41  ;;  %v1303_v52 = vmul.f32 1.442695, %v1300_v46  ;;  %v1312_v59 = vrot.slane %v1270_v6, 3 }
 0x5fb   :  { %2460 = vpow2.f32 %v1284_v43 }
 0x5fc   :  { %2462 = vpow2.f32 %v1301_v21 }
 0x5fd   :  { %2464 = vpow2.f32 %v1303_v52 }
 0x607   :  { %v2459_v51 = vpop.eup %2458 }
 0x608   :  { %v2461_v1 = vpop.eup %2460  ;;  %v1286_v20 = vadd.f32 1.0, %v2459_v51 }
 0x609   :  { %v1287_v47 = vadd.f32 1.0, %v2461_v1  ;;  %v2463_v48 = vpop.eup %2462 }
 0x60a   :  { %2466 = vrcp.f32 %v1286_v20  ;;  %v2465_v33 = vpop.eup %2464  ;;  %v1305_v63 = vadd.f32 1.0, %v2463_v48  ;;  %v1327_v48 = vrot.slane %v3668_v8, 7 }
 0x60b   :  { %2468 = vrcp.f32 %v1287_v47  ;;  %v1306_v45 = vadd.f32 1.0, %v2465_v33 }
 0x60c   :  { %2470 = vrcp.f32 %v1305_v63 }
 0x60d   :  { %2472 = vrcp.f32 %v1306_v45 }
 0x617   :  { %v2467_v43 = vpop.eup %2466 }
 0x618   :  { %v2469_v38 = vpop.eup %2468  ;;  %v1316_v7 = vmul.f32 %v2467_v43, %v1312_v59 }
 0x619   :  { %v1317_v21 = vmul.f32 %v2469_v38, %v1313_v56  ;;  %v2471_v20 = vpop.eup %2470 }
 0x61a   :  { %v1318_v41 = vadd.f32 %v3655_v4, %v1316_v7  ;;  %v2473_v52 = vpop.eup %2472  ;;  %v1322_v51 = vsub.f32 1.0, %v2471_v20  ;;  %v1330_v63 = vmul.f32 %v2471_v20, %v1326_v53 }
 0x61b   :  { %v1319_v46 = vadd.f32 %v3661_v36, %v1317_v21  ;;  %v1323_v47 = vsub.f32 1.0, %v2473_v52  ;;  %v1331_v45 = vmul.f32 %v2473_v52, %v1327_v48 }
 0x61c   :  { %2474 = vtanh.f32 %v1318_v41 }
 0x61d   :  { %2476 = vtanh.f32 %v1319_v46 }
 0x629   :  { %v2475_v1 = vpop.eup %2474 }
 0x62a   :  { %v2477_v33 = vpop.eup %2476  ;;  %v1324_v6 = vmul.f32 %v2475_v1, %v1322_v51 }
 0x62b   :  { %v1325_v59 = vmul.f32 %v2477_v33, %v1323_v47 }
 0x62c   :  { %v3759_v43 = vadd.f32 %v1330_v63, %v1324_v6 }
 0x62d   :  { %v3761_v56 = vadd.f32 %v1331_v45, %v1325_v59 }
 0x62e   :  { %v1336_v38 = vrot.slane %v3759_v43, 5  ;;  %v3766_v7 = vsel %vm1762_vm6, %v3673_v62, %v3759_v43 }
 0x62f   :  { %v1337_v35 = vrot.slane %v3761_v56, 4  ;;  %v3771_v8 = vsel %vm1762_vm6, %v3678_v39, %v3761_v56 }
 0x631   :  { %v1338_v21 = vsel %vm302_vm1, %v1337_v35, %v1336_v38 }
 0x632   :  { %1405 = vmatmul.mubr.f32.vlgmr.msra.gmra.mxu0 %v1338_v21  ;;  %2284 = vmatmul.mubr.f32.vlgmr.msra.gmra.mxu1 %v1338_v21 }
 0x633   :  { %1549 = vmatpush1.msra.mxu0 %v3228_v42  ;;  %2287 = vmatpush3.msra.mxu1 %v3457_v9  ;;  %v4082_v42 = vld [vmem:[#allocation20_spill] sm:$0xff] }
 0x634   :  { %1550 = vmatprep.subr.mxu0 %v3235_v61  ;;  %2288 = vmatprep.subr.mxu1 %v4023_v44  ;;  %v4083_v61 = vld [vmem:[#allocation7_spill] sm:$0xff] }
 0x635   :  { %1551 = vmatpush1.msra.mxu0 %v3242_v54  ;;  %2289 = vmatpush3.msra.mxu1 %v3466_v5  ;;  %v4084_v54 = vld [vmem:[#allocation19_spill] sm:$0xff] }
 0x636   :  { %1552 = vmatprep.subr.mxu0 %v3249_v15  ;;  %2290 = vmatprep.subr.mxu1 %v4023_v44  ;;  %v4085_v15 = vld [vmem:[#allocation5_spill] sm:$0xff] }
 0x637   :  { %1553 = vmatpush1.msra.mxu0 %v3256_v60  ;;  %2291 = vmatpush3.msra.mxu1 %v3475_v17  ;;  %v4086_v60 = vld [vmem:[#allocation8_spill] sm:$0xff]  ;;  %v4097_v17 = vld [vmem:[#allocation22_spill] sm:$0xff] }
 0x638   :  { %1554 = vmatprep.subr.mxu0 %v3263_v16  ;;  %2292 = vmatprep.subr.mxu1 %v4023_v44  ;;  %v4087_v16 = vld [vmem:[#allocation6_spill] sm:$0xff] }
 0x639   :  { %1555 = vmatpush1.msra.mxu0 %v3270_v23  ;;  %2293 = vmatpush3.msra.mxu1 %v3484_v3  ;;  %v4088_v23 = vld [vmem:[#allocation14_spill] sm:$0xff] }
 0x63a   :  { %1556 = vmatprep.subr.mxu0 %v3277_v19  ;;  %2294 = vmatprep.subr.mxu1 %v4023_v44  ;;  %v4089_v19 = vld [vmem:[#allocation9_spill] sm:$0xff] }
 0x63b   :  { %1557 = vmatpush1.msra.mxu0 %v3284_v24  ;;  %2295 = vmatpush3.msra.mxu1 %v3493_v10  ;;  %v4090_v24 = vld [vmem:[#allocation10_spill] sm:$0xff] }
 0x63c   :  { %1558 = vmatprep.subr.mxu0 %v3291_v22  ;;  %2296 = vmatprep.subr.mxu1 %v4023_v44  ;;  %v4091_v22 = vld [vmem:[#allocation15_spill] sm:$0xff] }
 0x63d   :  { %1559 = vmatpush1.msra.mxu0 %v3298_v26  ;;  %2297 = vmatpush3.msra.mxu1 %v3502_v55  ;;  %v4092_v26 = vld [vmem:[#allocation11_spill] sm:$0xff] }
 0x63e   :  { %1560 = vmatprep.subr.mxu0 %v3305_v25  ;;  %2298 = vmatprep.subr.mxu1 %v4023_v44  ;;  %v4093_v25 = vld [vmem:[#allocation12_spill] sm:$0xff] }
 0x63f   :  { %1561 = vmatpush1.msra.mxu0 %v3312_v27  ;;  %2299 = vmatpush3.msra.mxu1 %v3511_v11  ;;  %v4094_v27 = vld [vmem:[#allocation16_spill] sm:$0xff] }
 0x640   :  { %1562 = vmatprep.subr.mxu0 %v3319_v28  ;;  %2300 = vmatprep.subr.mxu1 %v4023_v44  ;;  %v4095_v28 = vld [vmem:[#allocation4_spill] sm:$0xff] }
 0x641   :  { %1563 = vmatpush1.msra.mxu0 %v3326_v29  ;;  %2301 = vmatpush3.msra.mxu1 %v3520_v12 }
 0x642   :  { %1564 = vmatprep.subr.mxu0 %v3333_v31  ;;  %2302 = vmatprep.subr.mxu1 %v4023_v44 }
 0x643   :  { %1565 = vmatpush1.msra.mxu0 %v3340_v30  ;;  %2303 = vmatpush3.msra.mxu1 %v3529_v13  ;;  %v4096_v30 = vld [vmem:[#allocation17_spill] sm:$0xff] }
 0x644   :  { %1566 = vmatprep.subr.mxu0 %v3347_v34  ;;  %2304 = vmatprep.subr.mxu1 %v4023_v44 }
 0x645   :  { %1567 = vmatpush1.msra.mxu0 %v3354_v32  ;;  %2305 = vmatpush3.msra.mxu1 %v3538_v57 }
 0x646   :  { %1568 = vmatprep.subr.mxu0 %v3361_v37  ;;  %2306 = vmatprep.subr.mxu1 %v4023_v44 }
 0x647   :  { %1569 = vmatpush1.msra.mxu0 %v3368_v58  ;;  %2307 = vmatpush3.msra.mxu1 %v3547_v18 }
 0x648   :  { %1570 = vmatprep.subr.mxu0 %v3375_v40  ;;  %2308 = vmatprep.subr.mxu1 %v4023_v44 }
 0x649   :  { %1571 = vmatpush1.msra.mxu0 %v4082_v42  ;;  %2309 = vmatpush3.msra.mxu1 %v4083_v61 }
 0x64a   :  { %1572 = vmatprep.subr.mxu0 %v4084_v54  ;;  %2310 = vmatprep.subr.mxu1 %v4023_v44 }
 0x64b   :  { %1573 = vmatpush1.msra.mxu0 %v4085_v15  ;;  %2311 = vmatpush3.msra.mxu1 %v4086_v60 }
 0x64c   :  { %1574 = vmatprep.subr.mxu0 %v4087_v16  ;;  %2312 = vmatprep.subr.mxu1 %v4023_v44  ;;  %v1534_v16 = vrot.slane %v3759_v43, 7 }
 0x64d   :  { %1575 = vmatpush1.msra.mxu0 %v4088_v23  ;;  %2313 = vmatpush3.msra.mxu1 %v4089_v19 }
 0x64e   :  { %1576 = vmatprep.subr.mxu0 %v4090_v24  ;;  %2314 = vmatprep.subr.mxu1 %v4023_v44  ;;  %v1535_v24 = vrot.slane %v3761_v56, 7 }
 0x64f   :  { %1577 = vmatpush1.msra.mxu0 %v4091_v22  ;;  %2315 = vmatpush3.msra.mxu1 %v4092_v26 }
 0x650   :  { %1578 = vmatprep.subr.mxu0 %v4093_v25  ;;  %2316 = vmatprep.subr.mxu1 %v4023_v44 }
 0x651   :  { %1579 = vmatpush1.msra.mxu0 %v4094_v27  ;;  %1612 = vmatprep.mubr.f32.mxu0 %v4023_v44 }
 0x652   :  { %2317 = vmatpush3.msra.mxu1 %v4095_v28  ;;  %2318 = vmatprep.mubr.msk.f32.mxu1 %vm2573_vm0, %v4023_v44 }
 0x6f2   :  { %v1406_v29 = vpop.f32.mrf.mxu0  ;;  %v1477_v31 = vpop.f32.mrf.mxu1 }
 0x6f3   :  { %v1407_v34 = vadd.f32 %v1406_v29, %v4096_v30  ;;  %v1478_v48 = vadd.f32 %v1477_v31, %v3018_v49 }
 0x6f4   :  { %v1408_v32 = vpop.f32.mrf.mxu0  ;;  %v2285_v37 = vpop.f32.mrf.mxu1 }
 0x6f5   :  { %v1482_v58 = vrot.slane %v1407_v34, 2  ;;  %v1483_v40 = vrot.slane %v1407_v34, 3  ;;  %v1409_v9 = vadd.f32 %v1408_v32, %v4078_v14  ;;  %v1520_v63 = vrot.slane %v1478_v48, 2 }
 0x6f6   :  { %v1521_v45 = vrot.slane %v1478_v48, 3 }
 0x6f7   :  { %v1486_v5 = vadd.f32 %v4079_v2, %v1482_v58  ;;  %v1487_v3 = vadd.f32 %v4097_v17, %v1483_v40  ;;  %v1501_v10 = vrot.slane %v1409_v9, 2  ;;  %v1502_v55 = vrot.slane %v1409_v9, 3  ;;  %v1797_v58 = vld [vmem:[%s3938_s3 + $0x78] sm:$0xff]  ;;  %v1794_v40 = vld [vmem:[%s3938_s3 + $0x60] sm:$0xff] }
 0x6f8   :  { %2321 = vmatprep.subr.mxu0 %v1797_v58  ;;  %v1793_v9 = vld [vmem:[%s3938_s3 + $0x58] sm:$0xff] }
 0x6f9   :  { %v1488_v11 = vsub.f32 0.0, %v1486_v5  ;;  %v1489_v12 = vsub.f32 0.0, %v1487_v3  ;;  %v1505_v57 = vadd.f32 %v4081_v50, %v1501_v10  ;;  %v1506_v18 = vadd.f32 %v3648_v0, %v1502_v55  ;;  %v1792_v5 = vld [vmem:[%s3938_s3 + $0x50] sm:$0xff]  ;;  %v1791_v3 = vld [vmem:[%s3938_s3 + $0x48] sm:$0xff]  ;;  %v1790_v10 = vld [vmem:[%s3938_s3 + $0x40] sm:$0xff] }
 0x6fa   :  { %v1789_v55 = vld [vmem:[%s3938_s3 + $0x38] sm:$0xff] }
 0x6fb   :  { %v1490_v13 = vmul.f32 1.442695, %v1488_v11  ;;  %v1492_v44 = vmul.f32 1.442695, %v1489_v12  ;;  %v1507_v62 = vsub.f32 0.0, %v1505_v57  ;;  %v1508_v39 = vsub.f32 0.0, %v1506_v18 }
 0x6fc   :  { %v1788_v11 = vld [vmem:[%s3938_s3 + $0x30] sm:$0xff]  ;;  %v1787_v12 = vld [vmem:[%s3938_s3 + $0x28] sm:$0xff] }
 0x6fd   :  { %2478 = vpow2.f32 %v1490_v13  ;;  %v1509_v41 = vmul.f32 1.442695, %v1507_v62  ;;  %v1511_v46 = vmul.f32 1.442695, %v1508_v39  ;;  %v1786_v13 = vld [vmem:[%s3938_s3 + $0x20] sm:$0xff]  ;;  %v1784_v57 = vld [vmem:[%s3938_s3 + $0x10] sm:$0xff] }
 0x6fe   :  { %2480 = vpow2.f32 %v1492_v44  ;;  %v1785_v44 = vld [vmem:[%s3938_s3 + $0x18] sm:$0xff]  ;;  %v1783_v18 = vld [vmem:[%s3938_s3 + $0x8] sm:$0xff]  ;;  %v1782_v62 = vld [vmem:[%s3938_s3] sm:$0xff] }
 0x6ff   :  { %2482 = vpow2.f32 %v1509_v41 }
 0x700   :  { %2484 = vpow2.f32 %v1511_v46 }
 0x70a   :  { %v2479_v20 = vpop.eup %2478 }
 0x70b   :  { %v2481_v52 = vpop.eup %2480  ;;  %v1494_v51 = vadd.f32 1.0, %v2479_v20 }
 0x70c   :  { %v1495_v53 = vadd.f32 1.0, %v2481_v52  ;;  %v2483_v1 = vpop.eup %2482 }
 0x70d   :  { %2486 = vrcp.f32 %v1494_v51  ;;  %v2485_v47 = vpop.eup %2484  ;;  %v1513_v33 = vadd.f32 1.0, %v2483_v1 }
 0x70e   :  { %2488 = vrcp.f32 %v1495_v53  ;;  %v1514_v6 = vadd.f32 1.0, %v2485_v47 }
 0x70f   :  { %2490 = vrcp.f32 %v1513_v33 }
 0x710   :  { %2492 = vrcp.f32 %v1514_v6 }
 0x71a   :  { %v2487_v59 = vpop.eup %2486 }
 0x71b   :  { %v2489_v38 = vpop.eup %2488  ;;  %v1524_v35 = vmul.f32 %v2487_v59, %v1520_v63 }
 0x71c   :  { %v1525_v21 = vmul.f32 %v2489_v38, %v1521_v45  ;;  %v2491_v54 = vpop.eup %2490 }
 0x71d   :  { %v1526_v42 = vadd.f32 %v3655_v4, %v1524_v35  ;;  %v2493_v15 = vpop.eup %2492  ;;  %v1530_v60 = vsub.f32 1.0, %v2491_v54  ;;  %v1538_v25 = vmul.f32 %v2491_v54, %v1534_v16 }
 0x71e   :  { %v1527_v61 = vadd.f32 %v3661_v36, %v1525_v21  ;;  %v1531_v19 = vsub.f32 1.0, %v2493_v15  ;;  %v1539_v28 = vmul.f32 %v2493_v15, %v1535_v24 }
 0x71f   :  { %2494 = vtanh.f32 %v1526_v42 }
 0x720   :  { %2496 = vtanh.f32 %v1527_v61 }
 0x72c   :  { %v2495_v23 = vpop.eup %2494 }
 0x72d   :  { %v2497_v22 = vpop.eup %2496  ;;  %v1532_v26 = vmul.f32 %v2495_v23, %v1530_v60 }
 0x72e   :  { %v1533_v27 = vmul.f32 %v2497_v22, %v1531_v19 }
 0x72f   :  { %v3850_v29 = vadd.f32 %v1538_v25, %v1532_v26 }
 0x730   :  { %v3852_v31 = vadd.f32 %v1539_v28, %v1533_v27 }
 0x731   :  { %v1544_v34 = vrot.slane %v3850_v29, 6  ;;  %v3857_v32 = vsel %vm1765_vm7, %v3766_v7, %v3850_v29  ;;  %v1796_v7 = vld [vmem:[%s3938_s3 + $0x70] sm:$0xff] }
 0x732   :  { %v1545_v43 = vrot.slane %v3852_v31, 5  ;;  %v3862_v56 = vsel %vm1765_vm7, %v3771_v8, %v3852_v31  ;;  %v1795_v8 = vld [vmem:[%s3938_s3 + $0x68] sm:$0xff] }
 0x734   :  { %v1546_v37 = vsel %vm302_vm1, %v1545_v43, %v1544_v34 }
 0x735   :  { %1613 = vmatmul.mubr.f32.vlgmr.msra.gmra.mxu0 %v1546_v37  ;;  %2319 = vmatmul.mubr.f32.vlgmr.msra.gmra.mxu1 %v1546_v37 }
 0x736   :  { %2322 = vmatpush3.msra.mxu0 %v1797_v58 }
 0x737   :  { %2323 = vmatprep.subr.mxu0 %v1796_v7 }
 0x738   :  { %2324 = vmatpush3.msra.mxu0 %v1796_v7 }
 0x739   :  { %2325 = vmatprep.subr.mxu0 %v1795_v8 }
 0x73a   :  { %2326 = vmatpush3.msra.mxu0 %v1795_v8 }
 0x73b   :  { %2327 = vmatprep.subr.mxu0 %v1794_v40 }
 0x73c   :  { %2328 = vmatpush3.msra.mxu0 %v1794_v40  ;;  %v1743_v40 = vrot.slane %v3852_v31, 7 }
 0x73d   :  { %2329 = vmatprep.subr.mxu0 %v1793_v9 }
 0x73e   :  { %2330 = vmatpush3.msra.mxu0 %v1793_v9 }
 0x73f   :  { %2331 = vmatprep.subr.mxu0 %v1792_v5 }
 0x740   :  { %2332 = vmatpush3.msra.mxu0 %v1792_v5 }
 0x741   :  { %2333 = vmatprep.subr.mxu0 %v1791_v3 }
 0x742   :  { %2334 = vmatpush3.msra.mxu0 %v1791_v3 }
 0x743   :  { %2335 = vmatprep.subr.mxu0 %v1790_v10 }
 0x744   :  { %2336 = vmatpush3.msra.mxu0 %v1790_v10 }
 0x745   :  { %2337 = vmatprep.subr.mxu0 %v1789_v55 }
 0x746   :  { %2338 = vmatpush3.msra.mxu0 %v1789_v55 }
 0x747   :  { %2339 = vmatprep.subr.mxu0 %v1788_v11 }
 0x748   :  { %2340 = vmatpush3.msra.mxu0 %v1788_v11 }
 0x749   :  { %2341 = vmatprep.subr.mxu0 %v1787_v12 }
 0x74a   :  { %2342 = vmatpush3.msra.mxu0 %v1787_v12 }
 0x74b   :  { %2343 = vmatprep.subr.mxu0 %v1786_v13 }
 0x74c   :  { %2344 = vmatpush3.msra.mxu0 %v1786_v13 }
 0x74d   :  { %2345 = vmatprep.subr.mxu0 %v1785_v44 }
 0x74e   :  { %2346 = vmatpush3.msra.mxu0 %v1785_v44 }
 0x74f   :  { %2347 = vmatprep.subr.mxu0 %v1784_v57 }
 0x750   :  { %2348 = vmatpush3.msra.mxu0 %v1784_v57 }
 0x751   :  { %2349 = vmatprep.subr.mxu0 %v1783_v18 }
 0x752   :  { %2350 = vmatpush3.msra.mxu0 %v1783_v18 }
 0x753   :  { %2351 = vmatprep.subr.mxu0 %v1782_v62 }
 0x754   :  { %2352 = vmatpush3.msra.mxu0 %v1782_v62 }
 0x7f5   :  { %v1614_v39 = vpop.f32.mrf.mxu0  ;;  %v1685_v41 = vpop.f32.mrf.mxu1 }
 0x7f6   :  { %v1615_v46 = vadd.f32 %v1614_v39, %v4096_v30 }
 0x7f7   :  { %v1616_v20 = vpop.f32.mrf.mxu0  ;;  %v2320_v52 = vpop.f32.mrf.mxu1 }
 0x7f8   :  { %v1690_v51 = vrot.slane %v1615_v46, 1  ;;  %v1691_v53 = vrot.slane %v1615_v46, 2  ;;  %v1617_v1 = vadd.f32 %v1616_v20, %v4078_v14 }
 0x7fa   :  { %v1694_v47 = vadd.f32 %v4079_v2, %v1690_v51  ;;  %v1695_v48 = vadd.f32 %v4097_v17, %v1691_v53  ;;  %v1709_v33 = vrot.slane %v1617_v1, 1  ;;  %v1710_v6 = vrot.slane %v1617_v1, 2 }
 0x7fc   :  { %v1696_v63 = vsub.f32 0.0, %v1694_v47  ;;  %v1697_v59 = vsub.f32 0.0, %v1695_v48  ;;  %v1713_v35 = vadd.f32 %v4081_v50, %v1709_v33  ;;  %v1714_v30 = vadd.f32 %v3648_v0, %v1710_v6 }
 0x7fd   :  { %v1686_v50 = vadd.f32 %v1685_v41, %v3018_v49  ;;  %v1742_v49 = vrot.slane %v3850_v29, 7  ;;  %v1886_v29 = vld [vmem:[%s3939_s4] ss:$0 sm:$0xff] }
 0x7fe   :  { %v1698_v45 = vmul.f32 1.442695, %v1696_v63  ;;  %v1700_v38 = vmul.f32 1.442695, %v1697_v59  ;;  %v1715_v21 = vsub.f32 0.0, %v1713_v35  ;;  %v1716_v42 = vsub.f32 0.0, %v1714_v30 }
 0x7ff   :  { %v1728_v19 = vrot.slane %v1686_v50, 1  ;;  %v1729_v22 = vrot.slane %v1686_v50, 2 }
 0x800   :  { %2498 = vpow2.f32 %v1698_v45  ;;  %v1717_v61 = vmul.f32 1.442695, %v1715_v21  ;;  %v1719_v14 = vmul.f32 1.442695, %v1716_v42 }
 0x801   :  { %2500 = vpow2.f32 %v1700_v38 }
 0x802   :  { %2502 = vpow2.f32 %v1717_v61 }
 0x803   :  { %2504 = vpow2.f32 %v1719_v14 }
 0x80d   :  { %v2499_v2 = vpop.eup %2498 }
 0x80e   :  { %v2501_v17 = vpop.eup %2500  ;;  %v1702_v54 = vadd.f32 1.0, %v2499_v2 }
 0x80f   :  { %v1703_v15 = vadd.f32 1.0, %v2501_v17  ;;  %v2503_v60 = vpop.eup %2502 }
 0x810   :  { %2506 = vrcp.f32 %v1702_v54  ;;  %v2505_v16 = vpop.eup %2504  ;;  %v1721_v23 = vadd.f32 1.0, %v2503_v60 }
 0x811   :  { %2508 = vrcp.f32 %v1703_v15  ;;  %v1722_v0 = vadd.f32 1.0, %v2505_v16 }
 0x812   :  { %2510 = vrcp.f32 %v1721_v23 }
 0x813   :  { %2512 = vrcp.f32 %v1722_v0 }
 0x81d   :  { %v2507_v24 = vpop.eup %2506 }
 0x81e   :  { %v2509_v26 = vpop.eup %2508  ;;  %v1732_v25 = vmul.f32 %v2507_v24, %v1728_v19 }
 0x81f   :  { %v1733_v27 = vmul.f32 %v2509_v26, %v1729_v22  ;;  %v2511_v43 = vpop.eup %2510 }
 0x820   :  { %v1734_v28 = vadd.f32 %v3655_v4, %v1732_v25  ;;  %v2513_v37 = vpop.eup %2512  ;;  %v1738_v58 = vsub.f32 1.0, %v2511_v43  ;;  %v1746_v3 = vmul.f32 %v2511_v43, %v1742_v49 }
 0x821   :  { %v1735_v34 = vadd.f32 %v3661_v36, %v1733_v27  ;;  %v1739_v8 = vsub.f32 1.0, %v2513_v37  ;;  %v1747_v55 = vmul.f32 %v2513_v37, %v1743_v40 }
 0x822   :  { %2514 = vtanh.f32 %v1734_v28 }
 0x823   :  { %2516 = vtanh.f32 %v1735_v34 }
 0x82f   :  { %v2515_v7 = vpop.eup %2514 }
 0x830   :  { %v2517_v9 = vpop.eup %2516  ;;  %v1740_v5 = vmul.f32 %v2515_v7, %v1738_v58 }
 0x831   :  { %v1741_v10 = vmul.f32 %v2517_v9, %v1739_v8 }
 0x832   :  { %v1748_v4 = vadd.f32 %v1746_v3, %v1740_v5 }
 0x833   :  { %v1749_v11 = vadd.f32 %v1747_v55, %v1741_v10 }
 0x834   :  { %v1769_v36 = vsel %vm1768_vm8, %v3857_v32, %v1748_v4  ;;  %1778 = vst [vmem:[#allocation2 - $0x7] sm:$0x80] %v1748_v4 }
 0x835   :  { %2353 = vmatprep.mubr.f32.mxu0 %v1769_v36  ;;  %v1770_v12 = vsel %vm1768_vm8, %v3862_v56, %v1749_v11  ;;  %v1775_v13 = vrot.slane %v1749_v11, 7 }
 0x836   :  { %2354 = vmatmul.mubr.f32.vlgmr.msra.gmra.mxu0 %v1770_v12 }
 0x837   :  { %1779 = vst [vmem:[#allocation2 + $0x1] sm:$0x1] %v1775_v13 }
 0x8f6   :  { %v2355_v31 = vpop.f32.mrf.mxu0 }
 0x8f7   :  { %v1877_v44 = vadd.f32 %v2355_v31, %v1886_v29 }
 0x8f8   :  { %v1871_v57 = vpop.f32.mrf.mxu0 }
 0x8f9   :  { %1881 = vst [vmem:[%s3940_s5 + $0x8] sm:$0xff] %v1877_v44  ;;  %v1872_v18 = vadd.f32 %v1886_v29, %v1871_v57 }
 0x8fb   :  { %1880 = vst [vmem:[%s3940_s5] sm:$0xff] %v1872_v18 }

</bundles_post_ra>
